<compile_context>
chip_gen: v7x
topology: tpu7x:2x2x1
jax: 0.10.0
libtpu: 0.0.40
codegen_flags: <defaults>
</compile_context>

<pallas_src>
import jax
import jax.numpy as jnp
from jax.experimental import pallas as pl
from jax.experimental.pallas import tpu as pltpu

INPUT_DIM = 32 * 32 * 3   # 3072
HIDDEN_DIM = 512
NUM_CLASSES = 10
LANE = 128                # lane width / class-dim padding target
DEFAULT_TILE_B = 256      # fills v6e/v7x 2x256 MXU; also a 128-multiple for v5e


def _round_up(n: int, m: int) -> int:
    return (n + m - 1) // m * m


def _mlp_kernel(x_ref, w1_ref, b1_ref, w2_ref, b2_ref, o_ref):
    # x:  (TILE_B, 3072) bf16     w1: (3072, 512) bf16   b1: (1, 512) f32
    # w2: (512, C_pad)   bf16     b2: (1, C_pad)  f32    o:  (TILE_B, C_pad) f32
    h = jnp.dot(x_ref[...], w1_ref[...], preferred_element_type=jnp.float32)
    h = jnp.maximum(h + b1_ref[...], 0.0)           # bias + ReLU on VPU (hidden under MXU)
    out = jnp.dot(h.astype(jnp.bfloat16), w2_ref[...],
                  preferred_element_type=jnp.float32)
    o_ref[...] = (out + b2_ref[...]).astype(o_ref.dtype)


def ann1h3d_forward(x_nchw, w1, b1, w2, b2, *, tile_b=DEFAULT_TILE_B):
    """x_nchw: (B, 3, 32, 32) float32. Returns logits (B, num_classes) float32."""
    B = x_nchw.shape[0]
    num_classes = w2.shape[1]
    c_pad = _round_up(max(num_classes, LANE), LANE)          # lane-dense output width

    # --- host-side glue: flatten (same ordering as torch .view), cast, pad ---
    x_flat = x_nchw.reshape(B, -1).astype(jnp.bfloat16)
    # Batch tile: tile_b for real batches; for tiny batches a single
    # sublane-aligned tile (multiple of 8) covering the whole (padded) batch.
    if B >= tile_b:
        tile_b_eff = tile_b
    else:
        tile_b_eff = max(8, _round_up(B, 8))
    b_pad = _round_up(B, tile_b_eff)
    if b_pad != B:
        x_flat = jnp.pad(x_flat, ((0, b_pad - B), (0, 0)))   # zero rows -> sliced off below

    w1_bf = w1.astype(jnp.bfloat16)
    w2_bf = jnp.pad(w2, ((0, 0), (0, c_pad - num_classes))).astype(jnp.bfloat16)
    b1_2d = b1.reshape(1, -1).astype(jnp.float32)
    b2_2d = jnp.pad(b2.reshape(1, -1), ((0, 0), (0, c_pad - num_classes))).astype(jnp.float32)

    grid = (b_pad // tile_b_eff,)

    cost = pl.CostEstimate(
        flops=2 * b_pad * INPUT_DIM * HIDDEN_DIM + 2 * b_pad * HIDDEN_DIM * c_pad,
        transcendentals=0,
        bytes_accessed=(x_flat.size * 2 + w1_bf.size * 2 + w2_bf.size * 2
                        + b1_2d.size * 4 + b2_2d.size * 4 + b_pad * c_pad * 4),
    )

    out = pl.pallas_call(
        _mlp_kernel,
        out_shape=jax.ShapeDtypeStruct((b_pad, c_pad), jnp.float32),
        grid=grid,
        in_specs=[
            pl.BlockSpec((tile_b_eff, INPUT_DIM), lambda i: (i, 0)),   # x tile streams over B
            pl.BlockSpec((INPUT_DIM, HIDDEN_DIM), lambda i: (0, 0)),   # w1 resident
            pl.BlockSpec((1, HIDDEN_DIM), lambda i: (0, 0)),           # b1 resident
            pl.BlockSpec((HIDDEN_DIM, c_pad), lambda i: (0, 0)),       # w2 resident
            pl.BlockSpec((1, c_pad), lambda i: (0, 0)),                # b2 resident
        ],
        out_specs=pl.BlockSpec((tile_b_eff, c_pad), lambda i: (i, 0)),
        compiler_params=pltpu.CompilerParams(
            dimension_semantics=("parallel",),
        ),
        cost_estimate=cost,
    )(x_flat, w1_bf, b1_2d, w2_bf, b2_2d)

    return out[:B, :num_classes]


def init_params(key):
    """Deterministic PyTorch-style (Kaiming-uniform-ish) init; weights stored (in, out)."""
    k1, k2, k3, k4 = jax.random.split(key, 4)
    bound1 = 1.0 / (INPUT_DIM ** 0.5)
    bound2 = 1.0 / (HIDDEN_DIM ** 0.5)
    w1 = jax.random.uniform(k1, (INPUT_DIM, HIDDEN_DIM), jnp.float32,
                            minval=-bound1, maxval=bound1)
    b1 = jax.random.uniform(k2, (HIDDEN_DIM,), jnp.float32,
                            minval=-bound1, maxval=bound1)
    w2 = jax.random.uniform(k3, (HIDDEN_DIM, NUM_CLASSES), jnp.float32,
                            minval=-bound2, maxval=bound2)
    b2 = jax.random.uniform(k4, (NUM_CLASSES,), jnp.float32,
                            minval=-bound2, maxval=bound2)
    return w1, b1, w2, b2


if __name__ == "__main__":
    key = jax.random.PRNGKey(0)
    kx, kp = jax.random.split(key)

    B = 8
    x = jax.random.normal(kx, (B, 3, 32, 32), jnp.float32)   # NCHW, like torch
    w1, b1, w2, b2 = init_params(kp)

    logits = ann1h3d_forward(x, w1, b1, w2, b2)
    jax.block_until_ready(logits)

    # Pure-JAX fp32 reference; bf16 kernel inputs loosen the tolerance.
    x_flat = x.reshape(B, -1)
    ref = jnp.maximum(x_flat @ w1 + b1, 0.0) @ w2 + b2
    assert logits.shape == (B, NUM_CLASSES)
    assert jnp.allclose(logits, ref, atol=5e-2, rtol=5e-2), (
        float(jnp.max(jnp.abs(logits - ref))))

    print("KERNEL_OK")
</pallas_src>

<mosaic_0001>
module attributes {stable_mosaic.version = 11 : i64} {
  func.func @_mlp_kernel(%arg0: i32, %arg1: memref<8x3072xbf16, #tpu.memory_space<vmem>>, %arg2: memref<3072x512xbf16, #tpu.memory_space<vmem>>, %arg3: memref<1x512xf32, #tpu.memory_space<vmem>>, %arg4: memref<512x128xbf16, #tpu.memory_space<vmem>>, %arg5: memref<1x128xf32, #tpu.memory_space<vmem>>, %arg6: memref<8x128xf32, #tpu.memory_space<vmem>>) attributes {dimension_semantics = [#tpu.dimension_semantics<parallel>], iteration_bounds = array<i64: 1>, scalar_prefetch = 0 : i64, scratch_operands = 0 : i64, tpu.core_type = #tpu.core_type<tc>, window_params = [{transform_indices = @transform_0, window_bounds = array<i64: 8, 3072>}, {pipeline_mode = #tpu.pipeline_mode<synchronous>, transform_indices = @transform_1, window_bounds = array<i64: 3072, 512>}, {pipeline_mode = #tpu.pipeline_mode<synchronous>, transform_indices = @transform_2, window_bounds = array<i64: 1, 512>}, {pipeline_mode = #tpu.pipeline_mode<synchronous>, transform_indices = @transform_3, window_bounds = array<i64: 512, 128>}, {pipeline_mode = #tpu.pipeline_mode<synchronous>, transform_indices = @transform_4, window_bounds = array<i64: 1, 128>}, {transform_indices = @transform_5, window_bounds = array<i64: 8, 128>}]} {
    %c0 = arith.constant 0 : index
    %c0_0 = arith.constant 0 : index
    %0 = vector.load %arg1[%c0, %c0_0] : memref<8x3072xbf16, #tpu.memory_space<vmem>>, vector<8x3072xbf16>
    %c0_1 = arith.constant 0 : index
    %c0_2 = arith.constant 0 : index
    %1 = vector.load %arg2[%c0_1, %c0_2] : memref<3072x512xbf16, #tpu.memory_space<vmem>>, vector<3072x512xbf16>
    %cst = arith.constant dense<0.000000e+00> : vector<8x512xf32>
    %2 = tpu.matmul %0, %1, %cst {dimension_numbers = #tpu.dot_dimension_numbers<[1], [0], [0], [1], [0, 0, 1, 1], [], []>} : vector<8x3072xbf16>, vector<3072x512xbf16>, vector<8x512xf32> -> vector<8x512xf32>
    %c0_3 = arith.constant 0 : index
    %c0_4 = arith.constant 0 : index
    %3 = vector.load %arg3[%c0_3, %c0_4] : memref<1x512xf32, #tpu.memory_space<vmem>>, vector<1x512xf32>
    %4 = vector.broadcast %3 : vector<1x512xf32> to vector<8x512xf32>
    %5 = arith.addf %2, %4 : vector<8x512xf32>
    %cst_5 = arith.constant 0.000000e+00 : f32
    %6 = vector.broadcast %cst_5 : f32 to vector<8x512xf32>
    %7 = arith.maximumf %5, %6 : vector<8x512xf32>
    %8 = arith.truncf %7 : vector<8x512xf32> to vector<8x512xbf16>
    %c0_6 = arith.constant 0 : index
    %c0_7 = arith.constant 0 : index
    %9 = vector.load %arg4[%c0_6, %c0_7] : memref<512x128xbf16, #tpu.memory_space<vmem>>, vector<512x128xbf16>
    %cst_8 = arith.constant dense<0.000000e+00> : vector<8x128xf32>
    %10 = tpu.matmul %8, %9, %cst_8 {dimension_numbers = #tpu.dot_dimension_numbers<[1], [0], [0], [1], [0, 0, 1, 1], [], []>} : vector<8x512xbf16>, vector<512x128xbf16>, vector<8x128xf32> -> vector<8x128xf32>
    %c0_9 = arith.constant 0 : index
    %c0_10 = arith.constant 0 : index
    %11 = vector.load %arg5[%c0_9, %c0_10] : memref<1x128xf32, #tpu.memory_space<vmem>>, vector<1x128xf32>
    %12 = vector.broadcast %11 : vector<1x128xf32> to vector<8x128xf32>
    %13 = arith.addf %10, %12 : vector<8x128xf32>
    %c0_11 = arith.constant 0 : index
    %c0_12 = arith.constant 0 : index
    %14 = vector.load %arg6[%c0_11, %c0_12] : memref<8x128xf32, #tpu.memory_space<vmem>>, vector<8x128xf32>
    tpu.vector_store %arg6[%c0_11, %c0_12], %13 {strides = array<i32>} : memref<8x128xf32, #tpu.memory_space<vmem>>, vector<8x128xf32>,
    return
  }
  func.func @transform_0(%arg0: i32) -> (i32, i32) {
    %c0_i32 = arith.constant 0 : i32
    %c0_i32_0 = arith.constant 0 : i32
    return %arg0, %c0_i32 : i32, i32
  }
  func.func @transform_1(%arg0: i32) -> (i32, i32) {
    %c0_i32 = arith.constant 0 : i32
    %c0_i32_0 = arith.constant 0 : i32
    %c0_i32_1 = arith.constant 0 : i32
    return %c0_i32, %c0_i32_0 : i32, i32
  }
  func.func @transform_2(%arg0: i32) -> (i32, i32) {
    %c0_i32 = arith.constant 0 : i32
    %c0_i32_0 = arith.constant 0 : i32
    %c0_i32_1 = arith.constant 0 : i32
    return %c0_i32, %c0_i32_0 : i32, i32
  }
  func.func @transform_3(%arg0: i32) -> (i32, i32) {
    %c0_i32 = arith.constant 0 : i32
    %c0_i32_0 = arith.constant 0 : i32
    %c0_i32_1 = arith.constant 0 : i32
    return %c0_i32, %c0_i32_0 : i32, i32
  }
  func.func @transform_4(%arg0: i32) -> (i32, i32) {
    %c0_i32 = arith.constant 0 : i32
    %c0_i32_0 = arith.constant 0 : i32
    %c0_i32_1 = arith.constant 0 : i32
    return %c0_i32, %c0_i32_0 : i32, i32
  }
  func.func @transform_5(%arg0: i32) -> (i32, i32) {
    %c0_i32 = arith.constant 0 : i32
    %c0_i32_0 = arith.constant 0 : i32
    return %arg0, %c0_i32 : i32, i32
  }
}

</mosaic_0001>

<bundles_post_ra>
// kernel: tpu_custom_call.1
= control target key start
LH: loop header
LB: loop body
LE: loop exit
PB: predicated region body
PF: predicated region fallthrough
CT: control target
= control target key end

     0   :  { %10 = vsyncpa [#allocation3], 0  ;;  %s8660_s0 = inlined_call_operand.hbm [shape: bf16[8,3072], index: 0, kind: input, shape index: {}]   ;;  %s8661_s1 = inlined_call_operand.hbm [shape: bf16[3072,512], index: 1, kind: input, shape index: {}]   ;;  %s8662_s2 = inlined_call_operand.hbm [shape: f32[1,512], index: 2, kind: input, shape index: {}]   ;;  %s8663_s3 = inlined_call_operand.hbm [shape: bf16[512,128], index: 3, kind: input, shape index: {}]   ;;  %s8664_s4 = inlined_call_operand.hbm [shape: f32[1,128], index: 4, kind: input, shape index: {}]   ;;  %s8665_s5 = inlined_call_operand.hbm [shape: f32[8,128], index: 5, kind: output, shape index: {}]  }
   0x1   :  { %11 = vsyncpa [#allocation6], 0 }
   0x2   :  { %12 = vsyncpa [#allocation9], 0 }
   0x3   :  { %13 = vsyncpa [#allocation4], 0  ;;  %s8482_s18 = smov [#allocation5]   ;;  %s8342_s22 = scalar_lea.hbm %s8661_s1, 98304 }
   0x4   :  { %s29_s19 = sshll.u32 %s8482_s18, 4  ;;  %p8343_p0 = scmp.ne.s32.totalorder %s8661_s1, %s8342_s22  ;;  %s30_s19 = int_to_ptr.vmem [resolvable:$true] %s29_s19 }
   0x5   :  { %p8346_p1 = scmp.lt.u32.totalorder %s8342_s22, %s8661_s1 }
   0x7   :  { %p8348_p2 = pnand %p8346_p1, %p8343_p0 }
   0x9   :  { %8351 = shalt.err (!%p8348_p2)
}
   0xa   :  { %s8352_s27 = scalar_lea.vmem %s30_s19, 98304  ;;  %p8357_p4 = scmp.lt.s32.totalorder %s30_s19, %s30_s19 }
   0xb   :  { %p8353_p3 = scmp.ne.s32.totalorder %s30_s19, %s8352_s27  ;;  %p8358_p5 = scmp.lt.s32.totalorder %s8352_s27, %s8352_s27 }
   0xd   :  { %p8359_p6 = por %p8358_p5, %p8357_p4 }
   0xf   :  { %p8360_p7 = pnand %p8359_p6, %p8353_p3 }
  0x11   :  { %8363 = shalt.err (!%p8360_p7)
}
  0x12   :  { %s8483_s28 = smov 256   ;;  %s8484_s29 = smov 16  }
  0x13   :  { %35 = dma.hbm_to_vmem [thread:$0]  %s8661_s1, 98304, %s30_s19, [#allocation6], %s8483_s28, %s8483_s28, %s8484_s29  }
  0x14   :  { %s8485_s7 = smov [#allocation8]   ;;  %s8364_s11 = scalar_lea.hbm %s8663_s3, 4096 }
  0x15   :  { %s51_s8 = sshll.u32 %s8485_s7, 4  ;;  %p8365_p8 = scmp.ne.s32.totalorder %s8663_s3, %s8364_s11  ;;  %s52_s8 = int_to_ptr.vmem [resolvable:$true] %s51_s8 }
  0x16   :  { %p8368_p9 = scmp.lt.u32.totalorder %s8364_s11, %s8663_s3 }
  0x18   :  { %p8370_p10 = pnand %p8368_p9, %p8365_p8 }
  0x1a   :  { %8373 = shalt.err (!%p8370_p10)
}
  0x1b   :  { %s8374_s16 = scalar_lea.vmem %s52_s8, 4096  ;;  %p8379_p12 = scmp.lt.s32.totalorder %s52_s8, %s52_s8 }
  0x1c   :  { %p8375_p11 = scmp.ne.s32.totalorder %s52_s8, %s8374_s16  ;;  %p8380_p13 = scmp.lt.s32.totalorder %s8374_s16, %s8374_s16 }
  0x1e   :  { %p8381_p0 = por %p8380_p13, %p8379_p12 }
  0x20   :  { %p8382_p1 = pnand %p8381_p0, %p8375_p11 }
  0x22   :  { %8385 = shalt.err (!%p8382_p1)
}
  0x23   :  { %s8486_s1 = smov 64   ;;  %s8487_s17 = smov 4  }
  0x24   :  { %57 = dma.hbm_to_vmem [thread:$0]  %s8663_s3, 4096, %s52_s8, [#allocation9], %s8486_s1, %s8486_s1, %s8487_s17  }
  0x25   :  { %s8488_s20 = smov [#allocation2]   ;;  %s8489_s22 = smov [#allocation7]  }
  0x26   :  { %s20_s21 = sshll.u32 %s8488_s20, 4  ;;  %s42_s23 = sshll.u32 %s8489_s22, 4  ;;  %s21_s21 = int_to_ptr.vmem [resolvable:$true] %s20_s21  ;;  %s43_s23 = int_to_ptr.vmem [resolvable:$true] %s42_s23 }
  0x27   :  { %s8386_s26 = scalar_lea.hbm %s8660_s0, 1536 }
  0x28   :  { %p8387_p2 = scmp.ne.s32.totalorder %s8660_s0, %s8386_s26  ;;  %p8390_p3 = scmp.lt.u32.totalorder %s8386_s26, %s8660_s0 }
  0x2a   :  { %p8392_p4 = pnand %p8390_p3, %p8387_p2 }
  0x2c   :  { %8395 = shalt.err (!%p8392_p4)
}
  0x2d   :  { %s8396_s3 = scalar_lea.vmem %s21_s21, 1536  ;;  %p8401_p6 = scmp.lt.s32.totalorder %s21_s21, %s21_s21 }
  0x2e   :  { %p8397_p5 = scmp.ne.s32.totalorder %s21_s21, %s8396_s3  ;;  %p8402_p7 = scmp.lt.s32.totalorder %s8396_s3, %s8396_s3 }
  0x30   :  { %p8403_p8 = por %p8402_p7, %p8401_p6 }
  0x32   :  { %p8404_p9 = pnand %p8403_p8, %p8397_p5 }
  0x34   :  { %8407 = shalt.err (!%p8404_p9)
}
  0x35   :  { %23 = dma.hbm_to_vmem [thread:$0]  %s8660_s0, 1536, %s21_s21, [#allocation3]  }
  0x36   :  { %s8408_s10 = scalar_lea.hbm %s8662_s2, 64 }
  0x37   :  { %p8409_p10 = scmp.ne.s32.totalorder %s8662_s2, %s8408_s10  ;;  %p8412_p11 = scmp.lt.u32.totalorder %s8408_s10, %s8662_s2 }
  0x39   :  { %p8414_p12 = pnand %p8412_p11, %p8409_p10 }
  0x3b   :  { %8417 = shalt.err (!%p8414_p12)
}
  0x3c   :  { %s8418_s15 = scalar_lea.vmem %s43_s23, 64  ;;  %p8423_p0 = scmp.lt.s32.totalorder %s43_s23, %s43_s23 }
  0x3d   :  { %p8419_p13 = scmp.ne.s32.totalorder %s43_s23, %s8418_s15  ;;  %p8424_p1 = scmp.lt.s32.totalorder %s8418_s15, %s8418_s15 }
  0x3f   :  { %p8425_p2 = por %p8424_p1, %p8423_p0 }
  0x41   :  { %p8426_p3 = pnand %p8425_p2, %p8419_p13 }
  0x43   :  { %8429 = shalt.err (!%p8426_p3)
}
  0x44   :  { %45 = dma.hbm_to_vmem [thread:$0]  %s8662_s2, 64, %s43_s23, [#allocation6]  }
  0x45   :  { %s8490_s1 = smov [#allocation10]   ;;  %s8430_s20 = scalar_lea.hbm %s8664_s4, 16 }
  0x46   :  { %s64_s17 = sshll.u32 %s8490_s1, 4  ;;  %p8431_p4 = scmp.ne.s32.totalorder %s8664_s4, %s8430_s20  ;;  %s65_s17 = int_to_ptr.vmem [resolvable:$true] %s64_s17 }
  0x47   :  { %p8434_p5 = scmp.lt.u32.totalorder %s8430_s20, %s8664_s4 }
  0x49   :  { %p8436_p6 = pnand %p8434_p5, %p8431_p4 }
  0x4b   :  { %8439 = shalt.err (!%p8436_p6)
}
  0x4c   :  { %s8440_s26 = scalar_lea.vmem %s65_s17, 16  ;;  %s8444_s2 = scalar_lea.vmem %s65_s17, 32 }
  0x4d   :  { %p8441_p7 = scmp.ne.s32.totalorder %s65_s17, %s8440_s26  ;;  %p8445_p8 = scmp.lt.s32.totalorder %s65_s17, %s65_s17 }
  0x4e   :  { %p8446_p9 = scmp.lt.s32.totalorder %s8444_s2, %s8440_s26 }
  0x50   :  { %p8447_p10 = por %p8446_p9, %p8445_p8 }
  0x52   :  { %p8448_p11 = pnand %p8447_p10, %p8441_p7 }
  0x54   :  { %8451 = shalt.err (!%p8448_p11)
}
  0x55   :  { %67 = dma.hbm_to_vmem [thread:$0]  %s8664_s4, 16, %s65_s17, [#allocation9]  }
  0x56   :  { %8474 = dma.done.wait [#allocation3], 1536  }
  0x57   :  { %8475 = vsyncadd [#allocation3], 4294965760 }
  0x58   :  { %8476 = dma.done.wait [#allocation6], 98368  }
  0x59   :  { %8477 = vsyncadd [#allocation6], 4294868928 }
  0x5a   :  { %8478 = dma.done.wait [#allocation9], 4112  }
  0x5b   :  { %8479 = vsyncadd [#allocation9], 4294963184  ;;  %v7134_v0 = vld [vmem:[#allocation5 + $0x4] ss:$16 sps:$4 sm:$0xff]   ;;  %v7136_v1 = vld [vmem:[#allocation5 + $0xc] ss:$16 sps:$4 sm:$0xff]  }
  0x5c   :  { %4810 = vmatprep.subr.bf16.mxu0 %v7134_v0  ;;  %v7138_v2 = vld [vmem:[#allocation5] ss:$16 sps:$4 sm:$0xff]   ;;  %v7139_v3 = vld [vmem:[#allocation5 + $0x8] ss:$16 sps:$4 sm:$0xff]   ;;  %5302 = vmatprep.subr.bf16.mxu1 %v7136_v1  ;;  %v7140_v4 = vld [vmem:[#allocation5 + $0x24] ss:$16 sps:$4 sm:$0xff]  }
  0x5d   :  { %4811 = vmatpush1.bf16.msra.mxu0 %v7138_v2  ;;  %5303 = vmatpush1.bf16.msra.mxu1 %v7139_v3  ;;  %v7142_v5 = vld [vmem:[#allocation5 + $0x2c] ss:$16 sps:$4 sm:$0xff]   ;;  %v7144_v6 = vld [vmem:[#allocation5 + $0x20] ss:$16 sps:$4 sm:$0xff]   ;;  %v7145_v7 = vld [vmem:[#allocation5 + $0x28] ss:$16 sps:$4 sm:$0xff]  }
  0x5e   :  { %4812 = vmatprep.subr.bf16.mxu0 %v7140_v4  ;;  %5304 = vmatprep.subr.bf16.mxu1 %v7142_v5  ;;  %v7146_v8 = vld [vmem:[#allocation5 + $0x44] ss:$16 sps:$4 sm:$0xff]   ;;  %v7148_v9 = vld [vmem:[#allocation5 + $0x4c] ss:$16 sps:$4 sm:$0xff]   ;;  %v7150_v10 = vld [vmem:[#allocation5 + $0x40] ss:$16 sps:$4 sm:$0xff]  }
  0x5f   :  { %v7151_v11 = vld [vmem:[#allocation5 + $0x48] ss:$16 sps:$4 sm:$0xff]   ;;  %v7152_v12 = vld [vmem:[#allocation5 + $0x64] ss:$16 sps:$4 sm:$0xff]   ;;  %v7154_v13 = vld [vmem:[#allocation5 + $0x6c] ss:$16 sps:$4 sm:$0xff]  }
  0x60   :  { %v7156_v14 = vld [vmem:[#allocation5 + $0x60] ss:$16 sps:$4 sm:$0xff]   ;;  %v7157_v15 = vld [vmem:[#allocation5 + $0x68] ss:$16 sps:$4 sm:$0xff]   ;;  %v7158_v16 = vld [vmem:[#allocation5 + $0x84] ss:$16 sps:$4 sm:$0xff]  }
  0x61   :  { %4813 = vmatpush1.bf16.msra.mxu0 %v7144_v6  ;;  %5305 = vmatpush1.bf16.msra.mxu1 %v7145_v7  ;;  %v7160_v17 = vld [vmem:[#allocation5 + $0x8c] ss:$16 sps:$4 sm:$0xff]   ;;  %v7162_v18 = vld [vmem:[#allocation5 + $0x80] ss:$16 sps:$4 sm:$0xff]   ;;  %v7163_v19 = vld [vmem:[#allocation5 + $0x88] ss:$16 sps:$4 sm:$0xff]  }
  0x62   :  { %4814 = vmatprep.subr.bf16.mxu0 %v7146_v8  ;;  %5306 = vmatprep.subr.bf16.mxu1 %v7148_v9  ;;  %v7164_v20 = vld [vmem:[#allocation5 + $0xa4] ss:$16 sps:$4 sm:$0xff]   ;;  %v7166_v21 = vld [vmem:[#allocation5 + $0xac] ss:$16 sps:$4 sm:$0xff]   ;;  %v7168_v22 = vld [vmem:[#allocation5 + $0xa0] ss:$16 sps:$4 sm:$0xff]  }
  0x63   :  { %v7169_v23 = vld [vmem:[#allocation5 + $0xa8] ss:$16 sps:$4 sm:$0xff]   ;;  %v7170_v24 = vld [vmem:[#allocation5 + $0xc4] ss:$16 sps:$4 sm:$0xff]   ;;  %v7172_v25 = vld [vmem:[#allocation5 + $0xcc] ss:$16 sps:$4 sm:$0xff]  }
  0x64   :  { %v7174_v26 = vld [vmem:[#allocation5 + $0xc0] ss:$16 sps:$4 sm:$0xff]   ;;  %v7175_v27 = vld [vmem:[#allocation5 + $0xc8] ss:$16 sps:$4 sm:$0xff]   ;;  %v7176_v28 = vld [vmem:[#allocation5 + $0xe4] ss:$16 sps:$4 sm:$0xff]  }
  0x65   :  { %4815 = vmatpush1.bf16.msra.mxu0 %v7150_v10  ;;  %5307 = vmatpush1.bf16.msra.mxu1 %v7151_v11  ;;  %v7178_v29 = vld [vmem:[#allocation5 + $0xec] ss:$16 sps:$4 sm:$0xff]   ;;  %v7180_v30 = vld [vmem:[#allocation5 + $0xe0] ss:$16 sps:$4 sm:$0xff]   ;;  %v7181_v31 = vld [vmem:[#allocation5 + $0xe8] ss:$16 sps:$4 sm:$0xff]  }
  0x66   :  { %4816 = vmatprep.subr.bf16.mxu0 %v7152_v12  ;;  %5308 = vmatprep.subr.bf16.mxu1 %v7154_v13  ;;  %v7182_v32 = vld [vmem:[#allocation5 + $0x104] ss:$16 sps:$4 sm:$0xff]   ;;  %v7184_v33 = vld [vmem:[#allocation5 + $0x10c] ss:$16 sps:$4 sm:$0xff]   ;;  %v7186_v34 = vld [vmem:[#allocation5 + $0x100] ss:$16 sps:$4 sm:$0xff]  }
  0x67   :  { %v7187_v35 = vld [vmem:[#allocation5 + $0x108] ss:$16 sps:$4 sm:$0xff]   ;;  %v7188_v36 = vld [vmem:[#allocation5 + $0x124] ss:$16 sps:$4 sm:$0xff]   ;;  %v7190_v37 = vld [vmem:[#allocation5 + $0x12c] ss:$16 sps:$4 sm:$0xff]  }
  0x68   :  { %v7192_v38 = vld [vmem:[#allocation5 + $0x120] ss:$16 sps:$4 sm:$0xff]   ;;  %v7193_v39 = vld [vmem:[#allocation5 + $0x128] ss:$16 sps:$4 sm:$0xff]   ;;  %v7194_v40 = vld [vmem:[#allocation5 + $0x144] ss:$16 sps:$4 sm:$0xff]  }
  0x69   :  { %4817 = vmatpush1.bf16.msra.mxu0 %v7156_v14  ;;  %5309 = vmatpush1.bf16.msra.mxu1 %v7157_v15  ;;  %v7196_v41 = vld [vmem:[#allocation5 + $0x14c] ss:$16 sps:$4 sm:$0xff]   ;;  %v7198_v42 = vld [vmem:[#allocation5 + $0x140] ss:$16 sps:$4 sm:$0xff]   ;;  %v7199_v43 = vld [vmem:[#allocation5 + $0x148] ss:$16 sps:$4 sm:$0xff]  }
  0x6a   :  { %4818 = vmatprep.subr.bf16.mxu0 %v7158_v16  ;;  %5310 = vmatprep.subr.bf16.mxu1 %v7160_v17  ;;  %v7200_v44 = vld [vmem:[#allocation5 + $0x164] ss:$16 sps:$4 sm:$0xff]   ;;  %v7202_v45 = vld [vmem:[#allocation5 + $0x16c] ss:$16 sps:$4 sm:$0xff]   ;;  %v7204_v47 = vld [vmem:[#allocation5 + $0x160] ss:$16 sps:$4 sm:$0xff]  }
  0x6b   :  { %v84_v46 = vld [vmem:[#allocation2] sm:$0xff]  ;;  %v7205_v49 = vld [vmem:[#allocation5 + $0x168] ss:$16 sps:$4 sm:$0xff]   ;;  %v7208_v51 = vld [vmem:[#allocation5 + $0x18c] ss:$16 sps:$4 sm:$0xff]   ;;  %s8491_s4 = smov [#allocation11]  }
  0x6c   :  { %v6164_v48 = vcombine.high %v84_v46, %v84_v46  ;;  %v7206_v50 = vld [vmem:[#allocation5 + $0x184] ss:$16 sps:$4 sm:$0xff]   ;;  %v7210_v52 = vld [vmem:[#allocation5 + $0x180] ss:$16 sps:$4 sm:$0xff]   ;;  %v7211_v53 = vld [vmem:[#allocation5 + $0x188] ss:$16 sps:$4 sm:$0xff]   ;;  %v6163_v4 = vcombine.low %v84_v46, %v84_v46 }
  0x6d   :  { %4819 = vmatpush1.bf16.msra.mxu0 %v7162_v18  ;;  %5311 = vmatpush1.bf16.msra.mxu1 %v7163_v19  ;;  %v7212_v54 = vld [vmem:[#allocation5 + $0x1a4] ss:$16 sps:$4 sm:$0xff]   ;;  %v7214_v55 = vld [vmem:[#allocation5 + $0x1ac] ss:$16 sps:$4 sm:$0xff]   ;;  %v7216_v56 = vld [vmem:[#allocation5 + $0x1a0] ss:$16 sps:$4 sm:$0xff]  }
  0x6e   :  { %4820 = vmatprep.subr.bf16.mxu0 %v7164_v20  ;;  %5312 = vmatprep.subr.bf16.mxu1 %v7166_v21  ;;  %v7217_v57 = vld [vmem:[#allocation5 + $0x1a8] ss:$16 sps:$4 sm:$0xff]   ;;  %v7218_v58 = vld [vmem:[#allocation5 + $0x1c4] ss:$16 sps:$4 sm:$0xff]   ;;  %v7220_v59 = vld [vmem:[#allocation5 + $0x1cc] ss:$16 sps:$4 sm:$0xff]  }
  0x6f   :  { %4842 = vmatprep.mubr.bf16.mxu0 %v6164_v48  ;;  %5334 = vmatprep.mubr.bf16.mxu1 %v6164_v48  ;;  %v7222_v60 = vld [vmem:[#allocation5 + $0x1c0] ss:$16 sps:$4 sm:$0xff]   ;;  %v7223_v61 = vld [vmem:[#allocation5 + $0x1c8] ss:$16 sps:$4 sm:$0xff]   ;;  %v7224_v62 = vld [vmem:[#allocation5 + $0x1e4] ss:$16 sps:$4 sm:$0xff]  }
  0x70   :  { %v7226_v63 = vld [vmem:[#allocation5 + $0x1ec] ss:$16 sps:$4 sm:$0xff]   ;;  %v7228_v0 = vld [vmem:[#allocation5 + $0x1e0] ss:$16 sps:$4 sm:$0xff]   ;;  %v7229_v1 = vld [vmem:[#allocation5 + $0x1e8] ss:$16 sps:$4 sm:$0xff]  }
  0x71   :  { %4821 = vmatpush1.bf16.msra.mxu0 %v7168_v22  ;;  %5313 = vmatpush1.bf16.msra.mxu1 %v7169_v23  ;;  %v7234_v2 = vld [vmem:[#allocation5 + $0x204] ss:$16 sps:$4 sm:$0xff]   ;;  %v7237_v3 = vld [vmem:[#allocation5 + $0x20c] ss:$16 sps:$4 sm:$0xff]   ;;  %v7232_v5 = vld [vmem:[#allocation5 + $0x200] ss:$16 sps:$4 sm:$0xff]  }
  0x72   :  { %4822 = vmatprep.subr.bf16.mxu0 %v7170_v24  ;;  %5314 = vmatprep.subr.bf16.mxu1 %v7172_v25  ;;  %v7235_v6 = vld [vmem:[#allocation5 + $0x208] ss:$16 sps:$4 sm:$0xff]   ;;  %v7240_v7 = vld [vmem:[#allocation5 + $0x224] ss:$16 sps:$4 sm:$0xff]   ;;  %v7243_v8 = vld [vmem:[#allocation5 + $0x22c] ss:$16 sps:$4 sm:$0xff]  }
  0x73   :  { %v7238_v9 = vld [vmem:[#allocation5 + $0x220] ss:$16 sps:$4 sm:$0xff]   ;;  %v7241_v10 = vld [vmem:[#allocation5 + $0x228] ss:$16 sps:$4 sm:$0xff]   ;;  %v7246_v11 = vld [vmem:[#allocation5 + $0x244] ss:$16 sps:$4 sm:$0xff]  }
  0x74   :  { %v7249_v12 = vld [vmem:[#allocation5 + $0x24c] ss:$16 sps:$4 sm:$0xff]   ;;  %v7244_v13 = vld [vmem:[#allocation5 + $0x240] ss:$16 sps:$4 sm:$0xff]   ;;  %v7247_v14 = vld [vmem:[#allocation5 + $0x248] ss:$16 sps:$4 sm:$0xff]  }
  0x75   :  { %4823 = vmatpush1.bf16.msra.mxu0 %v7174_v26  ;;  %5315 = vmatpush1.bf16.msra.mxu1 %v7175_v27  ;;  %v7252_v15 = vld [vmem:[#allocation5 + $0x264] ss:$16 sps:$4 sm:$0xff]   ;;  %v7255_v16 = vld [vmem:[#allocation5 + $0x26c] ss:$16 sps:$4 sm:$0xff]   ;;  %v7250_v17 = vld [vmem:[#allocation5 + $0x260] ss:$16 sps:$4 sm:$0xff]  }
  0x76   :  { %4824 = vmatprep.subr.bf16.mxu0 %v7176_v28  ;;  %5316 = vmatprep.subr.bf16.mxu1 %v7178_v29  ;;  %v7253_v18 = vld [vmem:[#allocation5 + $0x268] ss:$16 sps:$4 sm:$0xff]   ;;  %v7258_v19 = vld [vmem:[#allocation5 + $0x284] ss:$16 sps:$4 sm:$0xff]   ;;  %v7261_v20 = vld [vmem:[#allocation5 + $0x28c] ss:$16 sps:$4 sm:$0xff]  }
  0x77   :  { %v7256_v21 = vld [vmem:[#allocation5 + $0x280] ss:$16 sps:$4 sm:$0xff]   ;;  %v7259_v22 = vld [vmem:[#allocation5 + $0x288] ss:$16 sps:$4 sm:$0xff]   ;;  %v7264_v23 = vld [vmem:[#allocation5 + $0x2a4] ss:$16 sps:$4 sm:$0xff]  }
  0x78   :  { %v7267_v24 = vld [vmem:[#allocation5 + $0x2ac] ss:$16 sps:$4 sm:$0xff]   ;;  %v7262_v25 = vld [vmem:[#allocation5 + $0x2a0] ss:$16 sps:$4 sm:$0xff]   ;;  %v7265_v26 = vld [vmem:[#allocation5 + $0x2a8] ss:$16 sps:$4 sm:$0xff]  }
  0x79   :  { %4825 = vmatpush1.bf16.msra.mxu0 %v7180_v30  ;;  %5317 = vmatpush1.bf16.msra.mxu1 %v7181_v31  ;;  %v7270_v27 = vld [vmem:[#allocation5 + $0x2c4] ss:$16 sps:$4 sm:$0xff]   ;;  %v7273_v28 = vld [vmem:[#allocation5 + $0x2cc] ss:$16 sps:$4 sm:$0xff]   ;;  %v7268_v31 = vld [vmem:[#allocation5 + $0x2c0] ss:$16 sps:$4 sm:$0xff]  }
  0x7a   :  { %4826 = vmatprep.subr.bf16.mxu0 %v7182_v32  ;;  %5318 = vmatprep.subr.bf16.mxu1 %v7184_v33  ;;  %v8582_v29 = vld [vmem:[#allocation2 + $0x8] sm:$0xff]  ;;  %v7276_v33 = vld [vmem:[#allocation5 + $0x2e4] ss:$16 sps:$4 sm:$0xff]   ;;  %s6152_s28 = sshll.u32 %s8491_s4, 4  ;;  %s6153_s28 = int_to_ptr.vmem [resolvable:$true] %s6152_s28 }
  0x7b   :  { %v6166_v30 = vcombine.high %v8582_v29, %v8582_v29  ;;  %v7271_v32 = vld [vmem:[#allocation5 + $0x2c8] ss:$16 sps:$4 sm:$0xff]   ;;  %v7297_v46 = vld [vmem:[#allocation5 + $0x34c] ss:$16 sps:$4 sm:$0xff]   ;;  %s8452_s29 = scalar_lea.vmem %s6153_s28, 128  ;;  %p8457_p13 = scmp.lt.s32.totalorder %s6153_s28, %s6153_s28 }
  0x7c   :  { %v7295_v48 = vld [vmem:[#allocation5 + $0x348] ss:$16 sps:$4 sm:$0xff]   ;;  %p8453_p12 = scmp.ne.s32.totalorder %s6153_s28, %s8452_s29  ;;  %p8458_p0 = scmp.lt.s32.totalorder %s8452_s29, %s8452_s29 }
  0x7d   :  { %4827 = vmatpush1.bf16.msra.mxu0 %v7186_v34  ;;  %5319 = vmatpush1.bf16.msra.mxu1 %v7187_v35  ;;  %v7279_v34 = vld [vmem:[#allocation5 + $0x2ec] ss:$16 sps:$4 sm:$0xff]   ;;  %v7274_v35 = vld [vmem:[#allocation5 + $0x2e0] ss:$16 sps:$4 sm:$0xff]  }
  0x7e   :  { %4828 = vmatprep.subr.bf16.mxu0 %v7188_v36  ;;  %5320 = vmatprep.subr.bf16.mxu1 %v7190_v37  ;;  %v7277_v36 = vld [vmem:[#allocation5 + $0x2e8] ss:$16 sps:$4 sm:$0xff]   ;;  %v7282_v37 = vld [vmem:[#allocation5 + $0x304] ss:$16 sps:$4 sm:$0xff]   ;;  %p8459_p1 = por %p8458_p0, %p8457_p13 }
  0x80   :  { %p8460_p2 = pnand %p8459_p1, %p8453_p12 }
  0x81   :  { %4829 = vmatpush1.bf16.msra.mxu0 %v7192_v38  ;;  %5321 = vmatpush1.bf16.msra.mxu1 %v7193_v39  ;;  %v7285_v38 = vld [vmem:[#allocation5 + $0x30c] ss:$16 sps:$4 sm:$0xff]   ;;  %v7280_v39 = vld [vmem:[#allocation5 + $0x300] ss:$16 sps:$4 sm:$0xff]  }
  0x82   :  { %4830 = vmatprep.subr.bf16.mxu0 %v7194_v40  ;;  %5322 = vmatprep.subr.bf16.mxu1 %v7196_v41  ;;  %v7283_v40 = vld [vmem:[#allocation5 + $0x308] ss:$16 sps:$4 sm:$0xff]   ;;  %v7288_v41 = vld [vmem:[#allocation5 + $0x324] ss:$16 sps:$4 sm:$0xff]  }
  0x85   :  { %4831 = vmatpush1.bf16.msra.mxu0 %v7198_v42  ;;  %5323 = vmatpush1.bf16.msra.mxu1 %v7199_v43  ;;  %v7291_v42 = vld [vmem:[#allocation5 + $0x32c] ss:$16 sps:$4 sm:$0xff]   ;;  %v7286_v43 = vld [vmem:[#allocation5 + $0x320] ss:$16 sps:$4 sm:$0xff]  }
  0x86   :  { %4832 = vmatprep.subr.bf16.mxu0 %v7200_v44  ;;  %5324 = vmatprep.subr.bf16.mxu1 %v7202_v45  ;;  %v7289_v44 = vld [vmem:[#allocation5 + $0x328] ss:$16 sps:$4 sm:$0xff]   ;;  %v7294_v45 = vld [vmem:[#allocation5 + $0x344] ss:$16 sps:$4 sm:$0xff]  }
  0x89   :  { %4833 = vmatpush1.bf16.msra.mxu0 %v7204_v47  ;;  %5325 = vmatpush1.bf16.msra.mxu1 %v7205_v49  ;;  %v7292_v47 = vld [vmem:[#allocation5 + $0x340] ss:$16 sps:$4 sm:$0xff]   ;;  %v7300_v49 = vld [vmem:[#allocation5 + $0x364] ss:$16 sps:$4 sm:$0xff]  }
  0x8a   :  { %4834 = vmatprep.subr.bf16.mxu0 %v7206_v50  ;;  %5326 = vmatprep.subr.bf16.mxu1 %v7208_v51  ;;  %v7303_v50 = vld [vmem:[#allocation5 + $0x36c] ss:$16 sps:$4 sm:$0xff]   ;;  %v7298_v51 = vld [vmem:[#allocation5 + $0x360] ss:$16 sps:$4 sm:$0xff]  }
  0x8d   :  { %4835 = vmatpush1.bf16.msra.mxu0 %v7210_v52  ;;  %5327 = vmatpush1.bf16.msra.mxu1 %v7211_v53  ;;  %v7301_v52 = vld [vmem:[#allocation5 + $0x368] ss:$16 sps:$4 sm:$0xff]   ;;  %v7306_v53 = vld [vmem:[#allocation5 + $0x384] ss:$16 sps:$4 sm:$0xff]  }
  0x8e   :  { %4836 = vmatprep.subr.bf16.mxu0 %v7212_v54  ;;  %5328 = vmatprep.subr.bf16.mxu1 %v7214_v55  ;;  %v7309_v54 = vld [vmem:[#allocation5 + $0x38c] ss:$16 sps:$4 sm:$0xff]   ;;  %v7304_v55 = vld [vmem:[#allocation5 + $0x380] ss:$16 sps:$4 sm:$0xff]  }
  0x91   :  { %4837 = vmatpush1.bf16.msra.mxu0 %v7216_v56  ;;  %5329 = vmatpush1.bf16.msra.mxu1 %v7217_v57  ;;  %v7307_v56 = vld [vmem:[#allocation5 + $0x388] ss:$16 sps:$4 sm:$0xff]   ;;  %v7312_v57 = vld [vmem:[#allocation5 + $0x3a4] ss:$16 sps:$4 sm:$0xff]  }
  0x92   :  { %4838 = vmatprep.subr.bf16.mxu0 %v7218_v58  ;;  %5330 = vmatprep.subr.bf16.mxu1 %v7220_v59  ;;  %v7315_v58 = vld [vmem:[#allocation5 + $0x3ac] ss:$16 sps:$4 sm:$0xff]   ;;  %v7310_v59 = vld [vmem:[#allocation5 + $0x3a0] ss:$16 sps:$4 sm:$0xff]  }
  0x95   :  { %4839 = vmatpush1.bf16.msra.mxu0 %v7222_v60  ;;  %5331 = vmatpush1.bf16.msra.mxu1 %v7223_v61  ;;  %v7313_v60 = vld [vmem:[#allocation5 + $0x3a8] ss:$16 sps:$4 sm:$0xff]   ;;  %v7318_v61 = vld [vmem:[#allocation5 + $0x3c4] ss:$16 sps:$4 sm:$0xff]  }
  0x96   :  { %4840 = vmatprep.subr.bf16.mxu0 %v7224_v62  ;;  %5332 = vmatprep.subr.bf16.mxu1 %v7226_v63  ;;  %v7321_v62 = vld [vmem:[#allocation5 + $0x3cc] ss:$16 sps:$4 sm:$0xff]   ;;  %v7316_v63 = vld [vmem:[#allocation5 + $0x3c0] ss:$16 sps:$4 sm:$0xff]  }
  0x99   :  { %4841 = vmatpush1.bf16.msra.mxu0 %v7228_v0  ;;  %5333 = vmatpush1.bf16.msra.mxu1 %v7229_v1  ;;  %v7319_v0 = vld [vmem:[#allocation5 + $0x3c8] ss:$16 sps:$4 sm:$0xff]   ;;  %v7324_v1 = vld [vmem:[#allocation5 + $0x3e4] ss:$16 sps:$4 sm:$0xff]  }
  0x9a   :  { %4851 = vmatprep.subr.bf16.mxu0 %v7234_v2  ;;  %5343 = vmatprep.subr.bf16.mxu1 %v7237_v3  ;;  %v7327_v2 = vld [vmem:[#allocation5 + $0x3ec] ss:$16 sps:$4 sm:$0xff]   ;;  %v7322_v3 = vld [vmem:[#allocation5 + $0x3e0] ss:$16 sps:$4 sm:$0xff]  }
  0x9c   :  { %4843 = vmatmul.mubr.bf16.vlgmr.msra.gmra.mrb[0].mxu0 %v6163_v4  ;;  %5335 = vmatmul.mubr.bf16.vlgmr.msra.gmra.mrb[0].mxu1 %v6163_v4  ;;  %v7325_v4 = vld [vmem:[#allocation5 + $0x3e8] ss:$16 sps:$4 sm:$0xff]  }
  0x9d   :  { %4852 = vmatpush1.bf16.msra.mxu0 %v7232_v5  ;;  %5344 = vmatpush1.bf16.msra.mxu1 %v7235_v6  ;;  %v7332_v5 = vld [vmem:[#allocation5 + $0x404] ss:$16 sps:$4 sm:$0xff]   ;;  %v7335_v6 = vld [vmem:[#allocation5 + $0x40c] ss:$16 sps:$4 sm:$0xff]  }
  0x9e   :  { %4853 = vmatprep.subr.bf16.mxu0 %v7240_v7  ;;  %5345 = vmatprep.subr.bf16.mxu1 %v7243_v8  ;;  %v6165_v7 = vcombine.low %v8582_v29, %v8582_v29  ;;  %v7330_v8 = vld [vmem:[#allocation5 + $0x400] ss:$16 sps:$4 sm:$0xff]   ;;  %v7365_v29 = vld [vmem:[#allocation5 + $0x4ac] ss:$16 sps:$4 sm:$0xff]  }
  0x9f   :  { %4883 = vmatprep.mubr.bf16.mxu0 %v6166_v30  ;;  %5375 = vmatprep.mubr.bf16.mxu1 %v6166_v30  ;;  %v7360_v30 = vld [vmem:[#allocation5 + $0x4a0] ss:$16 sps:$4 sm:$0xff]  }
  0xa1   :  { %4854 = vmatpush1.bf16.msra.mxu0 %v7238_v9  ;;  %5346 = vmatpush1.bf16.msra.mxu1 %v7241_v10  ;;  %v7333_v9 = vld [vmem:[#allocation5 + $0x408] ss:$16 sps:$4 sm:$0xff]   ;;  %v7338_v10 = vld [vmem:[#allocation5 + $0x424] ss:$16 sps:$4 sm:$0xff]  }
  0xa2   :  { %4855 = vmatprep.subr.bf16.mxu0 %v7246_v11  ;;  %5347 = vmatprep.subr.bf16.mxu1 %v7249_v12  ;;  %v8588_v11 = vld [vmem:[#allocation2 + $0x10] sm:$0xff]  ;;  %v7341_v12 = vld [vmem:[#allocation5 + $0x42c] ss:$16 sps:$4 sm:$0xff]  }
  0xa5   :  { %4856 = vmatpush1.bf16.msra.mxu0 %v7244_v13  ;;  %5348 = vmatpush1.bf16.msra.mxu1 %v7247_v14  ;;  %v6168_v13 = vcombine.high %v8588_v11, %v8588_v11  ;;  %v7336_v14 = vld [vmem:[#allocation5 + $0x420] ss:$16 sps:$4 sm:$0xff]  }
  0xa6   :  { %4857 = vmatprep.subr.bf16.mxu0 %v7252_v15  ;;  %5349 = vmatprep.subr.bf16.mxu1 %v7255_v16  ;;  %v7339_v15 = vld [vmem:[#allocation5 + $0x428] ss:$16 sps:$4 sm:$0xff]   ;;  %v7344_v16 = vld [vmem:[#allocation5 + $0x444] ss:$16 sps:$4 sm:$0xff]  }
  0xa9   :  { %4858 = vmatpush1.bf16.msra.mxu0 %v7250_v17  ;;  %5350 = vmatpush1.bf16.msra.mxu1 %v7253_v18  ;;  %v7347_v17 = vld [vmem:[#allocation5 + $0x44c] ss:$16 sps:$4 sm:$0xff]   ;;  %v7342_v18 = vld [vmem:[#allocation5 + $0x440] ss:$16 sps:$4 sm:$0xff]  }
  0xaa   :  { %4859 = vmatprep.subr.bf16.mxu0 %v7258_v19  ;;  %5351 = vmatprep.subr.bf16.mxu1 %v7261_v20  ;;  %v7345_v19 = vld [vmem:[#allocation5 + $0x448] ss:$16 sps:$4 sm:$0xff]   ;;  %v7350_v20 = vld [vmem:[#allocation5 + $0x464] ss:$16 sps:$4 sm:$0xff]  }
  0xad   :  { %4860 = vmatpush1.bf16.msra.mxu0 %v7256_v21  ;;  %5352 = vmatpush1.bf16.msra.mxu1 %v7259_v22  ;;  %v7353_v21 = vld [vmem:[#allocation5 + $0x46c] ss:$16 sps:$4 sm:$0xff]   ;;  %v7348_v22 = vld [vmem:[#allocation5 + $0x460] ss:$16 sps:$4 sm:$0xff]  }
  0xae   :  { %4861 = vmatprep.subr.bf16.mxu0 %v7264_v23  ;;  %5353 = vmatprep.subr.bf16.mxu1 %v7267_v24  ;;  %v7351_v23 = vld [vmem:[#allocation5 + $0x468] ss:$16 sps:$4 sm:$0xff]   ;;  %v7356_v24 = vld [vmem:[#allocation5 + $0x484] ss:$16 sps:$4 sm:$0xff]  }
  0xb1   :  { %4862 = vmatpush1.bf16.msra.mxu0 %v7262_v25  ;;  %5354 = vmatpush1.bf16.msra.mxu1 %v7265_v26  ;;  %v7359_v25 = vld [vmem:[#allocation5 + $0x48c] ss:$16 sps:$4 sm:$0xff]   ;;  %v7354_v26 = vld [vmem:[#allocation5 + $0x480] ss:$16 sps:$4 sm:$0xff]  }
  0xb2   :  { %4863 = vmatprep.subr.bf16.mxu0 %v7270_v27  ;;  %5355 = vmatprep.subr.bf16.mxu1 %v7273_v28  ;;  %v7357_v27 = vld [vmem:[#allocation5 + $0x488] ss:$16 sps:$4 sm:$0xff]   ;;  %v7362_v28 = vld [vmem:[#allocation5 + $0x4a4] ss:$16 sps:$4 sm:$0xff]  }
  0xb5   :  { %4864 = vmatpush1.bf16.msra.mxu0 %v7268_v31  ;;  %5356 = vmatpush1.bf16.msra.mxu1 %v7271_v32  ;;  %v7363_v31 = vld [vmem:[#allocation5 + $0x4a8] ss:$16 sps:$4 sm:$0xff]   ;;  %v7368_v32 = vld [vmem:[#allocation5 + $0x4c4] ss:$16 sps:$4 sm:$0xff]  }
  0xb6   :  { %4865 = vmatprep.subr.bf16.mxu0 %v7276_v33  ;;  %5357 = vmatprep.subr.bf16.mxu1 %v7279_v34  ;;  %v7371_v33 = vld [vmem:[#allocation5 + $0x4cc] ss:$16 sps:$4 sm:$0xff]   ;;  %v7366_v34 = vld [vmem:[#allocation5 + $0x4c0] ss:$16 sps:$4 sm:$0xff]  }
  0xb9   :  { %4866 = vmatpush1.bf16.msra.mxu0 %v7274_v35  ;;  %5358 = vmatpush1.bf16.msra.mxu1 %v7277_v36  ;;  %v7369_v35 = vld [vmem:[#allocation5 + $0x4c8] ss:$16 sps:$4 sm:$0xff]   ;;  %v7374_v36 = vld [vmem:[#allocation5 + $0x4e4] ss:$16 sps:$4 sm:$0xff]  }
  0xba   :  { %4867 = vmatprep.subr.bf16.mxu0 %v7282_v37  ;;  %5359 = vmatprep.subr.bf16.mxu1 %v7285_v38  ;;  %v7377_v37 = vld [vmem:[#allocation5 + $0x4ec] ss:$16 sps:$4 sm:$0xff]   ;;  %v7372_v38 = vld [vmem:[#allocation5 + $0x4e0] ss:$16 sps:$4 sm:$0xff]  }
  0xbd   :  { %4868 = vmatpush1.bf16.msra.mxu0 %v7280_v39  ;;  %5360 = vmatpush1.bf16.msra.mxu1 %v7283_v40  ;;  %v7375_v39 = vld [vmem:[#allocation5 + $0x4e8] ss:$16 sps:$4 sm:$0xff]   ;;  %v7380_v40 = vld [vmem:[#allocation5 + $0x504] ss:$16 sps:$4 sm:$0xff]  }
  0xbe   :  { %4869 = vmatprep.subr.bf16.mxu0 %v7288_v41  ;;  %5361 = vmatprep.subr.bf16.mxu1 %v7291_v42  ;;  %v7383_v41 = vld [vmem:[#allocation5 + $0x50c] ss:$16 sps:$4 sm:$0xff]   ;;  %v7378_v42 = vld [vmem:[#allocation5 + $0x500] ss:$16 sps:$4 sm:$0xff]  }
  0xc1   :  { %4870 = vmatpush1.bf16.msra.mxu0 %v7286_v43  ;;  %5362 = vmatpush1.bf16.msra.mxu1 %v7289_v44  ;;  %v7381_v43 = vld [vmem:[#allocation5 + $0x508] ss:$16 sps:$4 sm:$0xff]   ;;  %v7386_v44 = vld [vmem:[#allocation5 + $0x524] ss:$16 sps:$4 sm:$0xff]  }
  0xc2   :  { %4871 = vmatprep.subr.bf16.mxu0 %v7294_v45  ;;  %5363 = vmatprep.subr.bf16.mxu1 %v7297_v46  ;;  %v7389_v45 = vld [vmem:[#allocation5 + $0x52c] ss:$16 sps:$4 sm:$0xff]   ;;  %v7384_v46 = vld [vmem:[#allocation5 + $0x520] ss:$16 sps:$4 sm:$0xff]  }
  0xc5   :  { %4872 = vmatpush1.bf16.msra.mxu0 %v7292_v47  ;;  %5364 = vmatpush1.bf16.msra.mxu1 %v7295_v48  ;;  %v7387_v47 = vld [vmem:[#allocation5 + $0x528] ss:$16 sps:$4 sm:$0xff]   ;;  %v7392_v48 = vld [vmem:[#allocation5 + $0x544] ss:$16 sps:$4 sm:$0xff]  }
  0xc6   :  { %4873 = vmatprep.subr.bf16.mxu0 %v7300_v49  ;;  %5365 = vmatprep.subr.bf16.mxu1 %v7303_v50  ;;  %v7395_v49 = vld [vmem:[#allocation5 + $0x54c] ss:$16 sps:$4 sm:$0xff]   ;;  %v7390_v50 = vld [vmem:[#allocation5 + $0x540] ss:$16 sps:$4 sm:$0xff]  }
  0xc9   :  { %4874 = vmatpush1.bf16.msra.mxu0 %v7298_v51  ;;  %5366 = vmatpush1.bf16.msra.mxu1 %v7301_v52  ;;  %v7393_v51 = vld [vmem:[#allocation5 + $0x548] ss:$16 sps:$4 sm:$0xff]   ;;  %v7398_v52 = vld [vmem:[#allocation5 + $0x564] ss:$16 sps:$4 sm:$0xff]  }
  0xca   :  { %4875 = vmatprep.subr.bf16.mxu0 %v7306_v53  ;;  %5367 = vmatprep.subr.bf16.mxu1 %v7309_v54  ;;  %v7401_v53 = vld [vmem:[#allocation5 + $0x56c] ss:$16 sps:$4 sm:$0xff]   ;;  %v7396_v54 = vld [vmem:[#allocation5 + $0x560] ss:$16 sps:$4 sm:$0xff]  }
  0xcd   :  { %4876 = vmatpush1.bf16.msra.mxu0 %v7304_v55  ;;  %5368 = vmatpush1.bf16.msra.mxu1 %v7307_v56  ;;  %v7399_v55 = vld [vmem:[#allocation5 + $0x568] ss:$16 sps:$4 sm:$0xff]   ;;  %v7404_v56 = vld [vmem:[#allocation5 + $0x584] ss:$16 sps:$4 sm:$0xff]  }
  0xce   :  { %4877 = vmatprep.subr.bf16.mxu0 %v7312_v57  ;;  %5369 = vmatprep.subr.bf16.mxu1 %v7315_v58  ;;  %v7407_v57 = vld [vmem:[#allocation5 + $0x58c] ss:$16 sps:$4 sm:$0xff]   ;;  %v7402_v58 = vld [vmem:[#allocation5 + $0x580] ss:$16 sps:$4 sm:$0xff]  }
  0xd1   :  { %4878 = vmatpush1.bf16.msra.mxu0 %v7310_v59  ;;  %5370 = vmatpush1.bf16.msra.mxu1 %v7313_v60  ;;  %v7405_v59 = vld [vmem:[#allocation5 + $0x588] ss:$16 sps:$4 sm:$0xff]   ;;  %v7410_v60 = vld [vmem:[#allocation5 + $0x5a4] ss:$16 sps:$4 sm:$0xff]  }
  0xd2   :  { %4879 = vmatprep.subr.bf16.mxu0 %v7318_v61  ;;  %5371 = vmatprep.subr.bf16.mxu1 %v7321_v62  ;;  %v7413_v61 = vld [vmem:[#allocation5 + $0x5ac] ss:$16 sps:$4 sm:$0xff]   ;;  %v7408_v62 = vld [vmem:[#allocation5 + $0x5a0] ss:$16 sps:$4 sm:$0xff]  }
  0xd5   :  { %4880 = vmatpush1.bf16.msra.mxu0 %v7316_v63  ;;  %5372 = vmatpush1.bf16.msra.mxu1 %v7319_v0  ;;  %v7411_v63 = vld [vmem:[#allocation5 + $0x5a8] ss:$16 sps:$4 sm:$0xff]   ;;  %v7416_v0 = vld [vmem:[#allocation5 + $0x5c4] ss:$16 sps:$4 sm:$0xff]  }
  0xd6   :  { %4881 = vmatprep.subr.bf16.mxu0 %v7324_v1  ;;  %5373 = vmatprep.subr.bf16.mxu1 %v7327_v2  ;;  %v7419_v1 = vld [vmem:[#allocation5 + $0x5cc] ss:$16 sps:$4 sm:$0xff]   ;;  %v7414_v2 = vld [vmem:[#allocation5 + $0x5c0] ss:$16 sps:$4 sm:$0xff]  }
  0xd9   :  { %4882 = vmatpush1.bf16.msra.mxu0 %v7322_v3  ;;  %5374 = vmatpush1.bf16.msra.mxu1 %v7325_v4  ;;  %v7417_v3 = vld [vmem:[#allocation5 + $0x5c8] ss:$16 sps:$4 sm:$0xff]   ;;  %v7422_v4 = vld [vmem:[#allocation5 + $0x5e4] ss:$16 sps:$4 sm:$0xff]  }
  0xda   :  { %4892 = vmatprep.subr.bf16.mxu0 %v7332_v5  ;;  %5384 = vmatprep.subr.bf16.mxu1 %v7335_v6  ;;  %v7425_v5 = vld [vmem:[#allocation5 + $0x5ec] ss:$16 sps:$4 sm:$0xff]   ;;  %v7420_v6 = vld [vmem:[#allocation5 + $0x5e0] ss:$16 sps:$4 sm:$0xff]  }
  0xdc   :  { %4884 = vmatmul.mubr.bf16.vlgmr.msra.gmra.mrb[0].mxu0 %v6165_v7  ;;  %5376 = vmatmul.mubr.bf16.vlgmr.msra.gmra.mrb[0].mxu1 %v6165_v7  ;;  %v7423_v7 = vld [vmem:[#allocation5 + $0x5e8] ss:$16 sps:$4 sm:$0xff]  }
  0xdd   :  { %4893 = vmatpush1.bf16.msra.mxu0 %v7330_v8  ;;  %5385 = vmatpush1.bf16.msra.mxu1 %v7333_v9  ;;  %v7430_v8 = vld [vmem:[#allocation5 + $0x604] ss:$16 sps:$4 sm:$0xff]   ;;  %v7433_v9 = vld [vmem:[#allocation5 + $0x60c] ss:$16 sps:$4 sm:$0xff]  }
  0xde   :  { %4894 = vmatprep.subr.bf16.mxu0 %v7338_v10  ;;  %5386 = vmatprep.subr.bf16.mxu1 %v7341_v12  ;;  %v7428_v10 = vld [vmem:[#allocation5 + $0x600] ss:$16 sps:$4 sm:$0xff]   ;;  %v6167_v12 = vcombine.low %v8588_v11, %v8588_v11  ;;  %v7445_v11 = vld [vmem:[#allocation5 + $0x64c] ss:$16 sps:$4 sm:$0xff]  }
  0xdf   :  { %4924 = vmatprep.mubr.bf16.mxu0 %v6168_v13  ;;  %5416 = vmatprep.mubr.bf16.mxu1 %v6168_v13  ;;  %v7431_v13 = vld [vmem:[#allocation5 + $0x608] ss:$16 sps:$4 sm:$0xff]  }
  0xe1   :  { %4895 = vmatpush1.bf16.msra.mxu0 %v7336_v14  ;;  %5387 = vmatpush1.bf16.msra.mxu1 %v7339_v15  ;;  %v8594_v14 = vld [vmem:[#allocation2 + $0x18] sm:$0xff]  ;;  %v7436_v15 = vld [vmem:[#allocation5 + $0x624] ss:$16 sps:$4 sm:$0xff]  }
  0xe2   :  { %4896 = vmatprep.subr.bf16.mxu0 %v7344_v16  ;;  %5388 = vmatprep.subr.bf16.mxu1 %v7347_v17  ;;  %v7439_v16 = vld [vmem:[#allocation5 + $0x62c] ss:$16 sps:$4 sm:$0xff]   ;;  %v6170_v17 = vcombine.high %v8594_v14, %v8594_v14 }
  0xe5   :  { %4897 = vmatpush1.bf16.msra.mxu0 %v7342_v18  ;;  %5389 = vmatpush1.bf16.msra.mxu1 %v7345_v19  ;;  %v7434_v18 = vld [vmem:[#allocation5 + $0x620] ss:$16 sps:$4 sm:$0xff]   ;;  %v7437_v19 = vld [vmem:[#allocation5 + $0x628] ss:$16 sps:$4 sm:$0xff]  }
  0xe6   :  { %4898 = vmatprep.subr.bf16.mxu0 %v7350_v20  ;;  %5390 = vmatprep.subr.bf16.mxu1 %v7353_v21  ;;  %v7442_v20 = vld [vmem:[#allocation5 + $0x644] ss:$16 sps:$4 sm:$0xff]   ;;  %v7440_v21 = vld [vmem:[#allocation5 + $0x640] ss:$16 sps:$4 sm:$0xff]  }
  0xe9   :  { %4899 = vmatpush1.bf16.msra.mxu0 %v7348_v22  ;;  %5391 = vmatpush1.bf16.msra.mxu1 %v7351_v23  ;;  %v7443_v22 = vld [vmem:[#allocation5 + $0x648] ss:$16 sps:$4 sm:$0xff]   ;;  %v7448_v23 = vld [vmem:[#allocation5 + $0x664] ss:$16 sps:$4 sm:$0xff]  }
  0xea   :  { %4900 = vmatprep.subr.bf16.mxu0 %v7356_v24  ;;  %5392 = vmatprep.subr.bf16.mxu1 %v7359_v25  ;;  %v7451_v24 = vld [vmem:[#allocation5 + $0x66c] ss:$16 sps:$4 sm:$0xff]   ;;  %v7446_v25 = vld [vmem:[#allocation5 + $0x660] ss:$16 sps:$4 sm:$0xff]  }
  0xed   :  { %4901 = vmatpush1.bf16.msra.mxu0 %v7354_v26  ;;  %5393 = vmatpush1.bf16.msra.mxu1 %v7357_v27  ;;  %v7449_v26 = vld [vmem:[#allocation5 + $0x668] ss:$16 sps:$4 sm:$0xff]   ;;  %v7454_v27 = vld [vmem:[#allocation5 + $0x684] ss:$16 sps:$4 sm:$0xff]  }
  0xee   :  { %4902 = vmatprep.subr.bf16.mxu0 %v7362_v28  ;;  %5394 = vmatprep.subr.bf16.mxu1 %v7365_v29  ;;  %v7457_v28 = vld [vmem:[#allocation5 + $0x68c] ss:$16 sps:$4 sm:$0xff]   ;;  %v7452_v29 = vld [vmem:[#allocation5 + $0x680] ss:$16 sps:$4 sm:$0xff]  }
  0xf1   :  { %4903 = vmatpush1.bf16.msra.mxu0 %v7360_v30  ;;  %5395 = vmatpush1.bf16.msra.mxu1 %v7363_v31  ;;  %v7455_v30 = vld [vmem:[#allocation5 + $0x688] ss:$16 sps:$4 sm:$0xff]   ;;  %v7460_v31 = vld [vmem:[#allocation5 + $0x6a4] ss:$16 sps:$4 sm:$0xff]  }
  0xf2   :  { %4904 = vmatprep.subr.bf16.mxu0 %v7368_v32  ;;  %5396 = vmatprep.subr.bf16.mxu1 %v7371_v33  ;;  %v7463_v32 = vld [vmem:[#allocation5 + $0x6ac] ss:$16 sps:$4 sm:$0xff]   ;;  %v7458_v33 = vld [vmem:[#allocation5 + $0x6a0] ss:$16 sps:$4 sm:$0xff]  }
  0xf5   :  { %4905 = vmatpush1.bf16.msra.mxu0 %v7366_v34  ;;  %5397 = vmatpush1.bf16.msra.mxu1 %v7369_v35  ;;  %v7461_v34 = vld [vmem:[#allocation5 + $0x6a8] ss:$16 sps:$4 sm:$0xff]   ;;  %v7466_v35 = vld [vmem:[#allocation5 + $0x6c4] ss:$16 sps:$4 sm:$0xff]  }
  0xf6   :  { %4906 = vmatprep.subr.bf16.mxu0 %v7374_v36  ;;  %5398 = vmatprep.subr.bf16.mxu1 %v7377_v37  ;;  %v7469_v36 = vld [vmem:[#allocation5 + $0x6cc] ss:$16 sps:$4 sm:$0xff]   ;;  %v7464_v37 = vld [vmem:[#allocation5 + $0x6c0] ss:$16 sps:$4 sm:$0xff]  }
  0xf9   :  { %4907 = vmatpush1.bf16.msra.mxu0 %v7372_v38  ;;  %5399 = vmatpush1.bf16.msra.mxu1 %v7375_v39  ;;  %v7467_v38 = vld [vmem:[#allocation5 + $0x6c8] ss:$16 sps:$4 sm:$0xff]   ;;  %v7472_v39 = vld [vmem:[#allocation5 + $0x6e4] ss:$16 sps:$4 sm:$0xff]  }
  0xfa   :  { %4908 = vmatprep.subr.bf16.mxu0 %v7380_v40  ;;  %5400 = vmatprep.subr.bf16.mxu1 %v7383_v41  ;;  %v7475_v40 = vld [vmem:[#allocation5 + $0x6ec] ss:$16 sps:$4 sm:$0xff]   ;;  %v7470_v41 = vld [vmem:[#allocation5 + $0x6e0] ss:$16 sps:$4 sm:$0xff]  }
  0xfd   :  { %4909 = vmatpush1.bf16.msra.mxu0 %v7378_v42  ;;  %5401 = vmatpush1.bf16.msra.mxu1 %v7381_v43  ;;  %v7473_v42 = vld [vmem:[#allocation5 + $0x6e8] ss:$16 sps:$4 sm:$0xff]   ;;  %v7478_v43 = vld [vmem:[#allocation5 + $0x704] ss:$16 sps:$4 sm:$0xff]  }
  0xfe   :  { %4910 = vmatprep.subr.bf16.mxu0 %v7386_v44  ;;  %5402 = vmatprep.subr.bf16.mxu1 %v7389_v45  ;;  %v7481_v44 = vld [vmem:[#allocation5 + $0x70c] ss:$16 sps:$4 sm:$0xff]   ;;  %v7476_v45 = vld [vmem:[#allocation5 + $0x700] ss:$16 sps:$4 sm:$0xff]  }
 0x101   :  { %4911 = vmatpush1.bf16.msra.mxu0 %v7384_v46  ;;  %5403 = vmatpush1.bf16.msra.mxu1 %v7387_v47  ;;  %v7479_v46 = vld [vmem:[#allocation5 + $0x708] ss:$16 sps:$4 sm:$0xff]   ;;  %v7484_v47 = vld [vmem:[#allocation5 + $0x724] ss:$16 sps:$4 sm:$0xff]  }
 0x102   :  { %4912 = vmatprep.subr.bf16.mxu0 %v7392_v48  ;;  %5404 = vmatprep.subr.bf16.mxu1 %v7395_v49  ;;  %v7487_v48 = vld [vmem:[#allocation5 + $0x72c] ss:$16 sps:$4 sm:$0xff]   ;;  %v7482_v49 = vld [vmem:[#allocation5 + $0x720] ss:$16 sps:$4 sm:$0xff]  }
 0x105   :  { %4913 = vmatpush1.bf16.msra.mxu0 %v7390_v50  ;;  %5405 = vmatpush1.bf16.msra.mxu1 %v7393_v51  ;;  %v7485_v50 = vld [vmem:[#allocation5 + $0x728] ss:$16 sps:$4 sm:$0xff]   ;;  %v7490_v51 = vld [vmem:[#allocation5 + $0x744] ss:$16 sps:$4 sm:$0xff]  }
 0x106   :  { %4914 = vmatprep.subr.bf16.mxu0 %v7398_v52  ;;  %5406 = vmatprep.subr.bf16.mxu1 %v7401_v53  ;;  %v7493_v52 = vld [vmem:[#allocation5 + $0x74c] ss:$16 sps:$4 sm:$0xff]   ;;  %v7488_v53 = vld [vmem:[#allocation5 + $0x740] ss:$16 sps:$4 sm:$0xff]  }
 0x109   :  { %4915 = vmatpush1.bf16.msra.mxu0 %v7396_v54  ;;  %5407 = vmatpush1.bf16.msra.mxu1 %v7399_v55  ;;  %v7491_v54 = vld [vmem:[#allocation5 + $0x748] ss:$16 sps:$4 sm:$0xff]   ;;  %v7496_v55 = vld [vmem:[#allocation5 + $0x764] ss:$16 sps:$4 sm:$0xff]  }
 0x10a   :  { %4916 = vmatprep.subr.bf16.mxu0 %v7404_v56  ;;  %5408 = vmatprep.subr.bf16.mxu1 %v7407_v57  ;;  %v7499_v56 = vld [vmem:[#allocation5 + $0x76c] ss:$16 sps:$4 sm:$0xff]   ;;  %v7494_v57 = vld [vmem:[#allocation5 + $0x760] ss:$16 sps:$4 sm:$0xff]  }
 0x10d   :  { %4917 = vmatpush1.bf16.msra.mxu0 %v7402_v58  ;;  %5409 = vmatpush1.bf16.msra.mxu1 %v7405_v59  ;;  %v7497_v58 = vld [vmem:[#allocation5 + $0x768] ss:$16 sps:$4 sm:$0xff]   ;;  %v7502_v59 = vld [vmem:[#allocation5 + $0x784] ss:$16 sps:$4 sm:$0xff]  }
 0x10e   :  { %4918 = vmatprep.subr.bf16.mxu0 %v7410_v60  ;;  %5410 = vmatprep.subr.bf16.mxu1 %v7413_v61  ;;  %v7505_v60 = vld [vmem:[#allocation5 + $0x78c] ss:$16 sps:$4 sm:$0xff]   ;;  %v7500_v61 = vld [vmem:[#allocation5 + $0x780] ss:$16 sps:$4 sm:$0xff]  }
 0x111   :  { %4919 = vmatpush1.bf16.msra.mxu0 %v7408_v62  ;;  %5411 = vmatpush1.bf16.msra.mxu1 %v7411_v63  ;;  %v7503_v62 = vld [vmem:[#allocation5 + $0x788] ss:$16 sps:$4 sm:$0xff]   ;;  %v7508_v63 = vld [vmem:[#allocation5 + $0x7a4] ss:$16 sps:$4 sm:$0xff]  }
 0x112   :  { %4920 = vmatprep.subr.bf16.mxu0 %v7416_v0  ;;  %5412 = vmatprep.subr.bf16.mxu1 %v7419_v1  ;;  %v7511_v0 = vld [vmem:[#allocation5 + $0x7ac] ss:$16 sps:$4 sm:$0xff]   ;;  %v7506_v1 = vld [vmem:[#allocation5 + $0x7a0] ss:$16 sps:$4 sm:$0xff]  }
 0x115   :  { %4921 = vmatpush1.bf16.msra.mxu0 %v7414_v2  ;;  %5413 = vmatpush1.bf16.msra.mxu1 %v7417_v3  ;;  %v7509_v2 = vld [vmem:[#allocation5 + $0x7a8] ss:$16 sps:$4 sm:$0xff]   ;;  %v7514_v3 = vld [vmem:[#allocation5 + $0x7c4] ss:$16 sps:$4 sm:$0xff]  }
 0x116   :  { %4922 = vmatprep.subr.bf16.mxu0 %v7422_v4  ;;  %5414 = vmatprep.subr.bf16.mxu1 %v7425_v5  ;;  %v7517_v4 = vld [vmem:[#allocation5 + $0x7cc] ss:$16 sps:$4 sm:$0xff]   ;;  %v7512_v5 = vld [vmem:[#allocation5 + $0x7c0] ss:$16 sps:$4 sm:$0xff]  }
 0x119   :  { %4923 = vmatpush1.bf16.msra.mxu0 %v7420_v6  ;;  %5415 = vmatpush1.bf16.msra.mxu1 %v7423_v7  ;;  %v7515_v6 = vld [vmem:[#allocation5 + $0x7c8] ss:$16 sps:$4 sm:$0xff]   ;;  %v7520_v7 = vld [vmem:[#allocation5 + $0x7e4] ss:$16 sps:$4 sm:$0xff]  }
 0x11a   :  { %4933 = vmatprep.subr.bf16.mxu0 %v7430_v8  ;;  %5425 = vmatprep.subr.bf16.mxu1 %v7433_v9  ;;  %v7523_v8 = vld [vmem:[#allocation5 + $0x7ec] ss:$16 sps:$4 sm:$0xff]   ;;  %v7518_v9 = vld [vmem:[#allocation5 + $0x7e0] ss:$16 sps:$4 sm:$0xff]  }
 0x11c   :  { %4925 = vmatmul.mubr.bf16.vlgmr.msra.gmra.mrb[0].mxu0 %v6167_v12  ;;  %5417 = vmatmul.mubr.bf16.vlgmr.msra.gmra.mrb[0].mxu1 %v6167_v12  ;;  %v7528_v12 = vld [vmem:[#allocation5 + $0x804] ss:$16 sps:$4 sm:$0xff]  }
 0x11d   :  { %4934 = vmatpush1.bf16.msra.mxu0 %v7428_v10  ;;  %5426 = vmatpush1.bf16.msra.mxu1 %v7431_v13  ;;  %v7521_v10 = vld [vmem:[#allocation5 + $0x7e8] ss:$16 sps:$4 sm:$0xff]   ;;  %v7531_v13 = vld [vmem:[#allocation5 + $0x80c] ss:$16 sps:$4 sm:$0xff]  }
 0x11e   :  { %4935 = vmatprep.subr.bf16.mxu0 %v7436_v15  ;;  %5427 = vmatprep.subr.bf16.mxu1 %v7439_v16  ;;  %v7526_v15 = vld [vmem:[#allocation5 + $0x800] ss:$16 sps:$4 sm:$0xff]   ;;  %v6169_v16 = vcombine.low %v8594_v14, %v8594_v14  ;;  %v7540_v14 = vld [vmem:[#allocation5 + $0x844] ss:$16 sps:$4 sm:$0xff]  }
 0x11f   :  { %4965 = vmatprep.mubr.bf16.mxu0 %v6170_v17  ;;  %5457 = vmatprep.mubr.bf16.mxu1 %v6170_v17  ;;  %v8600_v17 = vld [vmem:[#allocation2 + $0x20] sm:$0xff] }
 0x121   :  { %4936 = vmatpush1.bf16.msra.mxu0 %v7434_v18  ;;  %5428 = vmatpush1.bf16.msra.mxu1 %v7437_v19  ;;  %v7529_v18 = vld [vmem:[#allocation5 + $0x808] ss:$16 sps:$4 sm:$0xff]   ;;  %v7534_v19 = vld [vmem:[#allocation5 + $0x824] ss:$16 sps:$4 sm:$0xff]  }
 0x122   :  { %4937 = vmatprep.subr.bf16.mxu0 %v7442_v20  ;;  %5429 = vmatprep.subr.bf16.mxu1 %v7445_v11  ;;  %v7537_v20 = vld [vmem:[#allocation5 + $0x82c] ss:$16 sps:$4 sm:$0xff]   ;;  %v6172_v11 = vcombine.high %v8600_v17, %v8600_v17 }
 0x125   :  { %4938 = vmatpush1.bf16.msra.mxu0 %v7440_v21  ;;  %5430 = vmatpush1.bf16.msra.mxu1 %v7443_v22  ;;  %v7532_v21 = vld [vmem:[#allocation5 + $0x820] ss:$16 sps:$4 sm:$0xff]   ;;  %v7535_v22 = vld [vmem:[#allocation5 + $0x828] ss:$16 sps:$4 sm:$0xff]  }
 0x126   :  { %4939 = vmatprep.subr.bf16.mxu0 %v7448_v23  ;;  %5431 = vmatprep.subr.bf16.mxu1 %v7451_v24  ;;  %v7543_v23 = vld [vmem:[#allocation5 + $0x84c] ss:$16 sps:$4 sm:$0xff]   ;;  %v7538_v24 = vld [vmem:[#allocation5 + $0x840] ss:$16 sps:$4 sm:$0xff]  }
 0x129   :  { %4940 = vmatpush1.bf16.msra.mxu0 %v7446_v25  ;;  %5432 = vmatpush1.bf16.msra.mxu1 %v7449_v26  ;;  %v7541_v25 = vld [vmem:[#allocation5 + $0x848] ss:$16 sps:$4 sm:$0xff]   ;;  %v7546_v26 = vld [vmem:[#allocation5 + $0x864] ss:$16 sps:$4 sm:$0xff]  }
 0x12a   :  { %4941 = vmatprep.subr.bf16.mxu0 %v7454_v27  ;;  %5433 = vmatprep.subr.bf16.mxu1 %v7457_v28  ;;  %v7549_v27 = vld [vmem:[#allocation5 + $0x86c] ss:$16 sps:$4 sm:$0xff]   ;;  %v7544_v28 = vld [vmem:[#allocation5 + $0x860] ss:$16 sps:$4 sm:$0xff]  }
 0x12d   :  { %4942 = vmatpush1.bf16.msra.mxu0 %v7452_v29  ;;  %5434 = vmatpush1.bf16.msra.mxu1 %v7455_v30  ;;  %v7547_v29 = vld [vmem:[#allocation5 + $0x868] ss:$16 sps:$4 sm:$0xff]   ;;  %v7552_v30 = vld [vmem:[#allocation5 + $0x884] ss:$16 sps:$4 sm:$0xff]  }
 0x12e   :  { %4943 = vmatprep.subr.bf16.mxu0 %v7460_v31  ;;  %5435 = vmatprep.subr.bf16.mxu1 %v7463_v32  ;;  %v7555_v31 = vld [vmem:[#allocation5 + $0x88c] ss:$16 sps:$4 sm:$0xff]   ;;  %v7550_v32 = vld [vmem:[#allocation5 + $0x880] ss:$16 sps:$4 sm:$0xff]  }
 0x131   :  { %4944 = vmatpush1.bf16.msra.mxu0 %v7458_v33  ;;  %5436 = vmatpush1.bf16.msra.mxu1 %v7461_v34  ;;  %v7553_v33 = vld [vmem:[#allocation5 + $0x888] ss:$16 sps:$4 sm:$0xff]   ;;  %v7558_v34 = vld [vmem:[#allocation5 + $0x8a4] ss:$16 sps:$4 sm:$0xff]  }
 0x132   :  { %4945 = vmatprep.subr.bf16.mxu0 %v7466_v35  ;;  %5437 = vmatprep.subr.bf16.mxu1 %v7469_v36  ;;  %v7561_v35 = vld [vmem:[#allocation5 + $0x8ac] ss:$16 sps:$4 sm:$0xff]   ;;  %v7556_v36 = vld [vmem:[#allocation5 + $0x8a0] ss:$16 sps:$4 sm:$0xff]  }
 0x135   :  { %4946 = vmatpush1.bf16.msra.mxu0 %v7464_v37  ;;  %5438 = vmatpush1.bf16.msra.mxu1 %v7467_v38  ;;  %v7559_v37 = vld [vmem:[#allocation5 + $0x8a8] ss:$16 sps:$4 sm:$0xff]   ;;  %v7564_v38 = vld [vmem:[#allocation5 + $0x8c4] ss:$16 sps:$4 sm:$0xff]  }
 0x136   :  { %4947 = vmatprep.subr.bf16.mxu0 %v7472_v39  ;;  %5439 = vmatprep.subr.bf16.mxu1 %v7475_v40  ;;  %v7567_v39 = vld [vmem:[#allocation5 + $0x8cc] ss:$16 sps:$4 sm:$0xff]   ;;  %v7562_v40 = vld [vmem:[#allocation5 + $0x8c0] ss:$16 sps:$4 sm:$0xff]  }
 0x139   :  { %4948 = vmatpush1.bf16.msra.mxu0 %v7470_v41  ;;  %5440 = vmatpush1.bf16.msra.mxu1 %v7473_v42  ;;  %v7565_v41 = vld [vmem:[#allocation5 + $0x8c8] ss:$16 sps:$4 sm:$0xff]   ;;  %v7570_v42 = vld [vmem:[#allocation5 + $0x8e4] ss:$16 sps:$4 sm:$0xff]  }
 0x13a   :  { %4949 = vmatprep.subr.bf16.mxu0 %v7478_v43  ;;  %5441 = vmatprep.subr.bf16.mxu1 %v7481_v44  ;;  %v7573_v43 = vld [vmem:[#allocation5 + $0x8ec] ss:$16 sps:$4 sm:$0xff]   ;;  %v7568_v44 = vld [vmem:[#allocation5 + $0x8e0] ss:$16 sps:$4 sm:$0xff]  }
 0x13d   :  { %4950 = vmatpush1.bf16.msra.mxu0 %v7476_v45  ;;  %5442 = vmatpush1.bf16.msra.mxu1 %v7479_v46  ;;  %v7571_v45 = vld [vmem:[#allocation5 + $0x8e8] ss:$16 sps:$4 sm:$0xff]   ;;  %v7576_v46 = vld [vmem:[#allocation5 + $0x904] ss:$16 sps:$4 sm:$0xff]  }
 0x13e   :  { %4951 = vmatprep.subr.bf16.mxu0 %v7484_v47  ;;  %5443 = vmatprep.subr.bf16.mxu1 %v7487_v48  ;;  %v7579_v47 = vld [vmem:[#allocation5 + $0x90c] ss:$16 sps:$4 sm:$0xff]   ;;  %v7574_v48 = vld [vmem:[#allocation5 + $0x900] ss:$16 sps:$4 sm:$0xff]  }
 0x141   :  { %4952 = vmatpush1.bf16.msra.mxu0 %v7482_v49  ;;  %5444 = vmatpush1.bf16.msra.mxu1 %v7485_v50  ;;  %v7577_v49 = vld [vmem:[#allocation5 + $0x908] ss:$16 sps:$4 sm:$0xff]   ;;  %v7582_v50 = vld [vmem:[#allocation5 + $0x924] ss:$16 sps:$4 sm:$0xff]  }
 0x142   :  { %4953 = vmatprep.subr.bf16.mxu0 %v7490_v51  ;;  %5445 = vmatprep.subr.bf16.mxu1 %v7493_v52  ;;  %v7585_v51 = vld [vmem:[#allocation5 + $0x92c] ss:$16 sps:$4 sm:$0xff]   ;;  %v7580_v52 = vld [vmem:[#allocation5 + $0x920] ss:$16 sps:$4 sm:$0xff]  }
 0x145   :  { %4954 = vmatpush1.bf16.msra.mxu0 %v7488_v53  ;;  %5446 = vmatpush1.bf16.msra.mxu1 %v7491_v54  ;;  %v7583_v53 = vld [vmem:[#allocation5 + $0x928] ss:$16 sps:$4 sm:$0xff]   ;;  %v7588_v54 = vld [vmem:[#allocation5 + $0x944] ss:$16 sps:$4 sm:$0xff]  }
 0x146   :  { %4955 = vmatprep.subr.bf16.mxu0 %v7496_v55  ;;  %5447 = vmatprep.subr.bf16.mxu1 %v7499_v56  ;;  %v7591_v55 = vld [vmem:[#allocation5 + $0x94c] ss:$16 sps:$4 sm:$0xff]   ;;  %v7586_v56 = vld [vmem:[#allocation5 + $0x940] ss:$16 sps:$4 sm:$0xff]  }
 0x149   :  { %4956 = vmatpush1.bf16.msra.mxu0 %v7494_v57  ;;  %5448 = vmatpush1.bf16.msra.mxu1 %v7497_v58  ;;  %v7589_v57 = vld [vmem:[#allocation5 + $0x948] ss:$16 sps:$4 sm:$0xff]   ;;  %v7594_v58 = vld [vmem:[#allocation5 + $0x964] ss:$16 sps:$4 sm:$0xff]  }
 0x14a   :  { %4957 = vmatprep.subr.bf16.mxu0 %v7502_v59  ;;  %5449 = vmatprep.subr.bf16.mxu1 %v7505_v60  ;;  %v7597_v59 = vld [vmem:[#allocation5 + $0x96c] ss:$16 sps:$4 sm:$0xff]   ;;  %v7592_v60 = vld [vmem:[#allocation5 + $0x960] ss:$16 sps:$4 sm:$0xff]  }
 0x14d   :  { %4958 = vmatpush1.bf16.msra.mxu0 %v7500_v61  ;;  %5450 = vmatpush1.bf16.msra.mxu1 %v7503_v62  ;;  %v7595_v61 = vld [vmem:[#allocation5 + $0x968] ss:$16 sps:$4 sm:$0xff]   ;;  %v7600_v62 = vld [vmem:[#allocation5 + $0x984] ss:$16 sps:$4 sm:$0xff]  }
 0x14e   :  { %4959 = vmatprep.subr.bf16.mxu0 %v7508_v63  ;;  %5451 = vmatprep.subr.bf16.mxu1 %v7511_v0  ;;  %v7603_v63 = vld [vmem:[#allocation5 + $0x98c] ss:$16 sps:$4 sm:$0xff]   ;;  %v7598_v0 = vld [vmem:[#allocation5 + $0x980] ss:$16 sps:$4 sm:$0xff]  }
 0x151   :  { %4960 = vmatpush1.bf16.msra.mxu0 %v7506_v1  ;;  %5452 = vmatpush1.bf16.msra.mxu1 %v7509_v2  ;;  %v7601_v1 = vld [vmem:[#allocation5 + $0x988] ss:$16 sps:$4 sm:$0xff]   ;;  %v7606_v2 = vld [vmem:[#allocation5 + $0x9a4] ss:$16 sps:$4 sm:$0xff]  }
 0x152   :  { %4961 = vmatprep.subr.bf16.mxu0 %v7514_v3  ;;  %5453 = vmatprep.subr.bf16.mxu1 %v7517_v4  ;;  %v7609_v3 = vld [vmem:[#allocation5 + $0x9ac] ss:$16 sps:$4 sm:$0xff]   ;;  %v7604_v4 = vld [vmem:[#allocation5 + $0x9a0] ss:$16 sps:$4 sm:$0xff]  }
 0x155   :  { %4962 = vmatpush1.bf16.msra.mxu0 %v7512_v5  ;;  %5454 = vmatpush1.bf16.msra.mxu1 %v7515_v6  ;;  %v7607_v5 = vld [vmem:[#allocation5 + $0x9a8] ss:$16 sps:$4 sm:$0xff]   ;;  %v7612_v6 = vld [vmem:[#allocation5 + $0x9c4] ss:$16 sps:$4 sm:$0xff]  }
 0x156   :  { %4963 = vmatprep.subr.bf16.mxu0 %v7520_v7  ;;  %5455 = vmatprep.subr.bf16.mxu1 %v7523_v8  ;;  %v7615_v7 = vld [vmem:[#allocation5 + $0x9cc] ss:$16 sps:$4 sm:$0xff]   ;;  %v7610_v8 = vld [vmem:[#allocation5 + $0x9c0] ss:$16 sps:$4 sm:$0xff]  }
 0x159   :  { %4964 = vmatpush1.bf16.msra.mxu0 %v7518_v9  ;;  %5456 = vmatpush1.bf16.msra.mxu1 %v7521_v10  ;;  %v7613_v9 = vld [vmem:[#allocation5 + $0x9c8] ss:$16 sps:$4 sm:$0xff]   ;;  %v7618_v10 = vld [vmem:[#allocation5 + $0x9e4] ss:$16 sps:$4 sm:$0xff]  }
 0x15a   :  { %4974 = vmatprep.subr.bf16.mxu0 %v7528_v12  ;;  %5466 = vmatprep.subr.bf16.mxu1 %v7531_v13  ;;  %v7621_v12 = vld [vmem:[#allocation5 + $0x9ec] ss:$16 sps:$4 sm:$0xff]   ;;  %v7616_v13 = vld [vmem:[#allocation5 + $0x9e0] ss:$16 sps:$4 sm:$0xff]  }
 0x15c   :  { %4966 = vmatmul.mubr.bf16.vlgmr.msra.gmra.mrb[0].mxu0 %v6169_v16  ;;  %5458 = vmatmul.mubr.bf16.vlgmr.msra.gmra.mrb[0].mxu1 %v6169_v16  ;;  %v7626_v16 = vld [vmem:[#allocation5 + $0xa04] ss:$16 sps:$4 sm:$0xff]  }
 0x15d   :  { %4975 = vmatpush1.bf16.msra.mxu0 %v7526_v15  ;;  %5467 = vmatpush1.bf16.msra.mxu1 %v7529_v18  ;;  %v7619_v15 = vld [vmem:[#allocation5 + $0x9e8] ss:$16 sps:$4 sm:$0xff]   ;;  %v7629_v18 = vld [vmem:[#allocation5 + $0xa0c] ss:$16 sps:$4 sm:$0xff]  }
 0x15e   :  { %4976 = vmatprep.subr.bf16.mxu0 %v7534_v19  ;;  %5468 = vmatprep.subr.bf16.mxu1 %v7537_v20  ;;  %v8604_v19 = vld [vmem:[#allocation2 + $0x28] sm:$0xff]  ;;  %v6171_v20 = vcombine.low %v8600_v17, %v8600_v17  ;;  %v7638_v17 = vld [vmem:[#allocation5 + $0xa44] ss:$16 sps:$4 sm:$0xff]  }
 0x15f   :  { %5006 = vmatprep.mubr.bf16.mxu0 %v6172_v11  ;;  %5498 = vmatprep.mubr.bf16.mxu1 %v6172_v11  ;;  %v7624_v11 = vld [vmem:[#allocation5 + $0xa00] ss:$16 sps:$4 sm:$0xff]  }
 0x161   :  { %4977 = vmatpush1.bf16.msra.mxu0 %v7532_v21  ;;  %5469 = vmatpush1.bf16.msra.mxu1 %v7535_v22  ;;  %v7627_v21 = vld [vmem:[#allocation5 + $0xa08] ss:$16 sps:$4 sm:$0xff]   ;;  %v7632_v22 = vld [vmem:[#allocation5 + $0xa24] ss:$16 sps:$4 sm:$0xff]  }
 0x162   :  { %4978 = vmatprep.subr.bf16.mxu0 %v7540_v14  ;;  %5470 = vmatprep.subr.bf16.mxu1 %v7543_v23  ;;  %v7635_v14 = vld [vmem:[#allocation5 + $0xa2c] ss:$16 sps:$4 sm:$0xff]   ;;  %v6174_v23 = vcombine.high %v8604_v19, %v8604_v19 }
 0x165   :  { %4979 = vmatpush1.bf16.msra.mxu0 %v7538_v24  ;;  %5471 = vmatpush1.bf16.msra.mxu1 %v7541_v25  ;;  %v7630_v24 = vld [vmem:[#allocation5 + $0xa20] ss:$16 sps:$4 sm:$0xff]   ;;  %v7633_v25 = vld [vmem:[#allocation5 + $0xa28] ss:$16 sps:$4 sm:$0xff]  }
 0x166   :  { %4980 = vmatprep.subr.bf16.mxu0 %v7546_v26  ;;  %5472 = vmatprep.subr.bf16.mxu1 %v7549_v27  ;;  %v7641_v26 = vld [vmem:[#allocation5 + $0xa4c] ss:$16 sps:$4 sm:$0xff]   ;;  %v7636_v27 = vld [vmem:[#allocation5 + $0xa40] ss:$16 sps:$4 sm:$0xff]  }
 0x169   :  { %4981 = vmatpush1.bf16.msra.mxu0 %v7544_v28  ;;  %5473 = vmatpush1.bf16.msra.mxu1 %v7547_v29  ;;  %v7639_v28 = vld [vmem:[#allocation5 + $0xa48] ss:$16 sps:$4 sm:$0xff]   ;;  %v7644_v29 = vld [vmem:[#allocation5 + $0xa64] ss:$16 sps:$4 sm:$0xff]  }
 0x16a   :  { %4982 = vmatprep.subr.bf16.mxu0 %v7552_v30  ;;  %5474 = vmatprep.subr.bf16.mxu1 %v7555_v31  ;;  %v7647_v30 = vld [vmem:[#allocation5 + $0xa6c] ss:$16 sps:$4 sm:$0xff]   ;;  %v7642_v31 = vld [vmem:[#allocation5 + $0xa60] ss:$16 sps:$4 sm:$0xff]  }
 0x16d   :  { %4983 = vmatpush1.bf16.msra.mxu0 %v7550_v32  ;;  %5475 = vmatpush1.bf16.msra.mxu1 %v7553_v33  ;;  %v7645_v32 = vld [vmem:[#allocation5 + $0xa68] ss:$16 sps:$4 sm:$0xff]   ;;  %v7650_v33 = vld [vmem:[#allocation5 + $0xa84] ss:$16 sps:$4 sm:$0xff]  }
 0x16e   :  { %4984 = vmatprep.subr.bf16.mxu0 %v7558_v34  ;;  %5476 = vmatprep.subr.bf16.mxu1 %v7561_v35  ;;  %v7653_v34 = vld [vmem:[#allocation5 + $0xa8c] ss:$16 sps:$4 sm:$0xff]   ;;  %v7648_v35 = vld [vmem:[#allocation5 + $0xa80] ss:$16 sps:$4 sm:$0xff]  }
 0x171   :  { %4985 = vmatpush1.bf16.msra.mxu0 %v7556_v36  ;;  %5477 = vmatpush1.bf16.msra.mxu1 %v7559_v37  ;;  %v7651_v36 = vld [vmem:[#allocation5 + $0xa88] ss:$16 sps:$4 sm:$0xff]   ;;  %v7656_v37 = vld [vmem:[#allocation5 + $0xaa4] ss:$16 sps:$4 sm:$0xff]  }
 0x172   :  { %4986 = vmatprep.subr.bf16.mxu0 %v7564_v38  ;;  %5478 = vmatprep.subr.bf16.mxu1 %v7567_v39  ;;  %v7659_v38 = vld [vmem:[#allocation5 + $0xaac] ss:$16 sps:$4 sm:$0xff]   ;;  %v7654_v39 = vld [vmem:[#allocation5 + $0xaa0] ss:$16 sps:$4 sm:$0xff]  }
 0x175   :  { %4987 = vmatpush1.bf16.msra.mxu0 %v7562_v40  ;;  %5479 = vmatpush1.bf16.msra.mxu1 %v7565_v41  ;;  %v7657_v40 = vld [vmem:[#allocation5 + $0xaa8] ss:$16 sps:$4 sm:$0xff]   ;;  %v7662_v41 = vld [vmem:[#allocation5 + $0xac4] ss:$16 sps:$4 sm:$0xff]  }
 0x176   :  { %4988 = vmatprep.subr.bf16.mxu0 %v7570_v42  ;;  %5480 = vmatprep.subr.bf16.mxu1 %v7573_v43  ;;  %v7665_v42 = vld [vmem:[#allocation5 + $0xacc] ss:$16 sps:$4 sm:$0xff]   ;;  %v7660_v43 = vld [vmem:[#allocation5 + $0xac0] ss:$16 sps:$4 sm:$0xff]  }
 0x179   :  { %4989 = vmatpush1.bf16.msra.mxu0 %v7568_v44  ;;  %5481 = vmatpush1.bf16.msra.mxu1 %v7571_v45  ;;  %v7663_v44 = vld [vmem:[#allocation5 + $0xac8] ss:$16 sps:$4 sm:$0xff]   ;;  %v7668_v45 = vld [vmem:[#allocation5 + $0xae4] ss:$16 sps:$4 sm:$0xff]  }
 0x17a   :  { %4990 = vmatprep.subr.bf16.mxu0 %v7576_v46  ;;  %5482 = vmatprep.subr.bf16.mxu1 %v7579_v47  ;;  %v7671_v46 = vld [vmem:[#allocation5 + $0xaec] ss:$16 sps:$4 sm:$0xff]   ;;  %v7666_v47 = vld [vmem:[#allocation5 + $0xae0] ss:$16 sps:$4 sm:$0xff]  }
 0x17d   :  { %4991 = vmatpush1.bf16.msra.mxu0 %v7574_v48  ;;  %5483 = vmatpush1.bf16.msra.mxu1 %v7577_v49  ;;  %v7669_v48 = vld [vmem:[#allocation5 + $0xae8] ss:$16 sps:$4 sm:$0xff]   ;;  %v7674_v49 = vld [vmem:[#allocation5 + $0xb04] ss:$16 sps:$4 sm:$0xff]  }
 0x17e   :  { %4992 = vmatprep.subr.bf16.mxu0 %v7582_v50  ;;  %5484 = vmatprep.subr.bf16.mxu1 %v7585_v51  ;;  %v7677_v50 = vld [vmem:[#allocation5 + $0xb0c] ss:$16 sps:$4 sm:$0xff]   ;;  %v7672_v51 = vld [vmem:[#allocation5 + $0xb00] ss:$16 sps:$4 sm:$0xff]  }
 0x181   :  { %4993 = vmatpush1.bf16.msra.mxu0 %v7580_v52  ;;  %5485 = vmatpush1.bf16.msra.mxu1 %v7583_v53  ;;  %v7675_v52 = vld [vmem:[#allocation5 + $0xb08] ss:$16 sps:$4 sm:$0xff]   ;;  %v7680_v53 = vld [vmem:[#allocation5 + $0xb24] ss:$16 sps:$4 sm:$0xff]  }
 0x182   :  { %4994 = vmatprep.subr.bf16.mxu0 %v7588_v54  ;;  %5486 = vmatprep.subr.bf16.mxu1 %v7591_v55  ;;  %v7683_v54 = vld [vmem:[#allocation5 + $0xb2c] ss:$16 sps:$4 sm:$0xff]   ;;  %v7678_v55 = vld [vmem:[#allocation5 + $0xb20] ss:$16 sps:$4 sm:$0xff]  }
 0x185   :  { %4995 = vmatpush1.bf16.msra.mxu0 %v7586_v56  ;;  %5487 = vmatpush1.bf16.msra.mxu1 %v7589_v57  ;;  %v7681_v56 = vld [vmem:[#allocation5 + $0xb28] ss:$16 sps:$4 sm:$0xff]   ;;  %v7686_v57 = vld [vmem:[#allocation5 + $0xb44] ss:$16 sps:$4 sm:$0xff]  }
 0x186   :  { %4996 = vmatprep.subr.bf16.mxu0 %v7594_v58  ;;  %5488 = vmatprep.subr.bf16.mxu1 %v7597_v59  ;;  %v7689_v58 = vld [vmem:[#allocation5 + $0xb4c] ss:$16 sps:$4 sm:$0xff]   ;;  %v7684_v59 = vld [vmem:[#allocation5 + $0xb40] ss:$16 sps:$4 sm:$0xff]  }
 0x189   :  { %4997 = vmatpush1.bf16.msra.mxu0 %v7592_v60  ;;  %5489 = vmatpush1.bf16.msra.mxu1 %v7595_v61  ;;  %v7687_v60 = vld [vmem:[#allocation5 + $0xb48] ss:$16 sps:$4 sm:$0xff]   ;;  %v7692_v61 = vld [vmem:[#allocation5 + $0xb64] ss:$16 sps:$4 sm:$0xff]  }
 0x18a   :  { %4998 = vmatprep.subr.bf16.mxu0 %v7600_v62  ;;  %5490 = vmatprep.subr.bf16.mxu1 %v7603_v63  ;;  %v7695_v62 = vld [vmem:[#allocation5 + $0xb6c] ss:$16 sps:$4 sm:$0xff]   ;;  %v7690_v63 = vld [vmem:[#allocation5 + $0xb60] ss:$16 sps:$4 sm:$0xff]  }
 0x18d   :  { %4999 = vmatpush1.bf16.msra.mxu0 %v7598_v0  ;;  %5491 = vmatpush1.bf16.msra.mxu1 %v7601_v1  ;;  %v7693_v0 = vld [vmem:[#allocation5 + $0xb68] ss:$16 sps:$4 sm:$0xff]   ;;  %v7698_v1 = vld [vmem:[#allocation5 + $0xb84] ss:$16 sps:$4 sm:$0xff]  }
 0x18e   :  { %5000 = vmatprep.subr.bf16.mxu0 %v7606_v2  ;;  %5492 = vmatprep.subr.bf16.mxu1 %v7609_v3  ;;  %v7701_v2 = vld [vmem:[#allocation5 + $0xb8c] ss:$16 sps:$4 sm:$0xff]   ;;  %v7696_v3 = vld [vmem:[#allocation5 + $0xb80] ss:$16 sps:$4 sm:$0xff]  }
 0x191   :  { %5001 = vmatpush1.bf16.msra.mxu0 %v7604_v4  ;;  %5493 = vmatpush1.bf16.msra.mxu1 %v7607_v5  ;;  %v7699_v4 = vld [vmem:[#allocation5 + $0xb88] ss:$16 sps:$4 sm:$0xff]   ;;  %v7704_v5 = vld [vmem:[#allocation5 + $0xba4] ss:$16 sps:$4 sm:$0xff]  }
 0x192   :  { %5002 = vmatprep.subr.bf16.mxu0 %v7612_v6  ;;  %5494 = vmatprep.subr.bf16.mxu1 %v7615_v7  ;;  %v7707_v6 = vld [vmem:[#allocation5 + $0xbac] ss:$16 sps:$4 sm:$0xff]   ;;  %v7702_v7 = vld [vmem:[#allocation5 + $0xba0] ss:$16 sps:$4 sm:$0xff]  }
 0x195   :  { %5003 = vmatpush1.bf16.msra.mxu0 %v7610_v8  ;;  %5495 = vmatpush1.bf16.msra.mxu1 %v7613_v9  ;;  %v7705_v8 = vld [vmem:[#allocation5 + $0xba8] ss:$16 sps:$4 sm:$0xff]   ;;  %v7710_v9 = vld [vmem:[#allocation5 + $0xbc4] ss:$16 sps:$4 sm:$0xff]  }
 0x196   :  { %5004 = vmatprep.subr.bf16.mxu0 %v7618_v10  ;;  %5496 = vmatprep.subr.bf16.mxu1 %v7621_v12  ;;  %v7713_v10 = vld [vmem:[#allocation5 + $0xbcc] ss:$16 sps:$4 sm:$0xff]   ;;  %v7708_v12 = vld [vmem:[#allocation5 + $0xbc0] ss:$16 sps:$4 sm:$0xff]  }
 0x199   :  { %5005 = vmatpush1.bf16.msra.mxu0 %v7616_v13  ;;  %5497 = vmatpush1.bf16.msra.mxu1 %v7619_v15  ;;  %v7711_v13 = vld [vmem:[#allocation5 + $0xbc8] ss:$16 sps:$4 sm:$0xff]   ;;  %v7716_v15 = vld [vmem:[#allocation5 + $0xbe4] ss:$16 sps:$4 sm:$0xff]  }
 0x19a   :  { %5015 = vmatprep.subr.bf16.mxu0 %v7626_v16  ;;  %5507 = vmatprep.subr.bf16.mxu1 %v7629_v18  ;;  %v7719_v16 = vld [vmem:[#allocation5 + $0xbec] ss:$16 sps:$4 sm:$0xff]   ;;  %v7714_v18 = vld [vmem:[#allocation5 + $0xbe0] ss:$16 sps:$4 sm:$0xff]  }
 0x19c   :  { %5007 = vmatmul.mubr.bf16.vlgmr.msra.gmra.mrb[0].mxu0 %v6171_v20  ;;  %5499 = vmatmul.mubr.bf16.vlgmr.msra.gmra.mrb[0].mxu1 %v6171_v20  ;;  %v7717_v20 = vld [vmem:[#allocation5 + $0xbe8] ss:$16 sps:$4 sm:$0xff]  }
 0x19d   :  { %5016 = vmatpush1.bf16.msra.mxu0 %v7624_v11  ;;  %5508 = vmatpush1.bf16.msra.mxu1 %v7627_v21  ;;  %v7724_v11 = vld [vmem:[#allocation5 + $0xc04] ss:$16 sps:$4 sm:$0xff]   ;;  %v7727_v21 = vld [vmem:[#allocation5 + $0xc0c] ss:$16 sps:$4 sm:$0xff]  }
 0x19e   :  { %5017 = vmatprep.subr.bf16.mxu0 %v7632_v22  ;;  %5509 = vmatprep.subr.bf16.mxu1 %v7635_v14  ;;  %v8610_v22 = vld [vmem:[#allocation2 + $0x30] sm:$0xff]  ;;  %v6173_v14 = vcombine.low %v8604_v19, %v8604_v19 }
 0x19f   :  { %5047 = vmatprep.mubr.bf16.mxu0 %v6174_v23  ;;  %5539 = vmatprep.mubr.bf16.mxu1 %v6174_v23  ;;  %v7722_v23 = vld [vmem:[#allocation5 + $0xc00] ss:$16 sps:$4 sm:$0xff]   ;;  %v7736_v19 = vld [vmem:[#allocation5 + $0xc44] ss:$16 sps:$4 sm:$0xff]  }
 0x1a1   :  { %5018 = vmatpush1.bf16.msra.mxu0 %v7630_v24  ;;  %5510 = vmatpush1.bf16.msra.mxu1 %v7633_v25  ;;  %v7725_v24 = vld [vmem:[#allocation5 + $0xc08] ss:$16 sps:$4 sm:$0xff]   ;;  %v7730_v25 = vld [vmem:[#allocation5 + $0xc24] ss:$16 sps:$4 sm:$0xff]  }
 0x1a2   :  { %5019 = vmatprep.subr.bf16.mxu0 %v7638_v17  ;;  %5511 = vmatprep.subr.bf16.mxu1 %v7641_v26  ;;  %v7733_v17 = vld [vmem:[#allocation5 + $0xc2c] ss:$16 sps:$4 sm:$0xff]   ;;  %v6176_v26 = vcombine.high %v8610_v22, %v8610_v22 }
 0x1a5   :  { %5020 = vmatpush1.bf16.msra.mxu0 %v7636_v27  ;;  %5512 = vmatpush1.bf16.msra.mxu1 %v7639_v28  ;;  %v7728_v27 = vld [vmem:[#allocation5 + $0xc20] ss:$16 sps:$4 sm:$0xff]   ;;  %v7731_v28 = vld [vmem:[#allocation5 + $0xc28] ss:$16 sps:$4 sm:$0xff]  }
 0x1a6   :  { %5021 = vmatprep.subr.bf16.mxu0 %v7644_v29  ;;  %5513 = vmatprep.subr.bf16.mxu1 %v7647_v30  ;;  %v7739_v29 = vld [vmem:[#allocation5 + $0xc4c] ss:$16 sps:$4 sm:$0xff]   ;;  %v7734_v30 = vld [vmem:[#allocation5 + $0xc40] ss:$16 sps:$4 sm:$0xff]  }
 0x1a9   :  { %5022 = vmatpush1.bf16.msra.mxu0 %v7642_v31  ;;  %5514 = vmatpush1.bf16.msra.mxu1 %v7645_v32  ;;  %v7737_v31 = vld [vmem:[#allocation5 + $0xc48] ss:$16 sps:$4 sm:$0xff]   ;;  %v7742_v32 = vld [vmem:[#allocation5 + $0xc64] ss:$16 sps:$4 sm:$0xff]  }
 0x1aa   :  { %5023 = vmatprep.subr.bf16.mxu0 %v7650_v33  ;;  %5515 = vmatprep.subr.bf16.mxu1 %v7653_v34  ;;  %v7745_v33 = vld [vmem:[#allocation5 + $0xc6c] ss:$16 sps:$4 sm:$0xff]   ;;  %v7740_v34 = vld [vmem:[#allocation5 + $0xc60] ss:$16 sps:$4 sm:$0xff]  }
 0x1ad   :  { %5024 = vmatpush1.bf16.msra.mxu0 %v7648_v35  ;;  %5516 = vmatpush1.bf16.msra.mxu1 %v7651_v36  ;;  %v7743_v35 = vld [vmem:[#allocation5 + $0xc68] ss:$16 sps:$4 sm:$0xff]   ;;  %v7748_v36 = vld [vmem:[#allocation5 + $0xc84] ss:$16 sps:$4 sm:$0xff]  }
 0x1ae   :  { %5025 = vmatprep.subr.bf16.mxu0 %v7656_v37  ;;  %5517 = vmatprep.subr.bf16.mxu1 %v7659_v38  ;;  %v7751_v37 = vld [vmem:[#allocation5 + $0xc8c] ss:$16 sps:$4 sm:$0xff]   ;;  %v7746_v38 = vld [vmem:[#allocation5 + $0xc80] ss:$16 sps:$4 sm:$0xff]  }
 0x1b1   :  { %5026 = vmatpush1.bf16.msra.mxu0 %v7654_v39  ;;  %5518 = vmatpush1.bf16.msra.mxu1 %v7657_v40  ;;  %v7749_v39 = vld [vmem:[#allocation5 + $0xc88] ss:$16 sps:$4 sm:$0xff]   ;;  %v7754_v40 = vld [vmem:[#allocation5 + $0xca4] ss:$16 sps:$4 sm:$0xff]  }
 0x1b2   :  { %5027 = vmatprep.subr.bf16.mxu0 %v7662_v41  ;;  %5519 = vmatprep.subr.bf16.mxu1 %v7665_v42  ;;  %v7757_v41 = vld [vmem:[#allocation5 + $0xcac] ss:$16 sps:$4 sm:$0xff]   ;;  %v7752_v42 = vld [vmem:[#allocation5 + $0xca0] ss:$16 sps:$4 sm:$0xff]  }
 0x1b5   :  { %5028 = vmatpush1.bf16.msra.mxu0 %v7660_v43  ;;  %5520 = vmatpush1.bf16.msra.mxu1 %v7663_v44  ;;  %v7755_v43 = vld [vmem:[#allocation5 + $0xca8] ss:$16 sps:$4 sm:$0xff]   ;;  %v7760_v44 = vld [vmem:[#allocation5 + $0xcc4] ss:$16 sps:$4 sm:$0xff]  }
 0x1b6   :  { %5029 = vmatprep.subr.bf16.mxu0 %v7668_v45  ;;  %5521 = vmatprep.subr.bf16.mxu1 %v7671_v46  ;;  %v7763_v45 = vld [vmem:[#allocation5 + $0xccc] ss:$16 sps:$4 sm:$0xff]   ;;  %v7758_v46 = vld [vmem:[#allocation5 + $0xcc0] ss:$16 sps:$4 sm:$0xff]  }
 0x1b9   :  { %5030 = vmatpush1.bf16.msra.mxu0 %v7666_v47  ;;  %5522 = vmatpush1.bf16.msra.mxu1 %v7669_v48  ;;  %v7761_v47 = vld [vmem:[#allocation5 + $0xcc8] ss:$16 sps:$4 sm:$0xff]   ;;  %v7766_v48 = vld [vmem:[#allocation5 + $0xce4] ss:$16 sps:$4 sm:$0xff]  }
 0x1ba   :  { %5031 = vmatprep.subr.bf16.mxu0 %v7674_v49  ;;  %5523 = vmatprep.subr.bf16.mxu1 %v7677_v50  ;;  %v7769_v49 = vld [vmem:[#allocation5 + $0xcec] ss:$16 sps:$4 sm:$0xff]   ;;  %v7764_v50 = vld [vmem:[#allocation5 + $0xce0] ss:$16 sps:$4 sm:$0xff]  }
 0x1bd   :  { %5032 = vmatpush1.bf16.msra.mxu0 %v7672_v51  ;;  %5524 = vmatpush1.bf16.msra.mxu1 %v7675_v52  ;;  %v7767_v51 = vld [vmem:[#allocation5 + $0xce8] ss:$16 sps:$4 sm:$0xff]   ;;  %v7772_v52 = vld [vmem:[#allocation5 + $0xd04] ss:$16 sps:$4 sm:$0xff]  }
 0x1be   :  { %5033 = vmatprep.subr.bf16.mxu0 %v7680_v53  ;;  %5525 = vmatprep.subr.bf16.mxu1 %v7683_v54  ;;  %v7775_v53 = vld [vmem:[#allocation5 + $0xd0c] ss:$16 sps:$4 sm:$0xff]   ;;  %v7770_v54 = vld [vmem:[#allocation5 + $0xd00] ss:$16 sps:$4 sm:$0xff]  }
 0x1c1   :  { %5034 = vmatpush1.bf16.msra.mxu0 %v7678_v55  ;;  %5526 = vmatpush1.bf16.msra.mxu1 %v7681_v56  ;;  %v7773_v55 = vld [vmem:[#allocation5 + $0xd08] ss:$16 sps:$4 sm:$0xff]   ;;  %v7778_v56 = vld [vmem:[#allocation5 + $0xd24] ss:$16 sps:$4 sm:$0xff]  }
 0x1c2   :  { %5035 = vmatprep.subr.bf16.mxu0 %v7686_v57  ;;  %5527 = vmatprep.subr.bf16.mxu1 %v7689_v58  ;;  %v7781_v57 = vld [vmem:[#allocation5 + $0xd2c] ss:$16 sps:$4 sm:$0xff]   ;;  %v7776_v58 = vld [vmem:[#allocation5 + $0xd20] ss:$16 sps:$4 sm:$0xff]  }
 0x1c5   :  { %5036 = vmatpush1.bf16.msra.mxu0 %v7684_v59  ;;  %5528 = vmatpush1.bf16.msra.mxu1 %v7687_v60  ;;  %v7779_v59 = vld [vmem:[#allocation5 + $0xd28] ss:$16 sps:$4 sm:$0xff]   ;;  %v7784_v60 = vld [vmem:[#allocation5 + $0xd44] ss:$16 sps:$4 sm:$0xff]  }
 0x1c6   :  { %5037 = vmatprep.subr.bf16.mxu0 %v7692_v61  ;;  %5529 = vmatprep.subr.bf16.mxu1 %v7695_v62  ;;  %v7787_v61 = vld [vmem:[#allocation5 + $0xd4c] ss:$16 sps:$4 sm:$0xff]   ;;  %v7782_v62 = vld [vmem:[#allocation5 + $0xd40] ss:$16 sps:$4 sm:$0xff]  }
 0x1c9   :  { %5038 = vmatpush1.bf16.msra.mxu0 %v7690_v63  ;;  %5530 = vmatpush1.bf16.msra.mxu1 %v7693_v0  ;;  %v7785_v63 = vld [vmem:[#allocation5 + $0xd48] ss:$16 sps:$4 sm:$0xff]   ;;  %v7790_v0 = vld [vmem:[#allocation5 + $0xd64] ss:$16 sps:$4 sm:$0xff]  }
 0x1ca   :  { %5039 = vmatprep.subr.bf16.mxu0 %v7698_v1  ;;  %5531 = vmatprep.subr.bf16.mxu1 %v7701_v2  ;;  %v7793_v1 = vld [vmem:[#allocation5 + $0xd6c] ss:$16 sps:$4 sm:$0xff]   ;;  %v7788_v2 = vld [vmem:[#allocation5 + $0xd60] ss:$16 sps:$4 sm:$0xff]  }
 0x1cd   :  { %5040 = vmatpush1.bf16.msra.mxu0 %v7696_v3  ;;  %5532 = vmatpush1.bf16.msra.mxu1 %v7699_v4  ;;  %v7791_v3 = vld [vmem:[#allocation5 + $0xd68] ss:$16 sps:$4 sm:$0xff]   ;;  %v7796_v4 = vld [vmem:[#allocation5 + $0xd84] ss:$16 sps:$4 sm:$0xff]  }
 0x1ce   :  { %5041 = vmatprep.subr.bf16.mxu0 %v7704_v5  ;;  %5533 = vmatprep.subr.bf16.mxu1 %v7707_v6  ;;  %v7799_v5 = vld [vmem:[#allocation5 + $0xd8c] ss:$16 sps:$4 sm:$0xff]   ;;  %v7794_v6 = vld [vmem:[#allocation5 + $0xd80] ss:$16 sps:$4 sm:$0xff]  }
 0x1d1   :  { %5042 = vmatpush1.bf16.msra.mxu0 %v7702_v7  ;;  %5534 = vmatpush1.bf16.msra.mxu1 %v7705_v8  ;;  %v7797_v7 = vld [vmem:[#allocation5 + $0xd88] ss:$16 sps:$4 sm:$0xff]   ;;  %v7802_v8 = vld [vmem:[#allocation5 + $0xda4] ss:$16 sps:$4 sm:$0xff]  }
 0x1d2   :  { %5043 = vmatprep.subr.bf16.mxu0 %v7710_v9  ;;  %5535 = vmatprep.subr.bf16.mxu1 %v7713_v10  ;;  %v7805_v9 = vld [vmem:[#allocation5 + $0xdac] ss:$16 sps:$4 sm:$0xff]   ;;  %v7800_v10 = vld [vmem:[#allocation5 + $0xda0] ss:$16 sps:$4 sm:$0xff]  }
 0x1d5   :  { %5044 = vmatpush1.bf16.msra.mxu0 %v7708_v12  ;;  %5536 = vmatpush1.bf16.msra.mxu1 %v7711_v13  ;;  %v7803_v12 = vld [vmem:[#allocation5 + $0xda8] ss:$16 sps:$4 sm:$0xff]   ;;  %v7808_v13 = vld [vmem:[#allocation5 + $0xdc4] ss:$16 sps:$4 sm:$0xff]  }
 0x1d6   :  { %5045 = vmatprep.subr.bf16.mxu0 %v7716_v15  ;;  %5537 = vmatprep.subr.bf16.mxu1 %v7719_v16  ;;  %v7811_v15 = vld [vmem:[#allocation5 + $0xdcc] ss:$16 sps:$4 sm:$0xff]   ;;  %v7806_v16 = vld [vmem:[#allocation5 + $0xdc0] ss:$16 sps:$4 sm:$0xff]  }
 0x1d9   :  { %5046 = vmatpush1.bf16.msra.mxu0 %v7714_v18  ;;  %5538 = vmatpush1.bf16.msra.mxu1 %v7717_v20  ;;  %v7809_v18 = vld [vmem:[#allocation5 + $0xdc8] ss:$16 sps:$4 sm:$0xff]   ;;  %v7814_v20 = vld [vmem:[#allocation5 + $0xde4] ss:$16 sps:$4 sm:$0xff]  }
 0x1da   :  { %5056 = vmatprep.subr.bf16.mxu0 %v7724_v11  ;;  %5548 = vmatprep.subr.bf16.mxu1 %v7727_v21  ;;  %v7817_v11 = vld [vmem:[#allocation5 + $0xdec] ss:$16 sps:$4 sm:$0xff]   ;;  %v7812_v21 = vld [vmem:[#allocation5 + $0xde0] ss:$16 sps:$4 sm:$0xff]  }
 0x1dc   :  { %5048 = vmatmul.mubr.bf16.vlgmr.msra.gmra.mrb[0].mxu0 %v6173_v14  ;;  %5540 = vmatmul.mubr.bf16.vlgmr.msra.gmra.mrb[0].mxu1 %v6173_v14  ;;  %v7815_v14 = vld [vmem:[#allocation5 + $0xde8] ss:$16 sps:$4 sm:$0xff]  }
 0x1dd   :  { %5057 = vmatpush1.bf16.msra.mxu0 %v7722_v23  ;;  %5549 = vmatpush1.bf16.msra.mxu1 %v7725_v24  ;;  %v7822_v23 = vld [vmem:[#allocation5 + $0xe04] ss:$16 sps:$4 sm:$0xff]   ;;  %v7825_v24 = vld [vmem:[#allocation5 + $0xe0c] ss:$16 sps:$4 sm:$0xff]  }
 0x1de   :  { %5058 = vmatprep.subr.bf16.mxu0 %v7730_v25  ;;  %5550 = vmatprep.subr.bf16.mxu1 %v7733_v17  ;;  %v8616_v25 = vld [vmem:[#allocation2 + $0x38] sm:$0xff]  ;;  %v6175_v17 = vcombine.low %v8610_v22, %v8610_v22  ;;  %v7834_v22 = vld [vmem:[#allocation5 + $0xe44] ss:$16 sps:$4 sm:$0xff]  }
 0x1df   :  { %5088 = vmatprep.mubr.bf16.mxu0 %v6176_v26  ;;  %5580 = vmatprep.mubr.bf16.mxu1 %v6176_v26  ;;  %v7820_v26 = vld [vmem:[#allocation5 + $0xe00] ss:$16 sps:$4 sm:$0xff]  }
 0x1e1   :  { %5059 = vmatpush1.bf16.msra.mxu0 %v7728_v27  ;;  %5551 = vmatpush1.bf16.msra.mxu1 %v7731_v28  ;;  %v7823_v27 = vld [vmem:[#allocation5 + $0xe08] ss:$16 sps:$4 sm:$0xff]   ;;  %v7828_v28 = vld [vmem:[#allocation5 + $0xe24] ss:$16 sps:$4 sm:$0xff]  }
 0x1e2   :  { %5060 = vmatprep.subr.bf16.mxu0 %v7736_v19  ;;  %5552 = vmatprep.subr.bf16.mxu1 %v7739_v29  ;;  %v7831_v19 = vld [vmem:[#allocation5 + $0xe2c] ss:$16 sps:$4 sm:$0xff]   ;;  %v6178_v29 = vcombine.high %v8616_v25, %v8616_v25 }
 0x1e5   :  { %5061 = vmatpush1.bf16.msra.mxu0 %v7734_v30  ;;  %5553 = vmatpush1.bf16.msra.mxu1 %v7737_v31  ;;  %v7826_v30 = vld [vmem:[#allocation5 + $0xe20] ss:$16 sps:$4 sm:$0xff]   ;;  %v7829_v31 = vld [vmem:[#allocation5 + $0xe28] ss:$16 sps:$4 sm:$0xff]  }
 0x1e6   :  { %5062 = vmatprep.subr.bf16.mxu0 %v7742_v32  ;;  %5554 = vmatprep.subr.bf16.mxu1 %v7745_v33  ;;  %v7837_v32 = vld [vmem:[#allocation5 + $0xe4c] ss:$16 sps:$4 sm:$0xff]   ;;  %v7832_v33 = vld [vmem:[#allocation5 + $0xe40] ss:$16 sps:$4 sm:$0xff]  }
 0x1e9   :  { %5063 = vmatpush1.bf16.msra.mxu0 %v7740_v34  ;;  %5555 = vmatpush1.bf16.msra.mxu1 %v7743_v35  ;;  %v7835_v34 = vld [vmem:[#allocation5 + $0xe48] ss:$16 sps:$4 sm:$0xff]   ;;  %v7840_v35 = vld [vmem:[#allocation5 + $0xe64] ss:$16 sps:$4 sm:$0xff]  }
 0x1ea   :  { %5064 = vmatprep.subr.bf16.mxu0 %v7748_v36  ;;  %5556 = vmatprep.subr.bf16.mxu1 %v7751_v37  ;;  %v7843_v36 = vld [vmem:[#allocation5 + $0xe6c] ss:$16 sps:$4 sm:$0xff]   ;;  %v7838_v37 = vld [vmem:[#allocation5 + $0xe60] ss:$16 sps:$4 sm:$0xff]  }
 0x1ed   :  { %5065 = vmatpush1.bf16.msra.mxu0 %v7746_v38  ;;  %5557 = vmatpush1.bf16.msra.mxu1 %v7749_v39  ;;  %v7841_v38 = vld [vmem:[#allocation5 + $0xe68] ss:$16 sps:$4 sm:$0xff]   ;;  %v7846_v39 = vld [vmem:[#allocation5 + $0xe84] ss:$16 sps:$4 sm:$0xff]  }
 0x1ee   :  { %5066 = vmatprep.subr.bf16.mxu0 %v7754_v40  ;;  %5558 = vmatprep.subr.bf16.mxu1 %v7757_v41  ;;  %v7849_v40 = vld [vmem:[#allocation5 + $0xe8c] ss:$16 sps:$4 sm:$0xff]   ;;  %v7844_v41 = vld [vmem:[#allocation5 + $0xe80] ss:$16 sps:$4 sm:$0xff]  }
 0x1f1   :  { %5067 = vmatpush1.bf16.msra.mxu0 %v7752_v42  ;;  %5559 = vmatpush1.bf16.msra.mxu1 %v7755_v43  ;;  %v7847_v42 = vld [vmem:[#allocation5 + $0xe88] ss:$16 sps:$4 sm:$0xff]   ;;  %v7852_v43 = vld [vmem:[#allocation5 + $0xea4] ss:$16 sps:$4 sm:$0xff]  }
 0x1f2   :  { %5068 = vmatprep.subr.bf16.mxu0 %v7760_v44  ;;  %5560 = vmatprep.subr.bf16.mxu1 %v7763_v45  ;;  %v7855_v44 = vld [vmem:[#allocation5 + $0xeac] ss:$16 sps:$4 sm:$0xff]   ;;  %v7850_v45 = vld [vmem:[#allocation5 + $0xea0] ss:$16 sps:$4 sm:$0xff]  }
 0x1f5   :  { %5069 = vmatpush1.bf16.msra.mxu0 %v7758_v46  ;;  %5561 = vmatpush1.bf16.msra.mxu1 %v7761_v47  ;;  %v7853_v46 = vld [vmem:[#allocation5 + $0xea8] ss:$16 sps:$4 sm:$0xff]   ;;  %v7858_v47 = vld [vmem:[#allocation5 + $0xec4] ss:$16 sps:$4 sm:$0xff]  }
 0x1f6   :  { %5070 = vmatprep.subr.bf16.mxu0 %v7766_v48  ;;  %5562 = vmatprep.subr.bf16.mxu1 %v7769_v49  ;;  %v7861_v48 = vld [vmem:[#allocation5 + $0xecc] ss:$16 sps:$4 sm:$0xff]   ;;  %v7856_v49 = vld [vmem:[#allocation5 + $0xec0] ss:$16 sps:$4 sm:$0xff]  }
 0x1f9   :  { %5071 = vmatpush1.bf16.msra.mxu0 %v7764_v50  ;;  %5563 = vmatpush1.bf16.msra.mxu1 %v7767_v51  ;;  %v7859_v50 = vld [vmem:[#allocation5 + $0xec8] ss:$16 sps:$4 sm:$0xff]   ;;  %v7864_v51 = vld [vmem:[#allocation5 + $0xee4] ss:$16 sps:$4 sm:$0xff]  }
 0x1fa   :  { %5072 = vmatprep.subr.bf16.mxu0 %v7772_v52  ;;  %5564 = vmatprep.subr.bf16.mxu1 %v7775_v53  ;;  %v7867_v52 = vld [vmem:[#allocation5 + $0xeec] ss:$16 sps:$4 sm:$0xff]   ;;  %v7862_v53 = vld [vmem:[#allocation5 + $0xee0] ss:$16 sps:$4 sm:$0xff]  }
 0x1fd   :  { %5073 = vmatpush1.bf16.msra.mxu0 %v7770_v54  ;;  %5565 = vmatpush1.bf16.msra.mxu1 %v7773_v55  ;;  %v7865_v54 = vld [vmem:[#allocation5 + $0xee8] ss:$16 sps:$4 sm:$0xff]   ;;  %v7870_v55 = vld [vmem:[#allocation5 + $0xf04] ss:$16 sps:$4 sm:$0xff]  }
 0x1fe   :  { %5074 = vmatprep.subr.bf16.mxu0 %v7778_v56  ;;  %5566 = vmatprep.subr.bf16.mxu1 %v7781_v57  ;;  %v7873_v56 = vld [vmem:[#allocation5 + $0xf0c] ss:$16 sps:$4 sm:$0xff]   ;;  %v7868_v57 = vld [vmem:[#allocation5 + $0xf00] ss:$16 sps:$4 sm:$0xff]  }
 0x201   :  { %5075 = vmatpush1.bf16.msra.mxu0 %v7776_v58  ;;  %5567 = vmatpush1.bf16.msra.mxu1 %v7779_v59  ;;  %v7871_v58 = vld [vmem:[#allocation5 + $0xf08] ss:$16 sps:$4 sm:$0xff]   ;;  %v7876_v59 = vld [vmem:[#allocation5 + $0xf24] ss:$16 sps:$4 sm:$0xff]  }
 0x202   :  { %5076 = vmatprep.subr.bf16.mxu0 %v7784_v60  ;;  %5568 = vmatprep.subr.bf16.mxu1 %v7787_v61  ;;  %v7879_v60 = vld [vmem:[#allocation5 + $0xf2c] ss:$16 sps:$4 sm:$0xff]   ;;  %v7874_v61 = vld [vmem:[#allocation5 + $0xf20] ss:$16 sps:$4 sm:$0xff]  }
 0x205   :  { %5077 = vmatpush1.bf16.msra.mxu0 %v7782_v62  ;;  %5569 = vmatpush1.bf16.msra.mxu1 %v7785_v63  ;;  %v7877_v62 = vld [vmem:[#allocation5 + $0xf28] ss:$16 sps:$4 sm:$0xff]   ;;  %v7882_v63 = vld [vmem:[#allocation5 + $0xf44] ss:$16 sps:$4 sm:$0xff]  }
 0x206   :  { %5078 = vmatprep.subr.bf16.mxu0 %v7790_v0  ;;  %5570 = vmatprep.subr.bf16.mxu1 %v7793_v1  ;;  %v7885_v0 = vld [vmem:[#allocation5 + $0xf4c] ss:$16 sps:$4 sm:$0xff]   ;;  %v7880_v1 = vld [vmem:[#allocation5 + $0xf40] ss:$16 sps:$4 sm:$0xff]  }
 0x209   :  { %5079 = vmatpush1.bf16.msra.mxu0 %v7788_v2  ;;  %5571 = vmatpush1.bf16.msra.mxu1 %v7791_v3  ;;  %v7883_v2 = vld [vmem:[#allocation5 + $0xf48] ss:$16 sps:$4 sm:$0xff]   ;;  %v7888_v3 = vld [vmem:[#allocation5 + $0xf64] ss:$16 sps:$4 sm:$0xff]  }
 0x20a   :  { %5080 = vmatprep.subr.bf16.mxu0 %v7796_v4  ;;  %5572 = vmatprep.subr.bf16.mxu1 %v7799_v5  ;;  %v7891_v4 = vld [vmem:[#allocation5 + $0xf6c] ss:$16 sps:$4 sm:$0xff]   ;;  %v7886_v5 = vld [vmem:[#allocation5 + $0xf60] ss:$16 sps:$4 sm:$0xff]  }
 0x20d   :  { %5081 = vmatpush1.bf16.msra.mxu0 %v7794_v6  ;;  %5573 = vmatpush1.bf16.msra.mxu1 %v7797_v7  ;;  %v7889_v6 = vld [vmem:[#allocation5 + $0xf68] ss:$16 sps:$4 sm:$0xff]   ;;  %v7894_v7 = vld [vmem:[#allocation5 + $0xf84] ss:$16 sps:$4 sm:$0xff]  }
 0x20e   :  { %5082 = vmatprep.subr.bf16.mxu0 %v7802_v8  ;;  %5574 = vmatprep.subr.bf16.mxu1 %v7805_v9  ;;  %v7897_v8 = vld [vmem:[#allocation5 + $0xf8c] ss:$16 sps:$4 sm:$0xff]   ;;  %v7892_v9 = vld [vmem:[#allocation5 + $0xf80] ss:$16 sps:$4 sm:$0xff]  }
 0x211   :  { %5083 = vmatpush1.bf16.msra.mxu0 %v7800_v10  ;;  %5575 = vmatpush1.bf16.msra.mxu1 %v7803_v12  ;;  %v7895_v10 = vld [vmem:[#allocation5 + $0xf88] ss:$16 sps:$4 sm:$0xff]   ;;  %v7900_v12 = vld [vmem:[#allocation5 + $0xfa4] ss:$16 sps:$4 sm:$0xff]  }
 0x212   :  { %5084 = vmatprep.subr.bf16.mxu0 %v7808_v13  ;;  %5576 = vmatprep.subr.bf16.mxu1 %v7811_v15  ;;  %v7903_v13 = vld [vmem:[#allocation5 + $0xfac] ss:$16 sps:$4 sm:$0xff]   ;;  %v7898_v15 = vld [vmem:[#allocation5 + $0xfa0] ss:$16 sps:$4 sm:$0xff]  }
 0x215   :  { %5085 = vmatpush1.bf16.msra.mxu0 %v7806_v16  ;;  %5577 = vmatpush1.bf16.msra.mxu1 %v7809_v18  ;;  %v7901_v16 = vld [vmem:[#allocation5 + $0xfa8] ss:$16 sps:$4 sm:$0xff]   ;;  %v7906_v18 = vld [vmem:[#allocation5 + $0xfc4] ss:$16 sps:$4 sm:$0xff]  }
 0x216   :  { %5086 = vmatprep.subr.bf16.mxu0 %v7814_v20  ;;  %5578 = vmatprep.subr.bf16.mxu1 %v7817_v11  ;;  %v7909_v20 = vld [vmem:[#allocation5 + $0xfcc] ss:$16 sps:$4 sm:$0xff]   ;;  %v7904_v11 = vld [vmem:[#allocation5 + $0xfc0] ss:$16 sps:$4 sm:$0xff]  }
 0x219   :  { %5087 = vmatpush1.bf16.msra.mxu0 %v7812_v21  ;;  %5579 = vmatpush1.bf16.msra.mxu1 %v7815_v14  ;;  %v7907_v21 = vld [vmem:[#allocation5 + $0xfc8] ss:$16 sps:$4 sm:$0xff]   ;;  %v7912_v14 = vld [vmem:[#allocation5 + $0xfe4] ss:$16 sps:$4 sm:$0xff]  }
 0x21a   :  { %5097 = vmatprep.subr.bf16.mxu0 %v7822_v23  ;;  %5589 = vmatprep.subr.bf16.mxu1 %v7825_v24  ;;  %v7915_v23 = vld [vmem:[#allocation5 + $0xfec] ss:$16 sps:$4 sm:$0xff]   ;;  %v7910_v24 = vld [vmem:[#allocation5 + $0xfe0] ss:$16 sps:$4 sm:$0xff]  }
 0x21c   :  { %5089 = vmatmul.mubr.bf16.vlgmr.msra.gmra.mrb[0].mxu0 %v6175_v17  ;;  %5581 = vmatmul.mubr.bf16.vlgmr.msra.gmra.mrb[0].mxu1 %v6175_v17  ;;  %v7913_v17 = vld [vmem:[#allocation5 + $0xfe8] ss:$16 sps:$4 sm:$0xff]  }
 0x21d   :  { %5098 = vmatpush1.bf16.msra.mxu0 %v7820_v26  ;;  %5590 = vmatpush1.bf16.msra.mxu1 %v7823_v27  ;;  %v7920_v26 = vld [vmem:[#allocation5 + $0x1004] ss:$16 sps:$4 sm:$0xff]   ;;  %v7923_v27 = vld [vmem:[#allocation5 + $0x100c] ss:$16 sps:$4 sm:$0xff]  }
 0x21e   :  { %5099 = vmatprep.subr.bf16.mxu0 %v7828_v28  ;;  %5591 = vmatprep.subr.bf16.mxu1 %v7831_v19  ;;  %v6177_v28 = vcombine.low %v8616_v25, %v8616_v25  ;;  %v8624_v19 = vld [vmem:[#allocation2 + $0x40] sm:$0xff] }
 0x21f   :  { %5129 = vmatprep.mubr.bf16.mxu0 %v6178_v29  ;;  %5621 = vmatprep.mubr.bf16.mxu1 %v6178_v29  ;;  %v7918_v29 = vld [vmem:[#allocation5 + $0x1000] ss:$16 sps:$4 sm:$0xff]   ;;  %v7932_v25 = vld [vmem:[#allocation5 + $0x1044] ss:$16 sps:$4 sm:$0xff]  }
 0x221   :  { %5100 = vmatpush1.bf16.msra.mxu0 %v7826_v30  ;;  %5592 = vmatpush1.bf16.msra.mxu1 %v7829_v31  ;;  %v7921_v30 = vld [vmem:[#allocation5 + $0x1008] ss:$16 sps:$4 sm:$0xff]   ;;  %v7926_v31 = vld [vmem:[#allocation5 + $0x1024] ss:$16 sps:$4 sm:$0xff]  }
 0x222   :  { %5101 = vmatprep.subr.bf16.mxu0 %v7834_v22  ;;  %5593 = vmatprep.subr.bf16.mxu1 %v7837_v32  ;;  %v7929_v22 = vld [vmem:[#allocation5 + $0x102c] ss:$16 sps:$4 sm:$0xff]   ;;  %v6180_v32 = vcombine.high %v8624_v19, %v8624_v19 }
 0x225   :  { %5102 = vmatpush1.bf16.msra.mxu0 %v7832_v33  ;;  %5594 = vmatpush1.bf16.msra.mxu1 %v7835_v34  ;;  %v7924_v33 = vld [vmem:[#allocation5 + $0x1020] ss:$16 sps:$4 sm:$0xff]   ;;  %v7927_v34 = vld [vmem:[#allocation5 + $0x1028] ss:$16 sps:$4 sm:$0xff]  }
 0x226   :  { %5103 = vmatprep.subr.bf16.mxu0 %v7840_v35  ;;  %5595 = vmatprep.subr.bf16.mxu1 %v7843_v36  ;;  %v7935_v35 = vld [vmem:[#allocation5 + $0x104c] ss:$16 sps:$4 sm:$0xff]   ;;  %v7930_v36 = vld [vmem:[#allocation5 + $0x1040] ss:$16 sps:$4 sm:$0xff]  }
 0x229   :  { %5104 = vmatpush1.bf16.msra.mxu0 %v7838_v37  ;;  %5596 = vmatpush1.bf16.msra.mxu1 %v7841_v38  ;;  %v7933_v37 = vld [vmem:[#allocation5 + $0x1048] ss:$16 sps:$4 sm:$0xff]   ;;  %v7938_v38 = vld [vmem:[#allocation5 + $0x1064] ss:$16 sps:$4 sm:$0xff]  }
 0x22a   :  { %5105 = vmatprep.subr.bf16.mxu0 %v7846_v39  ;;  %5597 = vmatprep.subr.bf16.mxu1 %v7849_v40  ;;  %v7941_v39 = vld [vmem:[#allocation5 + $0x106c] ss:$16 sps:$4 sm:$0xff]   ;;  %v7936_v40 = vld [vmem:[#allocation5 + $0x1060] ss:$16 sps:$4 sm:$0xff]  }
 0x22d   :  { %5106 = vmatpush1.bf16.msra.mxu0 %v7844_v41  ;;  %5598 = vmatpush1.bf16.msra.mxu1 %v7847_v42  ;;  %v7939_v41 = vld [vmem:[#allocation5 + $0x1068] ss:$16 sps:$4 sm:$0xff]   ;;  %v7944_v42 = vld [vmem:[#allocation5 + $0x1084] ss:$16 sps:$4 sm:$0xff]  }
 0x22e   :  { %5107 = vmatprep.subr.bf16.mxu0 %v7852_v43  ;;  %5599 = vmatprep.subr.bf16.mxu1 %v7855_v44  ;;  %v7947_v43 = vld [vmem:[#allocation5 + $0x108c] ss:$16 sps:$4 sm:$0xff]   ;;  %v7942_v44 = vld [vmem:[#allocation5 + $0x1080] ss:$16 sps:$4 sm:$0xff]  }
 0x231   :  { %5108 = vmatpush1.bf16.msra.mxu0 %v7850_v45  ;;  %5600 = vmatpush1.bf16.msra.mxu1 %v7853_v46  ;;  %v7945_v45 = vld [vmem:[#allocation5 + $0x1088] ss:$16 sps:$4 sm:$0xff]   ;;  %v7950_v46 = vld [vmem:[#allocation5 + $0x10a4] ss:$16 sps:$4 sm:$0xff]  }
 0x232   :  { %5109 = vmatprep.subr.bf16.mxu0 %v7858_v47  ;;  %5601 = vmatprep.subr.bf16.mxu1 %v7861_v48  ;;  %v7953_v47 = vld [vmem:[#allocation5 + $0x10ac] ss:$16 sps:$4 sm:$0xff]   ;;  %v7948_v48 = vld [vmem:[#allocation5 + $0x10a0] ss:$16 sps:$4 sm:$0xff]  }
 0x235   :  { %5110 = vmatpush1.bf16.msra.mxu0 %v7856_v49  ;;  %5602 = vmatpush1.bf16.msra.mxu1 %v7859_v50  ;;  %v7951_v49 = vld [vmem:[#allocation5 + $0x10a8] ss:$16 sps:$4 sm:$0xff]   ;;  %v7956_v50 = vld [vmem:[#allocation5 + $0x10c4] ss:$16 sps:$4 sm:$0xff]  }
 0x236   :  { %5111 = vmatprep.subr.bf16.mxu0 %v7864_v51  ;;  %5603 = vmatprep.subr.bf16.mxu1 %v7867_v52  ;;  %v7959_v51 = vld [vmem:[#allocation5 + $0x10cc] ss:$16 sps:$4 sm:$0xff]   ;;  %v7954_v52 = vld [vmem:[#allocation5 + $0x10c0] ss:$16 sps:$4 sm:$0xff]  }
 0x239   :  { %5112 = vmatpush1.bf16.msra.mxu0 %v7862_v53  ;;  %5604 = vmatpush1.bf16.msra.mxu1 %v7865_v54  ;;  %v7957_v53 = vld [vmem:[#allocation5 + $0x10c8] ss:$16 sps:$4 sm:$0xff]   ;;  %v7962_v54 = vld [vmem:[#allocation5 + $0x10e4] ss:$16 sps:$4 sm:$0xff]  }
 0x23a   :  { %5113 = vmatprep.subr.bf16.mxu0 %v7870_v55  ;;  %5605 = vmatprep.subr.bf16.mxu1 %v7873_v56  ;;  %v7965_v55 = vld [vmem:[#allocation5 + $0x10ec] ss:$16 sps:$4 sm:$0xff]   ;;  %v7960_v56 = vld [vmem:[#allocation5 + $0x10e0] ss:$16 sps:$4 sm:$0xff]  }
 0x23d   :  { %5114 = vmatpush1.bf16.msra.mxu0 %v7868_v57  ;;  %5606 = vmatpush1.bf16.msra.mxu1 %v7871_v58  ;;  %v7963_v57 = vld [vmem:[#allocation5 + $0x10e8] ss:$16 sps:$4 sm:$0xff]   ;;  %v7968_v58 = vld [vmem:[#allocation5 + $0x1104] ss:$16 sps:$4 sm:$0xff]  }
 0x23e   :  { %5115 = vmatprep.subr.bf16.mxu0 %v7876_v59  ;;  %5607 = vmatprep.subr.bf16.mxu1 %v7879_v60  ;;  %v7971_v59 = vld [vmem:[#allocation5 + $0x110c] ss:$16 sps:$4 sm:$0xff]   ;;  %v7966_v60 = vld [vmem:[#allocation5 + $0x1100] ss:$16 sps:$4 sm:$0xff]  }
 0x241   :  { %5116 = vmatpush1.bf16.msra.mxu0 %v7874_v61  ;;  %5608 = vmatpush1.bf16.msra.mxu1 %v7877_v62  ;;  %v7969_v61 = vld [vmem:[#allocation5 + $0x1108] ss:$16 sps:$4 sm:$0xff]   ;;  %v7974_v62 = vld [vmem:[#allocation5 + $0x1124] ss:$16 sps:$4 sm:$0xff]  }
 0x242   :  { %5117 = vmatprep.subr.bf16.mxu0 %v7882_v63  ;;  %5609 = vmatprep.subr.bf16.mxu1 %v7885_v0  ;;  %v7977_v63 = vld [vmem:[#allocation5 + $0x112c] ss:$16 sps:$4 sm:$0xff]   ;;  %v7972_v0 = vld [vmem:[#allocation5 + $0x1120] ss:$16 sps:$4 sm:$0xff]  }
 0x245   :  { %5118 = vmatpush1.bf16.msra.mxu0 %v7880_v1  ;;  %5610 = vmatpush1.bf16.msra.mxu1 %v7883_v2  ;;  %v7975_v1 = vld [vmem:[#allocation5 + $0x1128] ss:$16 sps:$4 sm:$0xff]   ;;  %v7980_v2 = vld [vmem:[#allocation5 + $0x1144] ss:$16 sps:$4 sm:$0xff]  }
 0x246   :  { %5119 = vmatprep.subr.bf16.mxu0 %v7888_v3  ;;  %5611 = vmatprep.subr.bf16.mxu1 %v7891_v4  ;;  %v7983_v3 = vld [vmem:[#allocation5 + $0x114c] ss:$16 sps:$4 sm:$0xff]   ;;  %v7978_v4 = vld [vmem:[#allocation5 + $0x1140] ss:$16 sps:$4 sm:$0xff]  }
 0x249   :  { %5120 = vmatpush1.bf16.msra.mxu0 %v7886_v5  ;;  %5612 = vmatpush1.bf16.msra.mxu1 %v7889_v6  ;;  %v7981_v5 = vld [vmem:[#allocation5 + $0x1148] ss:$16 sps:$4 sm:$0xff]   ;;  %v7986_v6 = vld [vmem:[#allocation5 + $0x1164] ss:$16 sps:$4 sm:$0xff]  }
 0x24a   :  { %5121 = vmatprep.subr.bf16.mxu0 %v7894_v7  ;;  %5613 = vmatprep.subr.bf16.mxu1 %v7897_v8  ;;  %v7989_v7 = vld [vmem:[#allocation5 + $0x116c] ss:$16 sps:$4 sm:$0xff]   ;;  %v7984_v8 = vld [vmem:[#allocation5 + $0x1160] ss:$16 sps:$4 sm:$0xff]  }
 0x24d   :  { %5122 = vmatpush1.bf16.msra.mxu0 %v7892_v9  ;;  %5614 = vmatpush1.bf16.msra.mxu1 %v7895_v10  ;;  %v7987_v9 = vld [vmem:[#allocation5 + $0x1168] ss:$16 sps:$4 sm:$0xff]   ;;  %v7992_v10 = vld [vmem:[#allocation5 + $0x1184] ss:$16 sps:$4 sm:$0xff]  }
 0x24e   :  { %5123 = vmatprep.subr.bf16.mxu0 %v7900_v12  ;;  %5615 = vmatprep.subr.bf16.mxu1 %v7903_v13  ;;  %v7995_v12 = vld [vmem:[#allocation5 + $0x118c] ss:$16 sps:$4 sm:$0xff]   ;;  %v7990_v13 = vld [vmem:[#allocation5 + $0x1180] ss:$16 sps:$4 sm:$0xff]  }
 0x251   :  { %5124 = vmatpush1.bf16.msra.mxu0 %v7898_v15  ;;  %5616 = vmatpush1.bf16.msra.mxu1 %v7901_v16  ;;  %v7993_v15 = vld [vmem:[#allocation5 + $0x1188] ss:$16 sps:$4 sm:$0xff]   ;;  %v7998_v16 = vld [vmem:[#allocation5 + $0x11a4] ss:$16 sps:$4 sm:$0xff]  }
 0x252   :  { %5125 = vmatprep.subr.bf16.mxu0 %v7906_v18  ;;  %5617 = vmatprep.subr.bf16.mxu1 %v7909_v20  ;;  %v8001_v18 = vld [vmem:[#allocation5 + $0x11ac] ss:$16 sps:$4 sm:$0xff]   ;;  %v7996_v20 = vld [vmem:[#allocation5 + $0x11a0] ss:$16 sps:$4 sm:$0xff]  }
 0x255   :  { %5126 = vmatpush1.bf16.msra.mxu0 %v7904_v11  ;;  %5618 = vmatpush1.bf16.msra.mxu1 %v7907_v21  ;;  %v7999_v11 = vld [vmem:[#allocation5 + $0x11a8] ss:$16 sps:$4 sm:$0xff]   ;;  %v8004_v21 = vld [vmem:[#allocation5 + $0x11c4] ss:$16 sps:$4 sm:$0xff]  }
 0x256   :  { %5127 = vmatprep.subr.bf16.mxu0 %v7912_v14  ;;  %5619 = vmatprep.subr.bf16.mxu1 %v7915_v23  ;;  %v8007_v14 = vld [vmem:[#allocation5 + $0x11cc] ss:$16 sps:$4 sm:$0xff]   ;;  %v8002_v23 = vld [vmem:[#allocation5 + $0x11c0] ss:$16 sps:$4 sm:$0xff]  }
 0x259   :  { %5128 = vmatpush1.bf16.msra.mxu0 %v7910_v24  ;;  %5620 = vmatpush1.bf16.msra.mxu1 %v7913_v17  ;;  %v8005_v24 = vld [vmem:[#allocation5 + $0x11c8] ss:$16 sps:$4 sm:$0xff]   ;;  %v8010_v17 = vld [vmem:[#allocation5 + $0x11e4] ss:$16 sps:$4 sm:$0xff]  }
 0x25a   :  { %5138 = vmatprep.subr.bf16.mxu0 %v7920_v26  ;;  %5630 = vmatprep.subr.bf16.mxu1 %v7923_v27  ;;  %v8013_v26 = vld [vmem:[#allocation5 + $0x11ec] ss:$16 sps:$4 sm:$0xff]   ;;  %v8008_v27 = vld [vmem:[#allocation5 + $0x11e0] ss:$16 sps:$4 sm:$0xff]  }
 0x25c   :  { %5130 = vmatmul.mubr.bf16.vlgmr.msra.gmra.mrb[0].mxu0 %v6177_v28  ;;  %5622 = vmatmul.mubr.bf16.vlgmr.msra.gmra.mrb[0].mxu1 %v6177_v28  ;;  %v8011_v28 = vld [vmem:[#allocation5 + $0x11e8] ss:$16 sps:$4 sm:$0xff]  }
 0x25d   :  { %5139 = vmatpush1.bf16.msra.mxu0 %v7918_v29  ;;  %5631 = vmatpush1.bf16.msra.mxu1 %v7921_v30  ;;  %v8018_v29 = vld [vmem:[#allocation5 + $0x1204] ss:$16 sps:$4 sm:$0xff]   ;;  %v8021_v30 = vld [vmem:[#allocation5 + $0x120c] ss:$16 sps:$4 sm:$0xff]  }
 0x25e   :  { %5140 = vmatprep.subr.bf16.mxu0 %v7926_v31  ;;  %5632 = vmatprep.subr.bf16.mxu1 %v7929_v22  ;;  %v6179_v31 = vcombine.low %v8624_v19, %v8624_v19  ;;  %v8630_v22 = vld [vmem:[#allocation2 + $0x48] sm:$0xff]  ;;  %v8030_v19 = vld [vmem:[#allocation5 + $0x1244] ss:$16 sps:$4 sm:$0xff]  }
 0x25f   :  { %5170 = vmatprep.mubr.bf16.mxu0 %v6180_v32  ;;  %5662 = vmatprep.mubr.bf16.mxu1 %v6180_v32  ;;  %v8016_v32 = vld [vmem:[#allocation5 + $0x1200] ss:$16 sps:$4 sm:$0xff]  }
 0x261   :  { %5141 = vmatpush1.bf16.msra.mxu0 %v7924_v33  ;;  %5633 = vmatpush1.bf16.msra.mxu1 %v7927_v34  ;;  %v8019_v33 = vld [vmem:[#allocation5 + $0x1208] ss:$16 sps:$4 sm:$0xff]   ;;  %v8024_v34 = vld [vmem:[#allocation5 + $0x1224] ss:$16 sps:$4 sm:$0xff]  }
 0x262   :  { %5142 = vmatprep.subr.bf16.mxu0 %v7932_v25  ;;  %5634 = vmatprep.subr.bf16.mxu1 %v7935_v35  ;;  %v8027_v25 = vld [vmem:[#allocation5 + $0x122c] ss:$16 sps:$4 sm:$0xff]   ;;  %v6182_v35 = vcombine.high %v8630_v22, %v8630_v22 }
 0x265   :  { %5143 = vmatpush1.bf16.msra.mxu0 %v7930_v36  ;;  %5635 = vmatpush1.bf16.msra.mxu1 %v7933_v37  ;;  %v8022_v36 = vld [vmem:[#allocation5 + $0x1220] ss:$16 sps:$4 sm:$0xff]   ;;  %v8025_v37 = vld [vmem:[#allocation5 + $0x1228] ss:$16 sps:$4 sm:$0xff]  }
 0x266   :  { %5144 = vmatprep.subr.bf16.mxu0 %v7938_v38  ;;  %5636 = vmatprep.subr.bf16.mxu1 %v7941_v39  ;;  %v8033_v38 = vld [vmem:[#allocation5 + $0x124c] ss:$16 sps:$4 sm:$0xff]   ;;  %v8028_v39 = vld [vmem:[#allocation5 + $0x1240] ss:$16 sps:$4 sm:$0xff]  }
 0x269   :  { %5145 = vmatpush1.bf16.msra.mxu0 %v7936_v40  ;;  %5637 = vmatpush1.bf16.msra.mxu1 %v7939_v41  ;;  %v8031_v40 = vld [vmem:[#allocation5 + $0x1248] ss:$16 sps:$4 sm:$0xff]   ;;  %v8036_v41 = vld [vmem:[#allocation5 + $0x1264] ss:$16 sps:$4 sm:$0xff]  }
 0x26a   :  { %5146 = vmatprep.subr.bf16.mxu0 %v7944_v42  ;;  %5638 = vmatprep.subr.bf16.mxu1 %v7947_v43  ;;  %v8039_v42 = vld [vmem:[#allocation5 + $0x126c] ss:$16 sps:$4 sm:$0xff]   ;;  %v8034_v43 = vld [vmem:[#allocation5 + $0x1260] ss:$16 sps:$4 sm:$0xff]  }
 0x26d   :  { %5147 = vmatpush1.bf16.msra.mxu0 %v7942_v44  ;;  %5639 = vmatpush1.bf16.msra.mxu1 %v7945_v45  ;;  %v8037_v44 = vld [vmem:[#allocation5 + $0x1268] ss:$16 sps:$4 sm:$0xff]   ;;  %v8042_v45 = vld [vmem:[#allocation5 + $0x1284] ss:$16 sps:$4 sm:$0xff]  }
 0x26e   :  { %5148 = vmatprep.subr.bf16.mxu0 %v7950_v46  ;;  %5640 = vmatprep.subr.bf16.mxu1 %v7953_v47  ;;  %v8045_v46 = vld [vmem:[#allocation5 + $0x128c] ss:$16 sps:$4 sm:$0xff]   ;;  %v8040_v47 = vld [vmem:[#allocation5 + $0x1280] ss:$16 sps:$4 sm:$0xff]  }
 0x271   :  { %5149 = vmatpush1.bf16.msra.mxu0 %v7948_v48  ;;  %5641 = vmatpush1.bf16.msra.mxu1 %v7951_v49  ;;  %v8043_v48 = vld [vmem:[#allocation5 + $0x1288] ss:$16 sps:$4 sm:$0xff]   ;;  %v8048_v49 = vld [vmem:[#allocation5 + $0x12a4] ss:$16 sps:$4 sm:$0xff]  }
 0x272   :  { %5150 = vmatprep.subr.bf16.mxu0 %v7956_v50  ;;  %5642 = vmatprep.subr.bf16.mxu1 %v7959_v51  ;;  %v8051_v50 = vld [vmem:[#allocation5 + $0x12ac] ss:$16 sps:$4 sm:$0xff]   ;;  %v8046_v51 = vld [vmem:[#allocation5 + $0x12a0] ss:$16 sps:$4 sm:$0xff]  }
 0x275   :  { %5151 = vmatpush1.bf16.msra.mxu0 %v7954_v52  ;;  %5643 = vmatpush1.bf16.msra.mxu1 %v7957_v53  ;;  %v8049_v52 = vld [vmem:[#allocation5 + $0x12a8] ss:$16 sps:$4 sm:$0xff]   ;;  %v8054_v53 = vld [vmem:[#allocation5 + $0x12c4] ss:$16 sps:$4 sm:$0xff]  }
 0x276   :  { %5152 = vmatprep.subr.bf16.mxu0 %v7962_v54  ;;  %5644 = vmatprep.subr.bf16.mxu1 %v7965_v55  ;;  %v8057_v54 = vld [vmem:[#allocation5 + $0x12cc] ss:$16 sps:$4 sm:$0xff]   ;;  %v8052_v55 = vld [vmem:[#allocation5 + $0x12c0] ss:$16 sps:$4 sm:$0xff]  }
 0x279   :  { %5153 = vmatpush1.bf16.msra.mxu0 %v7960_v56  ;;  %5645 = vmatpush1.bf16.msra.mxu1 %v7963_v57  ;;  %v8055_v56 = vld [vmem:[#allocation5 + $0x12c8] ss:$16 sps:$4 sm:$0xff]   ;;  %v8060_v57 = vld [vmem:[#allocation5 + $0x12e4] ss:$16 sps:$4 sm:$0xff]  }
 0x27a   :  { %5154 = vmatprep.subr.bf16.mxu0 %v7968_v58  ;;  %5646 = vmatprep.subr.bf16.mxu1 %v7971_v59  ;;  %v8063_v58 = vld [vmem:[#allocation5 + $0x12ec] ss:$16 sps:$4 sm:$0xff]   ;;  %v8058_v59 = vld [vmem:[#allocation5 + $0x12e0] ss:$16 sps:$4 sm:$0xff]  }
 0x27d   :  { %5155 = vmatpush1.bf16.msra.mxu0 %v7966_v60  ;;  %5647 = vmatpush1.bf16.msra.mxu1 %v7969_v61  ;;  %v8061_v60 = vld [vmem:[#allocation5 + $0x12e8] ss:$16 sps:$4 sm:$0xff]   ;;  %v8066_v61 = vld [vmem:[#allocation5 + $0x1304] ss:$16 sps:$4 sm:$0xff]  }
 0x27e   :  { %5156 = vmatprep.subr.bf16.mxu0 %v7974_v62  ;;  %5648 = vmatprep.subr.bf16.mxu1 %v7977_v63  ;;  %v8069_v62 = vld [vmem:[#allocation5 + $0x130c] ss:$16 sps:$4 sm:$0xff]   ;;  %v8064_v63 = vld [vmem:[#allocation5 + $0x1300] ss:$16 sps:$4 sm:$0xff]  }
 0x281   :  { %5157 = vmatpush1.bf16.msra.mxu0 %v7972_v0  ;;  %5649 = vmatpush1.bf16.msra.mxu1 %v7975_v1  ;;  %v8067_v0 = vld [vmem:[#allocation5 + $0x1308] ss:$16 sps:$4 sm:$0xff]   ;;  %v8072_v1 = vld [vmem:[#allocation5 + $0x1324] ss:$16 sps:$4 sm:$0xff]  }
 0x282   :  { %5158 = vmatprep.subr.bf16.mxu0 %v7980_v2  ;;  %5650 = vmatprep.subr.bf16.mxu1 %v7983_v3  ;;  %v8075_v2 = vld [vmem:[#allocation5 + $0x132c] ss:$16 sps:$4 sm:$0xff]   ;;  %v8070_v3 = vld [vmem:[#allocation5 + $0x1320] ss:$16 sps:$4 sm:$0xff]  }
 0x285   :  { %5159 = vmatpush1.bf16.msra.mxu0 %v7978_v4  ;;  %5651 = vmatpush1.bf16.msra.mxu1 %v7981_v5  ;;  %v8073_v4 = vld [vmem:[#allocation5 + $0x1328] ss:$16 sps:$4 sm:$0xff]   ;;  %v8078_v5 = vld [vmem:[#allocation5 + $0x1344] ss:$16 sps:$4 sm:$0xff]  }
 0x286   :  { %5160 = vmatprep.subr.bf16.mxu0 %v7986_v6  ;;  %5652 = vmatprep.subr.bf16.mxu1 %v7989_v7  ;;  %v8081_v6 = vld [vmem:[#allocation5 + $0x134c] ss:$16 sps:$4 sm:$0xff]   ;;  %v8076_v7 = vld [vmem:[#allocation5 + $0x1340] ss:$16 sps:$4 sm:$0xff]  }
 0x289   :  { %5161 = vmatpush1.bf16.msra.mxu0 %v7984_v8  ;;  %5653 = vmatpush1.bf16.msra.mxu1 %v7987_v9  ;;  %v8079_v8 = vld [vmem:[#allocation5 + $0x1348] ss:$16 sps:$4 sm:$0xff]   ;;  %v8084_v9 = vld [vmem:[#allocation5 + $0x1364] ss:$16 sps:$4 sm:$0xff]  }
 0x28a   :  { %5162 = vmatprep.subr.bf16.mxu0 %v7992_v10  ;;  %5654 = vmatprep.subr.bf16.mxu1 %v7995_v12  ;;  %v8087_v10 = vld [vmem:[#allocation5 + $0x136c] ss:$16 sps:$4 sm:$0xff]   ;;  %v8082_v12 = vld [vmem:[#allocation5 + $0x1360] ss:$16 sps:$4 sm:$0xff]  }
 0x28d   :  { %5163 = vmatpush1.bf16.msra.mxu0 %v7990_v13  ;;  %5655 = vmatpush1.bf16.msra.mxu1 %v7993_v15  ;;  %v8085_v13 = vld [vmem:[#allocation5 + $0x1368] ss:$16 sps:$4 sm:$0xff]   ;;  %v8090_v15 = vld [vmem:[#allocation5 + $0x1384] ss:$16 sps:$4 sm:$0xff]  }
 0x28e   :  { %5164 = vmatprep.subr.bf16.mxu0 %v7998_v16  ;;  %5656 = vmatprep.subr.bf16.mxu1 %v8001_v18  ;;  %v8093_v16 = vld [vmem:[#allocation5 + $0x138c] ss:$16 sps:$4 sm:$0xff]   ;;  %v8088_v18 = vld [vmem:[#allocation5 + $0x1380] ss:$16 sps:$4 sm:$0xff]  }
 0x291   :  { %5165 = vmatpush1.bf16.msra.mxu0 %v7996_v20  ;;  %5657 = vmatpush1.bf16.msra.mxu1 %v7999_v11  ;;  %v8091_v20 = vld [vmem:[#allocation5 + $0x1388] ss:$16 sps:$4 sm:$0xff]   ;;  %v8096_v11 = vld [vmem:[#allocation5 + $0x13a4] ss:$16 sps:$4 sm:$0xff]  }
 0x292   :  { %5166 = vmatprep.subr.bf16.mxu0 %v8004_v21  ;;  %5658 = vmatprep.subr.bf16.mxu1 %v8007_v14  ;;  %v8099_v21 = vld [vmem:[#allocation5 + $0x13ac] ss:$16 sps:$4 sm:$0xff]   ;;  %v8094_v14 = vld [vmem:[#allocation5 + $0x13a0] ss:$16 sps:$4 sm:$0xff]  }
 0x295   :  { %5167 = vmatpush1.bf16.msra.mxu0 %v8002_v23  ;;  %5659 = vmatpush1.bf16.msra.mxu1 %v8005_v24  ;;  %v8097_v23 = vld [vmem:[#allocation5 + $0x13a8] ss:$16 sps:$4 sm:$0xff]   ;;  %v8102_v24 = vld [vmem:[#allocation5 + $0x13c4] ss:$16 sps:$4 sm:$0xff]  }
 0x296   :  { %5168 = vmatprep.subr.bf16.mxu0 %v8010_v17  ;;  %5660 = vmatprep.subr.bf16.mxu1 %v8013_v26  ;;  %v8105_v17 = vld [vmem:[#allocation5 + $0x13cc] ss:$16 sps:$4 sm:$0xff]   ;;  %v8100_v26 = vld [vmem:[#allocation5 + $0x13c0] ss:$16 sps:$4 sm:$0xff]  }
 0x299   :  { %5169 = vmatpush1.bf16.msra.mxu0 %v8008_v27  ;;  %5661 = vmatpush1.bf16.msra.mxu1 %v8011_v28  ;;  %v8103_v27 = vld [vmem:[#allocation5 + $0x13c8] ss:$16 sps:$4 sm:$0xff]   ;;  %v8108_v28 = vld [vmem:[#allocation5 + $0x13e4] ss:$16 sps:$4 sm:$0xff]  }
 0x29a   :  { %5179 = vmatprep.subr.bf16.mxu0 %v8018_v29  ;;  %5671 = vmatprep.subr.bf16.mxu1 %v8021_v30  ;;  %v8111_v29 = vld [vmem:[#allocation5 + $0x13ec] ss:$16 sps:$4 sm:$0xff]   ;;  %v8106_v30 = vld [vmem:[#allocation5 + $0x13e0] ss:$16 sps:$4 sm:$0xff]  }
 0x29c   :  { %5171 = vmatmul.mubr.bf16.vlgmr.msra.gmra.mrb[0].mxu0 %v6179_v31  ;;  %5663 = vmatmul.mubr.bf16.vlgmr.msra.gmra.mrb[0].mxu1 %v6179_v31  ;;  %v8109_v31 = vld [vmem:[#allocation5 + $0x13e8] ss:$16 sps:$4 sm:$0xff]  }
 0x29d   :  { %5180 = vmatpush1.bf16.msra.mxu0 %v8016_v32  ;;  %5672 = vmatpush1.bf16.msra.mxu1 %v8019_v33  ;;  %v8116_v32 = vld [vmem:[#allocation5 + $0x1404] ss:$16 sps:$4 sm:$0xff]   ;;  %v8119_v33 = vld [vmem:[#allocation5 + $0x140c] ss:$16 sps:$4 sm:$0xff]  }
 0x29e   :  { %5181 = vmatprep.subr.bf16.mxu0 %v8024_v34  ;;  %5673 = vmatprep.subr.bf16.mxu1 %v8027_v25  ;;  %v6181_v34 = vcombine.low %v8630_v22, %v8630_v22  ;;  %v8636_v25 = vld [vmem:[#allocation2 + $0x50] sm:$0xff] }
 0x29f   :  { %5211 = vmatprep.mubr.bf16.mxu0 %v6182_v35  ;;  %5703 = vmatprep.mubr.bf16.mxu1 %v6182_v35  ;;  %v8114_v35 = vld [vmem:[#allocation5 + $0x1400] ss:$16 sps:$4 sm:$0xff]   ;;  %v8128_v22 = vld [vmem:[#allocation5 + $0x1444] ss:$16 sps:$4 sm:$0xff]  }
 0x2a1   :  { %5182 = vmatpush1.bf16.msra.mxu0 %v8022_v36  ;;  %5674 = vmatpush1.bf16.msra.mxu1 %v8025_v37  ;;  %v8117_v36 = vld [vmem:[#allocation5 + $0x1408] ss:$16 sps:$4 sm:$0xff]   ;;  %v8122_v37 = vld [vmem:[#allocation5 + $0x1424] ss:$16 sps:$4 sm:$0xff]  }
 0x2a2   :  { %5183 = vmatprep.subr.bf16.mxu0 %v8030_v19  ;;  %5675 = vmatprep.subr.bf16.mxu1 %v8033_v38  ;;  %v8125_v19 = vld [vmem:[#allocation5 + $0x142c] ss:$16 sps:$4 sm:$0xff]   ;;  %v6184_v38 = vcombine.high %v8636_v25, %v8636_v25 }
 0x2a5   :  { %5184 = vmatpush1.bf16.msra.mxu0 %v8028_v39  ;;  %5676 = vmatpush1.bf16.msra.mxu1 %v8031_v40  ;;  %v8120_v39 = vld [vmem:[#allocation5 + $0x1420] ss:$16 sps:$4 sm:$0xff]   ;;  %v8123_v40 = vld [vmem:[#allocation5 + $0x1428] ss:$16 sps:$4 sm:$0xff]  }
 0x2a6   :  { %5185 = vmatprep.subr.bf16.mxu0 %v8036_v41  ;;  %5677 = vmatprep.subr.bf16.mxu1 %v8039_v42  ;;  %v8131_v41 = vld [vmem:[#allocation5 + $0x144c] ss:$16 sps:$4 sm:$0xff]   ;;  %v8126_v42 = vld [vmem:[#allocation5 + $0x1440] ss:$16 sps:$4 sm:$0xff]  }
 0x2a9   :  { %5186 = vmatpush1.bf16.msra.mxu0 %v8034_v43  ;;  %5678 = vmatpush1.bf16.msra.mxu1 %v8037_v44  ;;  %v8129_v43 = vld [vmem:[#allocation5 + $0x1448] ss:$16 sps:$4 sm:$0xff]   ;;  %v8134_v44 = vld [vmem:[#allocation5 + $0x1464] ss:$16 sps:$4 sm:$0xff]  }
 0x2aa   :  { %5187 = vmatprep.subr.bf16.mxu0 %v8042_v45  ;;  %5679 = vmatprep.subr.bf16.mxu1 %v8045_v46  ;;  %v8137_v45 = vld [vmem:[#allocation5 + $0x146c] ss:$16 sps:$4 sm:$0xff]   ;;  %v8132_v46 = vld [vmem:[#allocation5 + $0x1460] ss:$16 sps:$4 sm:$0xff]  }
 0x2ad   :  { %5188 = vmatpush1.bf16.msra.mxu0 %v8040_v47  ;;  %5680 = vmatpush1.bf16.msra.mxu1 %v8043_v48  ;;  %v8135_v47 = vld [vmem:[#allocation5 + $0x1468] ss:$16 sps:$4 sm:$0xff]   ;;  %v8140_v48 = vld [vmem:[#allocation5 + $0x1484] ss:$16 sps:$4 sm:$0xff]  }
 0x2ae   :  { %5189 = vmatprep.subr.bf16.mxu0 %v8048_v49  ;;  %5681 = vmatprep.subr.bf16.mxu1 %v8051_v50  ;;  %v8143_v49 = vld [vmem:[#allocation5 + $0x148c] ss:$16 sps:$4 sm:$0xff]   ;;  %v8138_v50 = vld [vmem:[#allocation5 + $0x1480] ss:$16 sps:$4 sm:$0xff]  }
 0x2b1   :  { %5190 = vmatpush1.bf16.msra.mxu0 %v8046_v51  ;;  %5682 = vmatpush1.bf16.msra.mxu1 %v8049_v52  ;;  %v8141_v51 = vld [vmem:[#allocation5 + $0x1488] ss:$16 sps:$4 sm:$0xff]   ;;  %v8146_v52 = vld [vmem:[#allocation5 + $0x14a4] ss:$16 sps:$4 sm:$0xff]  }
 0x2b2   :  { %5191 = vmatprep.subr.bf16.mxu0 %v8054_v53  ;;  %5683 = vmatprep.subr.bf16.mxu1 %v8057_v54  ;;  %v8149_v53 = vld [vmem:[#allocation5 + $0x14ac] ss:$16 sps:$4 sm:$0xff]   ;;  %v8144_v54 = vld [vmem:[#allocation5 + $0x14a0] ss:$16 sps:$4 sm:$0xff]  }
 0x2b5   :  { %5192 = vmatpush1.bf16.msra.mxu0 %v8052_v55  ;;  %5684 = vmatpush1.bf16.msra.mxu1 %v8055_v56  ;;  %v8147_v55 = vld [vmem:[#allocation5 + $0x14a8] ss:$16 sps:$4 sm:$0xff]   ;;  %v8152_v56 = vld [vmem:[#allocation5 + $0x14c4] ss:$16 sps:$4 sm:$0xff]  }
 0x2b6   :  { %5193 = vmatprep.subr.bf16.mxu0 %v8060_v57  ;;  %5685 = vmatprep.subr.bf16.mxu1 %v8063_v58  ;;  %v8155_v57 = vld [vmem:[#allocation5 + $0x14cc] ss:$16 sps:$4 sm:$0xff]   ;;  %v8150_v58 = vld [vmem:[#allocation5 + $0x14c0] ss:$16 sps:$4 sm:$0xff]  }
 0x2b9   :  { %5194 = vmatpush1.bf16.msra.mxu0 %v8058_v59  ;;  %5686 = vmatpush1.bf16.msra.mxu1 %v8061_v60  ;;  %v8153_v59 = vld [vmem:[#allocation5 + $0x14c8] ss:$16 sps:$4 sm:$0xff]   ;;  %v8158_v60 = vld [vmem:[#allocation5 + $0x14e4] ss:$16 sps:$4 sm:$0xff]  }
 0x2ba   :  { %5195 = vmatprep.subr.bf16.mxu0 %v8066_v61  ;;  %5687 = vmatprep.subr.bf16.mxu1 %v8069_v62  ;;  %v8161_v61 = vld [vmem:[#allocation5 + $0x14ec] ss:$16 sps:$4 sm:$0xff]   ;;  %v8156_v62 = vld [vmem:[#allocation5 + $0x14e0] ss:$16 sps:$4 sm:$0xff]  }
 0x2bd   :  { %5196 = vmatpush1.bf16.msra.mxu0 %v8064_v63  ;;  %5688 = vmatpush1.bf16.msra.mxu1 %v8067_v0  ;;  %v8159_v63 = vld [vmem:[#allocation5 + $0x14e8] ss:$16 sps:$4 sm:$0xff]   ;;  %v8164_v0 = vld [vmem:[#allocation5 + $0x1504] ss:$16 sps:$4 sm:$0xff]  }
 0x2be   :  { %5197 = vmatprep.subr.bf16.mxu0 %v8072_v1  ;;  %5689 = vmatprep.subr.bf16.mxu1 %v8075_v2  ;;  %v8167_v1 = vld [vmem:[#allocation5 + $0x150c] ss:$16 sps:$4 sm:$0xff]   ;;  %v8162_v2 = vld [vmem:[#allocation5 + $0x1500] ss:$16 sps:$4 sm:$0xff]  }
 0x2c1   :  { %5198 = vmatpush1.bf16.msra.mxu0 %v8070_v3  ;;  %5690 = vmatpush1.bf16.msra.mxu1 %v8073_v4  ;;  %v8165_v3 = vld [vmem:[#allocation5 + $0x1508] ss:$16 sps:$4 sm:$0xff]   ;;  %v8170_v4 = vld [vmem:[#allocation5 + $0x1524] ss:$16 sps:$4 sm:$0xff]  }
 0x2c2   :  { %5199 = vmatprep.subr.bf16.mxu0 %v8078_v5  ;;  %5691 = vmatprep.subr.bf16.mxu1 %v8081_v6  ;;  %v8173_v5 = vld [vmem:[#allocation5 + $0x152c] ss:$16 sps:$4 sm:$0xff]   ;;  %v8168_v6 = vld [vmem:[#allocation5 + $0x1520] ss:$16 sps:$4 sm:$0xff]  }
 0x2c5   :  { %5200 = vmatpush1.bf16.msra.mxu0 %v8076_v7  ;;  %5692 = vmatpush1.bf16.msra.mxu1 %v8079_v8  ;;  %v8171_v7 = vld [vmem:[#allocation5 + $0x1528] ss:$16 sps:$4 sm:$0xff]   ;;  %v8176_v8 = vld [vmem:[#allocation5 + $0x1544] ss:$16 sps:$4 sm:$0xff]  }
 0x2c6   :  { %5201 = vmatprep.subr.bf16.mxu0 %v8084_v9  ;;  %5693 = vmatprep.subr.bf16.mxu1 %v8087_v10  ;;  %v8179_v9 = vld [vmem:[#allocation5 + $0x154c] ss:$16 sps:$4 sm:$0xff]   ;;  %v8174_v10 = vld [vmem:[#allocation5 + $0x1540] ss:$16 sps:$4 sm:$0xff]  }
 0x2c9   :  { %5202 = vmatpush1.bf16.msra.mxu0 %v8082_v12  ;;  %5694 = vmatpush1.bf16.msra.mxu1 %v8085_v13  ;;  %v8177_v12 = vld [vmem:[#allocation5 + $0x1548] ss:$16 sps:$4 sm:$0xff]   ;;  %v8182_v13 = vld [vmem:[#allocation5 + $0x1564] ss:$16 sps:$4 sm:$0xff]  }
 0x2ca   :  { %5203 = vmatprep.subr.bf16.mxu0 %v8090_v15  ;;  %5695 = vmatprep.subr.bf16.mxu1 %v8093_v16  ;;  %v8185_v15 = vld [vmem:[#allocation5 + $0x156c] ss:$16 sps:$4 sm:$0xff]   ;;  %v8180_v16 = vld [vmem:[#allocation5 + $0x1560] ss:$16 sps:$4 sm:$0xff]  }
 0x2cd   :  { %5204 = vmatpush1.bf16.msra.mxu0 %v8088_v18  ;;  %5696 = vmatpush1.bf16.msra.mxu1 %v8091_v20  ;;  %v8183_v18 = vld [vmem:[#allocation5 + $0x1568] ss:$16 sps:$4 sm:$0xff]   ;;  %v8188_v20 = vld [vmem:[#allocation5 + $0x1584] ss:$16 sps:$4 sm:$0xff]  }
 0x2ce   :  { %5205 = vmatprep.subr.bf16.mxu0 %v8096_v11  ;;  %5697 = vmatprep.subr.bf16.mxu1 %v8099_v21  ;;  %v8191_v11 = vld [vmem:[#allocation5 + $0x158c] ss:$16 sps:$4 sm:$0xff]   ;;  %v8186_v21 = vld [vmem:[#allocation5 + $0x1580] ss:$16 sps:$4 sm:$0xff]  }
 0x2d1   :  { %5206 = vmatpush1.bf16.msra.mxu0 %v8094_v14  ;;  %5698 = vmatpush1.bf16.msra.mxu1 %v8097_v23  ;;  %v8189_v14 = vld [vmem:[#allocation5 + $0x1588] ss:$16 sps:$4 sm:$0xff]   ;;  %v8194_v23 = vld [vmem:[#allocation5 + $0x15a4] ss:$16 sps:$4 sm:$0xff]  }
 0x2d2   :  { %5207 = vmatprep.subr.bf16.mxu0 %v8102_v24  ;;  %5699 = vmatprep.subr.bf16.mxu1 %v8105_v17  ;;  %v8197_v24 = vld [vmem:[#allocation5 + $0x15ac] ss:$16 sps:$4 sm:$0xff]   ;;  %v8192_v17 = vld [vmem:[#allocation5 + $0x15a0] ss:$16 sps:$4 sm:$0xff]  }
 0x2d5   :  { %5208 = vmatpush1.bf16.msra.mxu0 %v8100_v26  ;;  %5700 = vmatpush1.bf16.msra.mxu1 %v8103_v27  ;;  %v8195_v26 = vld [vmem:[#allocation5 + $0x15a8] ss:$16 sps:$4 sm:$0xff]   ;;  %v8200_v27 = vld [vmem:[#allocation5 + $0x15c4] ss:$16 sps:$4 sm:$0xff]  }
 0x2d6   :  { %5209 = vmatprep.subr.bf16.mxu0 %v8108_v28  ;;  %5701 = vmatprep.subr.bf16.mxu1 %v8111_v29  ;;  %v8203_v28 = vld [vmem:[#allocation5 + $0x15cc] ss:$16 sps:$4 sm:$0xff]   ;;  %v8198_v29 = vld [vmem:[#allocation5 + $0x15c0] ss:$16 sps:$4 sm:$0xff]  }
 0x2d9   :  { %5210 = vmatpush1.bf16.msra.mxu0 %v8106_v30  ;;  %5702 = vmatpush1.bf16.msra.mxu1 %v8109_v31  ;;  %v8201_v30 = vld [vmem:[#allocation5 + $0x15c8] ss:$16 sps:$4 sm:$0xff]   ;;  %v8206_v31 = vld [vmem:[#allocation5 + $0x15e4] ss:$16 sps:$4 sm:$0xff]  }
 0x2da   :  { %5220 = vmatprep.subr.bf16.mxu0 %v8116_v32  ;;  %5712 = vmatprep.subr.bf16.mxu1 %v8119_v33  ;;  %v8209_v32 = vld [vmem:[#allocation5 + $0x15ec] ss:$16 sps:$4 sm:$0xff]   ;;  %v8204_v33 = vld [vmem:[#allocation5 + $0x15e0] ss:$16 sps:$4 sm:$0xff]  }
 0x2dc   :  { %5212 = vmatmul.mubr.bf16.vlgmr.msra.gmra.mrb[0].mxu0 %v6181_v34  ;;  %5704 = vmatmul.mubr.bf16.vlgmr.msra.gmra.mrb[0].mxu1 %v6181_v34  ;;  %v8207_v34 = vld [vmem:[#allocation5 + $0x15e8] ss:$16 sps:$4 sm:$0xff]  }
 0x2dd   :  { %5221 = vmatpush1.bf16.msra.mxu0 %v8114_v35  ;;  %5713 = vmatpush1.bf16.msra.mxu1 %v8117_v36  ;;  %v8214_v35 = vld [vmem:[#allocation5 + $0x1604] ss:$16 sps:$4 sm:$0xff]   ;;  %v8217_v36 = vld [vmem:[#allocation5 + $0x160c] ss:$16 sps:$4 sm:$0xff]  }
 0x2de   :  { %5222 = vmatprep.subr.bf16.mxu0 %v8122_v37  ;;  %5714 = vmatprep.subr.bf16.mxu1 %v8125_v19  ;;  %v6183_v37 = vcombine.low %v8636_v25, %v8636_v25  ;;  %v8642_v19 = vld [vmem:[#allocation2 + $0x58] sm:$0xff]  ;;  %v8226_v25 = vld [vmem:[#allocation5 + $0x1644] ss:$16 sps:$4 sm:$0xff]  }
 0x2df   :  { %5252 = vmatprep.mubr.bf16.mxu0 %v6184_v38  ;;  %5744 = vmatprep.mubr.bf16.mxu1 %v6184_v38  ;;  %v8212_v38 = vld [vmem:[#allocation5 + $0x1600] ss:$16 sps:$4 sm:$0xff]  }
 0x2e1   :  { %5223 = vmatpush1.bf16.msra.mxu0 %v8120_v39  ;;  %5715 = vmatpush1.bf16.msra.mxu1 %v8123_v40  ;;  %v8215_v39 = vld [vmem:[#allocation5 + $0x1608] ss:$16 sps:$4 sm:$0xff]   ;;  %v8220_v40 = vld [vmem:[#allocation5 + $0x1624] ss:$16 sps:$4 sm:$0xff]  }
 0x2e2   :  { %5224 = vmatprep.subr.bf16.mxu0 %v8128_v22  ;;  %5716 = vmatprep.subr.bf16.mxu1 %v8131_v41  ;;  %v8223_v22 = vld [vmem:[#allocation5 + $0x162c] ss:$16 sps:$4 sm:$0xff]   ;;  %v6186_v41 = vcombine.high %v8642_v19, %v8642_v19 }
 0x2e5   :  { %5225 = vmatpush1.bf16.msra.mxu0 %v8126_v42  ;;  %5717 = vmatpush1.bf16.msra.mxu1 %v8129_v43  ;;  %v8218_v42 = vld [vmem:[#allocation5 + $0x1620] ss:$16 sps:$4 sm:$0xff]   ;;  %v8221_v43 = vld [vmem:[#allocation5 + $0x1628] ss:$16 sps:$4 sm:$0xff]  }
 0x2e6   :  { %5226 = vmatprep.subr.bf16.mxu0 %v8134_v44  ;;  %5718 = vmatprep.subr.bf16.mxu1 %v8137_v45  ;;  %v8229_v44 = vld [vmem:[#allocation5 + $0x164c] ss:$16 sps:$4 sm:$0xff]   ;;  %v8224_v45 = vld [vmem:[#allocation5 + $0x1640] ss:$16 sps:$4 sm:$0xff]  }
 0x2e9   :  { %5227 = vmatpush1.bf16.msra.mxu0 %v8132_v46  ;;  %5719 = vmatpush1.bf16.msra.mxu1 %v8135_v47  ;;  %v8227_v46 = vld [vmem:[#allocation5 + $0x1648] ss:$16 sps:$4 sm:$0xff]   ;;  %v8232_v47 = vld [vmem:[#allocation5 + $0x1664] ss:$16 sps:$4 sm:$0xff]  }
 0x2ea   :  { %5228 = vmatprep.subr.bf16.mxu0 %v8140_v48  ;;  %5720 = vmatprep.subr.bf16.mxu1 %v8143_v49  ;;  %v8235_v48 = vld [vmem:[#allocation5 + $0x166c] ss:$16 sps:$4 sm:$0xff]   ;;  %v8230_v49 = vld [vmem:[#allocation5 + $0x1660] ss:$16 sps:$4 sm:$0xff]  }
 0x2ed   :  { %5229 = vmatpush1.bf16.msra.mxu0 %v8138_v50  ;;  %5721 = vmatpush1.bf16.msra.mxu1 %v8141_v51  ;;  %v8233_v50 = vld [vmem:[#allocation5 + $0x1668] ss:$16 sps:$4 sm:$0xff]   ;;  %v8238_v51 = vld [vmem:[#allocation5 + $0x1684] ss:$16 sps:$4 sm:$0xff]  }
 0x2ee   :  { %5230 = vmatprep.subr.bf16.mxu0 %v8146_v52  ;;  %5722 = vmatprep.subr.bf16.mxu1 %v8149_v53  ;;  %v8241_v52 = vld [vmem:[#allocation5 + $0x168c] ss:$16 sps:$4 sm:$0xff]   ;;  %v8236_v53 = vld [vmem:[#allocation5 + $0x1680] ss:$16 sps:$4 sm:$0xff]  }
 0x2f1   :  { %5231 = vmatpush1.bf16.msra.mxu0 %v8144_v54  ;;  %5723 = vmatpush1.bf16.msra.mxu1 %v8147_v55  ;;  %v8239_v54 = vld [vmem:[#allocation5 + $0x1688] ss:$16 sps:$4 sm:$0xff]   ;;  %v8244_v55 = vld [vmem:[#allocation5 + $0x16a4] ss:$16 sps:$4 sm:$0xff]  }
 0x2f2   :  { %5232 = vmatprep.subr.bf16.mxu0 %v8152_v56  ;;  %5724 = vmatprep.subr.bf16.mxu1 %v8155_v57  ;;  %v8247_v56 = vld [vmem:[#allocation5 + $0x16ac] ss:$16 sps:$4 sm:$0xff]   ;;  %v8242_v57 = vld [vmem:[#allocation5 + $0x16a0] ss:$16 sps:$4 sm:$0xff]  }
 0x2f5   :  { %5233 = vmatpush1.bf16.msra.mxu0 %v8150_v58  ;;  %5725 = vmatpush1.bf16.msra.mxu1 %v8153_v59  ;;  %v8245_v58 = vld [vmem:[#allocation5 + $0x16a8] ss:$16 sps:$4 sm:$0xff]   ;;  %v8250_v59 = vld [vmem:[#allocation5 + $0x16c4] ss:$16 sps:$4 sm:$0xff]  }
 0x2f6   :  { %5234 = vmatprep.subr.bf16.mxu0 %v8158_v60  ;;  %5726 = vmatprep.subr.bf16.mxu1 %v8161_v61  ;;  %v8253_v60 = vld [vmem:[#allocation5 + $0x16cc] ss:$16 sps:$4 sm:$0xff]   ;;  %v8248_v61 = vld [vmem:[#allocation5 + $0x16c0] ss:$16 sps:$4 sm:$0xff]  }
 0x2f9   :  { %5235 = vmatpush1.bf16.msra.mxu0 %v8156_v62  ;;  %5727 = vmatpush1.bf16.msra.mxu1 %v8159_v63  ;;  %v8251_v62 = vld [vmem:[#allocation5 + $0x16c8] ss:$16 sps:$4 sm:$0xff]   ;;  %v8256_v63 = vld [vmem:[#allocation5 + $0x16e4] ss:$16 sps:$4 sm:$0xff]  }
 0x2fa   :  { %5236 = vmatprep.subr.bf16.mxu0 %v8164_v0  ;;  %5728 = vmatprep.subr.bf16.mxu1 %v8167_v1  ;;  %v8259_v0 = vld [vmem:[#allocation5 + $0x16ec] ss:$16 sps:$4 sm:$0xff]   ;;  %v8254_v1 = vld [vmem:[#allocation5 + $0x16e0] ss:$16 sps:$4 sm:$0xff]  }
 0x2fd   :  { %5237 = vmatpush1.bf16.msra.mxu0 %v8162_v2  ;;  %5729 = vmatpush1.bf16.msra.mxu1 %v8165_v3  ;;  %v8257_v2 = vld [vmem:[#allocation5 + $0x16e8] ss:$16 sps:$4 sm:$0xff]   ;;  %v8262_v3 = vld [vmem:[#allocation5 + $0x1704] ss:$16 sps:$4 sm:$0xff]  }
 0x2fe   :  { %5238 = vmatprep.subr.bf16.mxu0 %v8170_v4  ;;  %5730 = vmatprep.subr.bf16.mxu1 %v8173_v5  ;;  %v8265_v4 = vld [vmem:[#allocation5 + $0x170c] ss:$16 sps:$4 sm:$0xff]   ;;  %v8260_v5 = vld [vmem:[#allocation5 + $0x1700] ss:$16 sps:$4 sm:$0xff]  }
 0x301   :  { %5239 = vmatpush1.bf16.msra.mxu0 %v8168_v6  ;;  %5731 = vmatpush1.bf16.msra.mxu1 %v8171_v7  ;;  %v8263_v6 = vld [vmem:[#allocation5 + $0x1708] ss:$16 sps:$4 sm:$0xff]   ;;  %v8268_v7 = vld [vmem:[#allocation5 + $0x1724] ss:$16 sps:$4 sm:$0xff]  }
 0x302   :  { %5240 = vmatprep.subr.bf16.mxu0 %v8176_v8  ;;  %5732 = vmatprep.subr.bf16.mxu1 %v8179_v9  ;;  %v8271_v8 = vld [vmem:[#allocation5 + $0x172c] ss:$16 sps:$4 sm:$0xff]   ;;  %v8266_v9 = vld [vmem:[#allocation5 + $0x1720] ss:$16 sps:$4 sm:$0xff]  }
 0x305   :  { %5241 = vmatpush1.bf16.msra.mxu0 %v8174_v10  ;;  %5733 = vmatpush1.bf16.msra.mxu1 %v8177_v12  ;;  %v8269_v10 = vld [vmem:[#allocation5 + $0x1728] ss:$16 sps:$4 sm:$0xff]   ;;  %v8274_v12 = vld [vmem:[#allocation5 + $0x1744] ss:$16 sps:$4 sm:$0xff]  }
 0x306   :  { %5242 = vmatprep.subr.bf16.mxu0 %v8182_v13  ;;  %5734 = vmatprep.subr.bf16.mxu1 %v8185_v15  ;;  %v8277_v13 = vld [vmem:[#allocation5 + $0x174c] ss:$16 sps:$4 sm:$0xff]   ;;  %v8272_v15 = vld [vmem:[#allocation5 + $0x1740] ss:$16 sps:$4 sm:$0xff]  }
 0x309   :  { %5243 = vmatpush1.bf16.msra.mxu0 %v8180_v16  ;;  %5735 = vmatpush1.bf16.msra.mxu1 %v8183_v18  ;;  %v8275_v16 = vld [vmem:[#allocation5 + $0x1748] ss:$16 sps:$4 sm:$0xff]   ;;  %v8280_v18 = vld [vmem:[#allocation5 + $0x1764] ss:$16 sps:$4 sm:$0xff]  }
 0x30a   :  { %5244 = vmatprep.subr.bf16.mxu0 %v8188_v20  ;;  %5736 = vmatprep.subr.bf16.mxu1 %v8191_v11  ;;  %v8283_v20 = vld [vmem:[#allocation5 + $0x176c] ss:$16 sps:$4 sm:$0xff]   ;;  %v8278_v11 = vld [vmem:[#allocation5 + $0x1760] ss:$16 sps:$4 sm:$0xff]  }
 0x30d   :  { %5245 = vmatpush1.bf16.msra.mxu0 %v8186_v21  ;;  %5737 = vmatpush1.bf16.msra.mxu1 %v8189_v14  ;;  %v8281_v21 = vld [vmem:[#allocation5 + $0x1768] ss:$16 sps:$4 sm:$0xff]   ;;  %v8286_v14 = vld [vmem:[#allocation5 + $0x1784] ss:$16 sps:$4 sm:$0xff]  }
 0x30e   :  { %5246 = vmatprep.subr.bf16.mxu0 %v8194_v23  ;;  %5738 = vmatprep.subr.bf16.mxu1 %v8197_v24  ;;  %v8289_v23 = vld [vmem:[#allocation5 + $0x178c] ss:$16 sps:$4 sm:$0xff]   ;;  %v8284_v24 = vld [vmem:[#allocation5 + $0x1780] ss:$16 sps:$4 sm:$0xff]  }
 0x311   :  { %5247 = vmatpush1.bf16.msra.mxu0 %v8192_v17  ;;  %5739 = vmatpush1.bf16.msra.mxu1 %v8195_v26  ;;  %v8287_v17 = vld [vmem:[#allocation5 + $0x1788] ss:$16 sps:$4 sm:$0xff]   ;;  %v8292_v26 = vld [vmem:[#allocation5 + $0x17a4] ss:$16 sps:$4 sm:$0xff]  }
 0x312   :  { %5248 = vmatprep.subr.bf16.mxu0 %v8200_v27  ;;  %5740 = vmatprep.subr.bf16.mxu1 %v8203_v28  ;;  %v8295_v27 = vld [vmem:[#allocation5 + $0x17ac] ss:$16 sps:$4 sm:$0xff]   ;;  %v8290_v28 = vld [vmem:[#allocation5 + $0x17a0] ss:$16 sps:$4 sm:$0xff]  }
 0x315   :  { %5249 = vmatpush1.bf16.msra.mxu0 %v8198_v29  ;;  %5741 = vmatpush1.bf16.msra.mxu1 %v8201_v30  ;;  %v8293_v29 = vld [vmem:[#allocation5 + $0x17a8] ss:$16 sps:$4 sm:$0xff]   ;;  %v8298_v30 = vld [vmem:[#allocation5 + $0x17c4] ss:$16 sps:$4 sm:$0xff]  }
 0x316   :  { %5250 = vmatprep.subr.bf16.mxu0 %v8206_v31  ;;  %5742 = vmatprep.subr.bf16.mxu1 %v8209_v32  ;;  %v8301_v31 = vld [vmem:[#allocation5 + $0x17cc] ss:$16 sps:$4 sm:$0xff]   ;;  %v8296_v32 = vld [vmem:[#allocation5 + $0x17c0] ss:$16 sps:$4 sm:$0xff]  }
 0x319   :  { %5251 = vmatpush1.bf16.msra.mxu0 %v8204_v33  ;;  %5743 = vmatpush1.bf16.msra.mxu1 %v8207_v34  ;;  %v8299_v33 = vld [vmem:[#allocation5 + $0x17c8] ss:$16 sps:$4 sm:$0xff]   ;;  %v8304_v34 = vld [vmem:[#allocation5 + $0x17e4] ss:$16 sps:$4 sm:$0xff]  }
 0x31a   :  { %5261 = vmatprep.subr.bf16.mxu0 %v8214_v35  ;;  %5753 = vmatprep.subr.bf16.mxu1 %v8217_v36  ;;  %v8307_v35 = vld [vmem:[#allocation5 + $0x17ec] ss:$16 sps:$4 sm:$0xff]   ;;  %v8302_v36 = vld [vmem:[#allocation5 + $0x17e0] ss:$16 sps:$4 sm:$0xff]  }
 0x31c   :  { %5253 = vmatmul.mubr.bf16.vlgmr.msra.gmra.mrb[0].mxu0 %v6183_v37  ;;  %5745 = vmatmul.mubr.bf16.vlgmr.msra.gmra.mrb[0].mxu1 %v6183_v37  ;;  %v8305_v37 = vld [vmem:[#allocation5 + $0x17e8] ss:$16 sps:$4 sm:$0xff]  }
 0x31d   :  { %5262 = vmatpush1.bf16.msra.mxu0 %v8212_v38  ;;  %5754 = vmatpush1.bf16.msra.mxu1 %v8215_v39  ;;  %v8310_v38 = vld [vmem:[#allocation8 + $0x40] sm:$0xff]  }
 0x31e   :  { %5263 = vmatprep.subr.bf16.mxu0 %v8220_v40  ;;  %5755 = vmatprep.subr.bf16.mxu1 %v8223_v22  ;;  %v8311_v39 = vld [vmem:[#allocation8 + $0xc0] sm:$0xff]   ;;  %v6185_v40 = vcombine.low %v8642_v19, %v8642_v19  ;;  %v8320_v19 = vld [vmem:[#allocation8 + $0x10] sm:$0xff]  }
 0x31f   :  { %5293 = vmatprep.mubr.bf16.mxu0 %v6186_v41  ;;  %5785 = vmatprep.mubr.bf16.mxu1 %v6186_v41  ;;  %v8312_v22 = vld [vmem:[#allocation8] sm:$0xff]  }
 0x320   :  { %v8313_v41 = vld [vmem:[#allocation8 + $0x80] sm:$0xff]  }
 0x321   :  { %5264 = vmatpush1.bf16.msra.mxu0 %v8218_v42  ;;  %5756 = vmatpush1.bf16.msra.mxu1 %v8221_v43  ;;  %v8314_v42 = vld [vmem:[#allocation8 + $0x48] sm:$0xff]  }
 0x322   :  { %5265 = vmatprep.subr.bf16.mxu0 %v8226_v25  ;;  %5757 = vmatprep.subr.bf16.mxu1 %v8229_v44  ;;  %v8315_v43 = vld [vmem:[#allocation8 + $0xc8] sm:$0xff]  }
 0x323   :  { %v8316_v25 = vld [vmem:[#allocation8 + $0x8] sm:$0xff]  }
 0x324   :  { %v8317_v44 = vld [vmem:[#allocation8 + $0x88] sm:$0xff]  }
 0x325   :  { %5266 = vmatpush1.bf16.msra.mxu0 %v8224_v45  ;;  %5758 = vmatpush1.bf16.msra.mxu1 %v8227_v46  ;;  %v8318_v45 = vld [vmem:[#allocation8 + $0x50] sm:$0xff]  }
 0x326   :  { %5267 = vmatprep.subr.bf16.mxu0 %v8232_v47  ;;  %5759 = vmatprep.subr.bf16.mxu1 %v8235_v48  ;;  %v8319_v46 = vld [vmem:[#allocation8 + $0xd0] sm:$0xff]   ;;  %v8322_v48 = vld [vmem:[#allocation8 + $0x58] sm:$0xff]  }
 0x327   :  { %v8321_v47 = vld [vmem:[#allocation8 + $0x90] sm:$0xff]  }
 0x329   :  { %5268 = vmatpush1.bf16.msra.mxu0 %v8230_v49  ;;  %5760 = vmatpush1.bf16.msra.mxu1 %v8233_v50  ;;  %v8323_v49 = vld [vmem:[#allocation8 + $0xd8] sm:$0xff]  }
 0x32a   :  { %5269 = vmatprep.subr.bf16.mxu0 %v8238_v51  ;;  %5761 = vmatprep.subr.bf16.mxu1 %v8241_v52  ;;  %v8324_v50 = vld [vmem:[#allocation8 + $0x18] sm:$0xff]   ;;  %v8326_v52 = vld [vmem:[#allocation8 + $0x60] sm:$0xff]  }
 0x32b   :  { %v8325_v51 = vld [vmem:[#allocation8 + $0x98] sm:$0xff]  }
 0x32d   :  { %5270 = vmatpush1.bf16.msra.mxu0 %v8236_v53  ;;  %5762 = vmatpush1.bf16.msra.mxu1 %v8239_v54  ;;  %v8327_v53 = vld [vmem:[#allocation8 + $0xe0] sm:$0xff]  }
 0x32e   :  { %5271 = vmatprep.subr.bf16.mxu0 %v8244_v55  ;;  %5763 = vmatprep.subr.bf16.mxu1 %v8247_v56  ;;  %v8328_v54 = vld [vmem:[#allocation8 + $0x20] sm:$0xff]   ;;  %v8330_v56 = vld [vmem:[#allocation8 + $0x68] sm:$0xff]  }
 0x32f   :  { %v8329_v55 = vld [vmem:[#allocation8 + $0xa0] sm:$0xff]  }
 0x331   :  { %5272 = vmatpush1.bf16.msra.mxu0 %v8242_v57  ;;  %5764 = vmatpush1.bf16.msra.mxu1 %v8245_v58  ;;  %v8331_v57 = vld [vmem:[#allocation8 + $0xe8] sm:$0xff]  }
 0x332   :  { %5273 = vmatprep.subr.bf16.mxu0 %v8250_v59  ;;  %5765 = vmatprep.subr.bf16.mxu1 %v8253_v60  ;;  %v8332_v58 = vld [vmem:[#allocation8 + $0x28] sm:$0xff]   ;;  %v8334_v60 = vld [vmem:[#allocation8 + $0x70] sm:$0xff]  }
 0x333   :  { %v8333_v59 = vld [vmem:[#allocation8 + $0xa8] sm:$0xff]  }
 0x335   :  { %5274 = vmatpush1.bf16.msra.mxu0 %v8248_v61  ;;  %5766 = vmatpush1.bf16.msra.mxu1 %v8251_v62  ;;  %v8335_v61 = vld [vmem:[#allocation8 + $0xf0] sm:$0xff]  }
 0x336   :  { %5275 = vmatprep.subr.bf16.mxu0 %v8256_v63  ;;  %5767 = vmatprep.subr.bf16.mxu1 %v8259_v0  ;;  %v8336_v62 = vld [vmem:[#allocation8 + $0x30] sm:$0xff]   ;;  %v8338_v0 = vld [vmem:[#allocation8 + $0x78] sm:$0xff]  }
 0x337   :  { %v8337_v63 = vld [vmem:[#allocation8 + $0xb0] sm:$0xff]  }
 0x339   :  { %5276 = vmatpush1.bf16.msra.mxu0 %v8254_v1  ;;  %5768 = vmatpush1.bf16.msra.mxu1 %v8257_v2  ;;  %v8339_v1 = vld [vmem:[#allocation8 + $0xf8] sm:$0xff]  }
 0x33a   :  { %5277 = vmatprep.subr.bf16.mxu0 %v8262_v3  ;;  %5769 = vmatprep.subr.bf16.mxu1 %v8265_v4  ;;  %v8340_v2 = vld [vmem:[#allocation8 + $0x38] sm:$0xff]   ;;  %v866_v4 = vlaneseq }
 0x33b   :  { %v8341_v3 = vld [vmem:[#allocation8 + $0xb8] sm:$0xff]  }
 0x33d   :  { %5278 = vmatpush1.bf16.msra.mxu0 %v8260_v5  ;;  %5770 = vmatpush1.bf16.msra.mxu1 %v8263_v6  ;;  %v867_v5 = vshrl.u32 %v866_v4, 7 }
 0x33e   :  { %5279 = vmatprep.subr.bf16.mxu0 %v8268_v7  ;;  %5771 = vmatprep.subr.bf16.mxu1 %v8271_v8  ;;  %v864_v8 = vld [vmem:[#allocation7] sm:$0xf] }
 0x33f   :  { %v868_v6 = vsub.s32 0, %v867_v5  ;;  %v876_v7 = vsub.s32 2, %v867_v5 }
 0x341   :  { %5280 = vmatpush1.bf16.msra.mxu0 %v8266_v9  ;;  %5772 = vmatpush1.bf16.msra.mxu1 %v8269_v10  ;;  %v872_v9 = vsub.s32 1, %v867_v5  ;;  %v880_v10 = vsub.s32 3, %v867_v5 }
 0x342   :  { %5281 = vmatprep.subr.bf16.mxu0 %v8274_v12  ;;  %5773 = vmatprep.subr.bf16.mxu1 %v8277_v13  ;;  %v869_v12 = vrot.slane %v864_v8, %v868_v6  ;;  %v877_v13 = vrot.slane %v864_v8, %v876_v7 }
 0x345   :  { %5282 = vmatpush1.bf16.msra.mxu0 %v8272_v15  ;;  %5774 = vmatpush1.bf16.msra.mxu1 %v8275_v16  ;;  %v873_v15 = vrot.slane %v864_v8, %v872_v9  ;;  %v881_v16 = vrot.slane %v864_v8, %v880_v10 }
 0x346   :  { %5283 = vmatprep.subr.bf16.mxu0 %v8280_v18  ;;  %5775 = vmatprep.subr.bf16.mxu1 %v8283_v20 }
 0x349   :  { %5284 = vmatpush1.bf16.msra.mxu0 %v8278_v11  ;;  %5776 = vmatpush1.bf16.msra.mxu1 %v8281_v21 }
 0x34a   :  { %5285 = vmatprep.subr.bf16.mxu0 %v8286_v14  ;;  %5777 = vmatprep.subr.bf16.mxu1 %v8289_v23 }
 0x34d   :  { %5286 = vmatpush1.bf16.msra.mxu0 %v8284_v24  ;;  %5778 = vmatpush1.bf16.msra.mxu1 %v8287_v17 }
 0x34e   :  { %5287 = vmatprep.subr.bf16.mxu0 %v8292_v26  ;;  %5779 = vmatprep.subr.bf16.mxu1 %v8295_v27 }
 0x351   :  { %5288 = vmatpush1.bf16.msra.mxu0 %v8290_v28  ;;  %5780 = vmatpush1.bf16.msra.mxu1 %v8293_v29 }
 0x352   :  { %5289 = vmatprep.subr.bf16.mxu0 %v8298_v30  ;;  %5781 = vmatprep.subr.bf16.mxu1 %v8301_v31 }
 0x355   :  { %5290 = vmatpush1.bf16.msra.mxu0 %v8296_v32  ;;  %5782 = vmatpush1.bf16.msra.mxu1 %v8299_v33 }
 0x356   :  { %5291 = vmatprep.subr.bf16.mxu0 %v8304_v34  ;;  %5783 = vmatprep.subr.bf16.mxu1 %v8307_v35 }
 0x359   :  { %5292 = vmatpush1.bf16.msra.mxu0 %v8302_v36  ;;  %5784 = vmatpush1.bf16.msra.mxu1 %v8305_v37 }
 0x35a   :  { %6988 = vmatprep.subr.bf16.mxu0 %v8310_v38  ;;  %7010 = vmatprep.subr.bf16.mxu1 %v8311_v39 }
 0x35c   :  { %5294 = vmatmul.mubr.bf16.vlgmr.msra.gmra.mrb[0].mxu0 %v6185_v40  ;;  %5786 = vmatmul.mubr.bf16.vlgmr.msra.gmra.mrb[0].mxu1 %v6185_v40  ;;  %v6955_v40 = vld [vmem:[#allocation10] ss:$0 sm:$0xff] }
 0x35d   :  { %6989 = vmatpush3.bf16.msra.mxu0 %v8312_v22  ;;  %7011 = vmatpush3.bf16.msra.mxu1 %v8313_v41 }
 0x35e   :  { %6990 = vmatprep.subr.bf16.mxu0 %v8314_v42  ;;  %7012 = vmatprep.subr.bf16.mxu1 %v8315_v43 }
 0x361   :  { %6991 = vmatpush3.bf16.msra.mxu0 %v8316_v25  ;;  %7013 = vmatpush3.bf16.msra.mxu1 %v8317_v44 }
 0x362   :  { %6992 = vmatprep.subr.bf16.mxu0 %v8318_v45  ;;  %7014 = vmatprep.subr.bf16.mxu1 %v8319_v46 }
 0x365   :  { %6993 = vmatpush3.bf16.msra.mxu0 %v8320_v19  ;;  %7015 = vmatpush3.bf16.msra.mxu1 %v8321_v47 }
 0x366   :  { %6994 = vmatprep.subr.bf16.mxu0 %v8322_v48  ;;  %7016 = vmatprep.subr.bf16.mxu1 %v8323_v49 }
 0x369   :  { %6995 = vmatpush3.bf16.msra.mxu0 %v8324_v50  ;;  %7017 = vmatpush3.bf16.msra.mxu1 %v8325_v51 }
 0x36a   :  { %6996 = vmatprep.subr.bf16.mxu0 %v8326_v52  ;;  %7018 = vmatprep.subr.bf16.mxu1 %v8327_v53 }
 0x36d   :  { %6997 = vmatpush3.bf16.msra.mxu0 %v8328_v54  ;;  %7019 = vmatpush3.bf16.msra.mxu1 %v8329_v55 }
 0x36e   :  { %6998 = vmatprep.subr.bf16.mxu0 %v8330_v56  ;;  %7020 = vmatprep.subr.bf16.mxu1 %v8331_v57 }
 0x371   :  { %6999 = vmatpush3.bf16.msra.mxu0 %v8332_v58  ;;  %7021 = vmatpush3.bf16.msra.mxu1 %v8333_v59 }
 0x372   :  { %7000 = vmatprep.subr.bf16.mxu0 %v8334_v60  ;;  %7022 = vmatprep.subr.bf16.mxu1 %v8335_v61 }
 0x375   :  { %7001 = vmatpush3.bf16.msra.mxu0 %v8336_v62  ;;  %7023 = vmatpush3.bf16.msra.mxu1 %v8337_v63 }
 0x376   :  { %7002 = vmatprep.subr.bf16.mxu0 %v8338_v0  ;;  %7024 = vmatprep.subr.bf16.mxu1 %v8339_v1 }
 0x379   :  { %7003 = vmatpush3.bf16.msra.mxu0 %v8340_v2  ;;  %7025 = vmatpush3.bf16.msra.mxu1 %v8341_v3 }
 0x42f   :  { %v5295_v18 = vpop.f32.mrb[0].mxu0  ;;  %v5787_v20 = vpop.f32.mrb[0].mxu1 }
 0x430   :  { %v7032_v11 = vadd.f32 %v5295_v18, %v869_v12  ;;  %v7034_v21 = vadd.f32 %v5787_v20, %v877_v13  ;;  %v5297_v14 = vpop.f32.mrb[1].mxu0  ;;  %v5789_v23 = vpop.f32.mrb[1].mxu1 }
 0x431   :  { %v7033_v24 = vadd.f32 %v5297_v14, %v873_v15  ;;  %v7035_v17 = vadd.f32 %v5789_v23, %v881_v16  ;;  %v5299_v26 = vpop.f32.mrb[2].mxu0  ;;  %v5791_v27 = vpop.f32.mrb[2].mxu1 }
 0x432   :  { %v5794_v28 = vmax.f32 %v7032_v11, 0.0  ;;  %v5796_v29 = vmax.f32 %v7034_v21, 0.0  ;;  %v5300_v30 = vpop.f32.mrb[3].mxu0  ;;  %v5792_v31 = vpop.f32.mrb[3].mxu1 }
 0x433   :  { %v5795_v32 = vmax.f32 %v7033_v24, 0.0  ;;  %v5797_v33 = vmax.f32 %v7035_v17, 0.0 }
 0x434   :  { %v5798_v36 = vpack.c.bf16 %v5794_v28, %v5794_v28  ;;  %v5800_v37 = vpack.c.bf16 %v5796_v29, %v5796_v29 }
 0x435   :  { %v5799_v34 = vpack.c.bf16 %v5795_v32, %v5795_v32  ;;  %v5801_v35 = vpack.c.bf16 %v5797_v33, %v5797_v33 }
 0x437   :  { %6097 = vmatprep.mubr.bf16.mxu0 %v5799_v34  ;;  %6137 = vmatprep.mubr.bf16.mxu1 %v5801_v35 }
 0x438   :  { %6098 = vmatmul.mubr.bf16.vlgmr.msra.gmra.mrb[4].mxu0 %v5798_v36  ;;  %6138 = vmatmul.mubr.bf16.vlgmr.msra.gmra.mrb[4].mxu1 %v5800_v37 }
 0x50b   :  { %v7004_v38 = vpop.f32.mrb[4].mxu0  ;;  %v7026_v39 = vpop.f32.mrb[4].mxu1 }
 0x50c   :  { %v7005_v22 = vpop.f32.mrb[5].mxu0  ;;  %v7027_v41 = vpop.f32.mrb[5].mxu1 }
 0x50d   :  { %v7006_v42 = vadd.f32 %v7005_v22, %v7004_v38  ;;  %v7028_v43 = vadd.f32 %v7027_v41, %v7026_v39  ;;  %v7007_v25 = vpop.f32.mrb[6].mxu0  ;;  %v7029_v44 = vpop.f32.mrb[6].mxu1 }
 0x50e   :  { %v7008_v45 = vpop.f32.mrb[7].mxu0  ;;  %v7030_v46 = vpop.f32.mrb[7].mxu1 }
 0x50f   :  { %v6100_v19 = vadd.f32 %v7006_v42, %v6955_v40 }
 0x511   :  { %v6140_v47 = vadd.f32 %v7028_v43, %v6100_v19 }
 0x513   :  { %6145 = vst [vmem:[#allocation11] sm:$0xff] %v6140_v47 }
 0x514   :  { %8463 = shalt.err (!%p8460_p2)
}
 0x515   :  { %s8464_s6 = scalar_lea.hbm %s8665_s5, 128 }
 0x516   :  { %p8465_p3 = scmp.ne.s32.totalorder %s8665_s5, %s8464_s6  ;;  %p8468_p4 = scmp.lt.u32.totalorder %s8464_s6, %s8665_s5 }
 0x518   :  { %p8470_p5 = pnand %p8468_p4, %p8465_p3 }
 0x51a   :  { %8473 = shalt.err (!%p8470_p5)
}
 0x51b   :  { %6155 = dma.vmem_to_hbm [thread:$0]  %s6153_s28, 128, %s8665_s5, [#allocation4]  }
 0x51c   :  { %8480 = dma.done.wait [#allocation4], 128  }
 0x51d   :  { %8481 = vsyncadd [#allocation4], 4294967168 }
 0x51e   :  { %6159 = vsyncpa [#allocation3], 1 }
 0x51f   :  { %6160 = vsyncpa [#allocation6], 1 }
 0x520   :  { %6161 = vsyncpa [#allocation9], 1 }
 0x521   :  { %6162 = vsyncpa [#allocation4], 1 }

</bundles_post_ra>
